<compile_context>
chip_gen: v7x
topology: tpu7x:2x2x1
jax: 0.10.0
libtpu: 0.0.40
codegen_flags: <defaults>
</compile_context>

<pallas_src>
import functools
import numpy as np
import jax
import jax.numpy as jnp
from jax.experimental import pallas as pl
from jax.experimental.pallas import tpu as pltpu

LN_EPS = 1e-5  # torch.nn.LayerNorm default


# ----------------------------------------------------------------------------
# small math helpers usable inside Pallas kernels
# ----------------------------------------------------------------------------
def _erf_approx(x):
    # Abramowitz & Stegun 7.1.26 rational approximation (max abs err ~1.5e-7).
    ax = jnp.abs(x)
    t = 1.0 / (1.0 + 0.3275911 * ax)
    poly = t * (0.254829592 + t * (-0.284496736 + t * (1.421413741
               + t * (-1.453152027 + t * 1.061405429))))
    y = 1.0 - poly * jnp.exp(-ax * ax)
    return jnp.where(x >= 0, y, -y)


def _gelu_exact_inkernel(x):
    # nn.GELU default is the erf form.
    return 0.5 * x * (1.0 + _erf_approx(x * 0.7071067811865476))


def _layernorm(x, g, b):
    mu = jnp.mean(x, axis=-1, keepdims=True)
    var = jnp.mean((x - mu) ** 2, axis=-1, keepdims=True)
    return (x - mu) * jax.lax.rsqrt(var + LN_EPS) * g + b


# ----------------------------------------------------------------------------
# Pallas kernels
# ----------------------------------------------------------------------------
def _attn_kernel(*refs, WPS, N, C, D, nh, hd, nW, scale, use_mask, compute_dtype):
    """norm1 + window MHSA + output projection for a batch of WPS windows."""
    if use_mask:
        (x_ref, mask_ref, bias_ref, g_ref, b_ref, wqkv_ref, bqkv_ref,
         wp_ref, bp_ref, o_ref, qkv_s, ctx_s) = refs
    else:
        (x_ref, bias_ref, g_ref, b_ref, wqkv_ref, bqkv_ref,
         wp_ref, bp_ref, o_ref, qkv_s, ctx_s) = refs
        mask_ref = None

    R = WPS * N
    x = x_ref[...].reshape(R, C)                              # (R, C) f32
    xn = _layernorm(x, g_ref[...], b_ref[...])                # norm1, f32

    # Fused QKV projection: one wide MXU matmul over all batched rows,
    # bf16 operands, f32 accumulation; staged in VMEM scratch for cheap slicing.
    qkv_s[...] = jnp.dot(xn.astype(compute_dtype), wqkv_ref[...],
                         preferred_element_type=jnp.float32) + bqkv_ref[...]

    # Small (N, N) attention per window/head, in-register.  WPS and nh are small
    # compile-time constants, so a static unroll is fine.
    for w in range(WPS):
        r0 = w * N
        for h in range(nh):
            c0 = h * hd
            q = qkv_s[r0:r0 + N, c0:c0 + hd]                   # (N, hd) f32
            k = qkv_s[r0:r0 + N, D + c0:D + c0 + hd]
            v = qkv_s[r0:r0 + N, 2 * D + c0:2 * D + c0 + hd]
            s = jax.lax.dot_general(q, k, (((1,), (1,)), ((), ())),
                                    preferred_element_type=jnp.float32) * scale
            s = s + bias_ref[h]                                # rel-pos bias
            if use_mask:
                s = s + mask_ref[w % nW]                       # shift mask (resident)
            s = s - jnp.max(s, axis=-1, keepdims=True)
            e = jnp.exp(s)
            p = e * pl.reciprocal(jnp.sum(e, axis=-1, keepdims=True), approx=True)
            ctx_s[r0:r0 + N, c0:c0 + hd] = jnp.dot(
                p, v, preferred_element_type=jnp.float32)

    # Single output projection over the concatenated per-head context.
    out = jnp.dot(ctx_s[...].astype(compute_dtype), wp_ref[...],
                  preferred_element_type=jnp.float32) + bp_ref[...]
    o_ref[...] = out.reshape(WPS, N, C)


def _mlp_kernel(sc_ref, at_ref, g_ref, b_ref, w1_ref, b1_ref, w2_ref, b2_ref,
                o_ref, *, compute_dtype):
    """Fused: x = shortcut + attn ; out = x + fc2(gelu(fc1(norm2(x))))."""
    x = sc_ref[...] + at_ref[...]                              # first residual (f32)
    xn = _layernorm(x, g_ref[...], b_ref[...])                 # norm2
    h = jnp.dot(xn.astype(compute_dtype), w1_ref[...],
                preferred_element_type=jnp.float32) + b1_ref[...]
    h = _gelu_exact_inkernel(h)
    y = jnp.dot(h.astype(compute_dtype), w2_ref[...],
                preferred_element_type=jnp.float32) + b2_ref[...]
    o_ref[...] = x + y                                         # second residual


# ----------------------------------------------------------------------------
# pallas_call wrappers
# ----------------------------------------------------------------------------
def _full_spec(shape):
    nd = len(shape)
    return pl.BlockSpec(shape, lambda i, nd=nd: (0,) * nd)


def window_attention_pallas(x_win, mask, rel_bias, p, cfg, wps, compute_dtype):
    Bw, N, C = x_win.shape
    nh, hd = cfg["num_heads"], cfg["head_dim"]
    D = nh * hd
    use_mask = mask is not None
    nW = mask.shape[0] if use_mask else 0
    scale = hd ** -0.5
    R = wps * N
    assert Bw % wps == 0
    if use_mask:
        assert wps % nW == 0, "window batch must cover whole mask periods"

    kernel = functools.partial(
        _attn_kernel, WPS=wps, N=N, C=C, D=D, nh=nh, hd=hd, nW=nW,
        scale=scale, use_mask=use_mask, compute_dtype=compute_dtype)

    in_specs = [pl.BlockSpec((wps, N, C), lambda i: (i, 0, 0))]
    args = [x_win]
    if use_mask:
        in_specs.append(_full_spec((nW, N, N)))                # resident, no tiling
        args.append(mask)
    in_specs += [
        _full_spec((nh, N, N)),                                # rel-pos bias
        _full_spec((1, C)), _full_spec((1, C)),                # norm1 gamma/beta
        _full_spec((C, 3 * D)), _full_spec((1, 3 * D)),        # fused Wqkv, bqkv
        _full_spec((D, C)), _full_spec((1, C)),                # Wproj, bproj
    ]
    args += [rel_bias, p["ln1_g"], p["ln1_b"],
             p["wqkv"], p["bqkv"], p["wp"], p["bp"]]

    wbytes = jnp.dtype(compute_dtype).itemsize
    flops = Bw * (2 * N * C * 3 * D + 4 * nh * N * N * hd + 2 * N * D * C)
    bytes_acc = (2 * Bw * N * C * 4                            # activations in/out
                 + (C * 3 * D + D * C) * wbytes                # weights
                 + (nW + nh) * N * N * 4)                      # mask + bias

    return pl.pallas_call(
        kernel,
        out_shape=jax.ShapeDtypeStruct((Bw, N, C), jnp.float32),
        grid=(Bw // wps,),
        in_specs=in_specs,
        out_specs=pl.BlockSpec((wps, N, C), lambda i: (i, 0, 0)),
        scratch_shapes=[pltpu.VMEM((R, 3 * D), jnp.float32),   # staged qkv
                        pltpu.VMEM((R, D), jnp.float32)],      # staged context
        compiler_params=pltpu.CompilerParams(dimension_semantics=("parallel",)),
        cost_estimate=pl.CostEstimate(flops=flops,
                                      transcendentals=Bw * nh * N * N,
                                      bytes_accessed=bytes_acc),
    )(*args)


def mlp_block_pallas(shortcut, attn_out, p, tile_rows, compute_dtype):
    M, C = shortcut.shape
    Hd = p["w1"].shape[1]
    assert M % tile_rows == 0

    kernel = functools.partial(_mlp_kernel, compute_dtype=compute_dtype)

    def rows():
        return pl.BlockSpec((tile_rows, C), lambda i: (i, 0))

    wbytes = jnp.dtype(compute_dtype).itemsize
    flops = 4 * M * C * Hd
    bytes_acc = 3 * M * C * 4 + 2 * C * Hd * wbytes

    return pl.pallas_call(
        kernel,
        out_shape=jax.ShapeDtypeStruct((M, C), jnp.float32),
        grid=(M // tile_rows,),
        in_specs=[rows(), rows(),
                  _full_spec((1, C)), _full_spec((1, C)),
                  _full_spec((C, Hd)), _full_spec((1, Hd)),
                  _full_spec((Hd, C)), _full_spec((1, C))],
        out_specs=rows(),
        compiler_params=pltpu.CompilerParams(dimension_semantics=("parallel",)),
        cost_estimate=pl.CostEstimate(flops=flops, transcendentals=M * Hd,
                                      bytes_accessed=bytes_acc),
    )(shortcut, attn_out, p["ln2_g"], p["ln2_b"],
      p["w1"], p["b1"], p["w2"], p["b2"])


# ----------------------------------------------------------------------------
# plain-JAX glue (reshapes, roll, window partition, static tables)
# ----------------------------------------------------------------------------
def window_partition(x, ws):
    B, H, W, C = x.shape
    x = x.reshape(B, H // ws, ws, W // ws, ws, C)
    return jnp.transpose(x, (0, 1, 3, 2, 4, 5)).reshape(-1, ws, ws, C)


def window_reverse(windows, ws, H, W):
    B = windows.shape[0] // ((H // ws) * (W // ws))
    x = windows.reshape(B, H // ws, W // ws, ws, ws, -1)
    return jnp.transpose(x, (0, 1, 3, 2, 4, 5)).reshape(B, H, W, -1)


def calculate_mask_np(H, W, window_size, shift_size):
    img_mask = np.zeros((1, H, W, 1), np.float32)
    slc = [slice(0, -window_size), slice(-window_size, -shift_size),
           slice(-shift_size, None)]
    cnt = 0
    for hs in slc:
        for wsl in slc:
            img_mask[:, hs, wsl, :] = cnt
            cnt += 1
    mw = img_mask.reshape(1, H // window_size, window_size,
                          W // window_size, window_size, 1)
    mw = mw.transpose(0, 1, 3, 2, 4, 5).reshape(-1, window_size * window_size)
    attn_mask = mw[:, None, :] - mw[:, :, None]
    return np.where(attn_mask == 0, 0.0, -100.0).astype(np.float32)   # (nW, N, N)


def make_rel_bias(table, ws, nh):
    coords = np.stack(np.meshgrid(np.arange(ws), np.arange(ws), indexing="ij"))
    cf = coords.reshape(2, -1)
    rel = (cf[:, :, None] - cf[:, None, :]).transpose(1, 2, 0).astype(np.int64)
    rel[:, :, 0] += ws - 1
    rel[:, :, 1] += ws - 1
    rel[:, :, 0] *= 2 * ws - 1
    idx = rel.sum(-1).reshape(-1)
    N = ws * ws
    bias = table[jnp.asarray(idx)].reshape(N, N, nh)
    return jnp.transpose(bias, (2, 0, 1)).astype(jnp.float32)          # (nh, N, N)


def _choose_window_batch(Bw, nW, N, target_rows=256):
    """Largest multiple of nW dividing Bw, stopping once rows >= target_rows."""
    best = nW
    m = 1
    while m * nW <= Bw:
        cand = m * nW
        if Bw % cand == 0:
            best = cand
            if cand * N >= target_rows:
                break
        m += 1
    return best


def _largest_divisor_leq(n, cap):
    best = 1
    for t in range(1, min(n, cap) + 1):
        if n % t == 0:
            best = t
    return best


def swin_block_forward(x, x_size, p, cfg, compute_dtype=jnp.bfloat16):
    H, W = x_size
    B, L, C = x.shape
    ws, shift = cfg["window_size"], cfg["shift_size"]
    nh, hd = cfg["num_heads"], cfg["head_dim"]
    N = ws * ws
    nW = (H // ws) * (W // ws)

    # One-time weight prep outside the kernels: fuse QKV and cast matmul weights
    # to the compute dtype (bf16 on all generations; accumulation stays f32).
    pp = dict(p)
    pp["wqkv"] = jnp.concatenate([p["wq"], p["wk"], p["wv"]], axis=1).astype(compute_dtype)
    pp["bqkv"] = jnp.concatenate([p["bq"], p["bk"], p["bv"]], axis=1)   # f32
    pp["wp"] = p["wp"].astype(compute_dtype)
    pp["w1"] = p["w1"].astype(compute_dtype)
    pp["w2"] = p["w2"].astype(compute_dtype)

    xs = x.reshape(B, H, W, C)
    if shift > 0:
        xs = jnp.roll(xs, shift=(-shift, -shift), axis=(1, 2))
    xw = window_partition(xs, ws).reshape(-1, N, C)
    Bw = xw.shape[0]

    mask = jnp.asarray(calculate_mask_np(H, W, ws, shift)) if shift > 0 else None
    rel_bias = make_rel_bias(p["rel_table"], ws, nh)

    # Batch enough windows per grid step that the QKV/proj matmuls are MXU-shaped
    # (>=256 rows targeted; smaller demos fall back to all windows in one step).
    wps = _choose_window_batch(Bw, nW, N, target_rows=256)
    attn_win = window_attention_pallas(xw, mask, rel_bias, pp, cfg, wps, compute_dtype)

    attn_win = attn_win.reshape(-1, ws, ws, C)
    sx = window_reverse(attn_win, ws, H, W)
    if shift > 0:
        sx = jnp.roll(sx, shift=(shift, shift), axis=(1, 2))

    M = B * L
    tile_rows = _largest_divisor_leq(M, 512)      # large row tiles (fits VMEM easily)
    out = mlp_block_pallas(x.reshape(M, C), sx.reshape(M, C), pp,
                           tile_rows, compute_dtype)
    return out.reshape(B, L, C)


# ----------------------------------------------------------------------------
# pure-JAX reference (mirrors the PyTorch forward) for verification.
# compute_dtype mirrors the kernel's bf16-operand / f32-accumulate matmuls.
# ----------------------------------------------------------------------------
def reference_forward(x, x_size, p, cfg, compute_dtype=jnp.float32):
    H, W = x_size
    B, L, C = x.shape
    ws, shift = cfg["window_size"], cfg["shift_size"]
    nh, hd = cfg["num_heads"], cfg["head_dim"]
    D = nh * hd
    scale = hd ** -0.5
    N = ws * ws
    nW = (H // ws) * (W // ws)
    cd = compute_dtype

    def ln(v, g, b):
        mu = jnp.mean(v, -1, keepdims=True)
        var = jnp.mean((v - mu) ** 2, -1, keepdims=True)
        return (v - mu) / jnp.sqrt(var + LN_EPS) * g + b

    def mm(a, w):
        return jnp.dot(a.astype(cd), w.astype(cd),
                       preferred_element_type=jnp.float32)

    shortcut = x
    xn = ln(x, p["ln1_g"][0], p["ln1_b"][0]).reshape(B, H, W, C)
    if shift > 0:
        xn = jnp.roll(xn, (-shift, -shift), (1, 2))
    xw = window_partition(xn, ws).reshape(-1, N, C)
    Bw = xw.shape[0]

    q = (mm(xw, p["wq"]) + p["bq"][0]).reshape(Bw, N, nh, hd).transpose(0, 2, 1, 3)
    k = (mm(xw, p["wk"]) + p["bk"][0]).reshape(Bw, N, nh, hd).transpose(0, 2, 1, 3)
    v = (mm(xw, p["wv"]) + p["bv"][0]).reshape(Bw, N, nh, hd).transpose(0, 2, 1, 3)
    attn = jnp.einsum("bhnd,bhmd->bhnm", q, k,
                      precision=jax.lax.Precision.HIGHEST) * scale
    attn = attn + make_rel_bias(p["rel_table"], ws, nh)[None]
    if shift > 0:
        mask = jnp.asarray(calculate_mask_np(H, W, ws, shift))
        attn = attn.reshape(Bw // nW, nW, nh, N, N) + mask[None, :, None]
        attn = attn.reshape(Bw, nh, N, N)
    attn = jax.nn.softmax(attn, -1)
    out = jnp.einsum("bhnm,bhmd->bhnd", attn, v,
                     precision=jax.lax.Precision.HIGHEST)
    out = out.transpose(0, 2, 1, 3).reshape(Bw, N, D)
    out = mm(out, p["wp"]) + p["bp"][0]
    sx = window_reverse(out.reshape(-1, ws, ws, C), ws, H, W)
    if shift > 0:
        sx = jnp.roll(sx, (shift, shift), (1, 2))
    xr = shortcut + sx.reshape(B, L, C)

    xn2 = ln(xr, p["ln2_g"][0], p["ln2_b"][0])
    h = mm(xn2, p["w1"]) + p["b1"][0]
    h = 0.5 * h * (1.0 + jax.lax.erf(h * 0.7071067811865476))   # exact erf GELU
    return xr + (mm(h, p["w2"]) + p["b2"][0])


# ----------------------------------------------------------------------------
# deterministic parameter init (shapes from the module __init__)
# ----------------------------------------------------------------------------
def init_params(key, C, num_heads, head_dim, hidden, window_size):
    D = num_heads * head_dim
    table_len = (2 * window_size - 1) * (2 * window_size - 1)
    ks = jax.random.split(key, 13)
    nrm = lambda k, shape, s: (s * jax.random.normal(k, shape)).astype(jnp.float32)
    return dict(
        ln1_g=jnp.ones((1, C), jnp.float32), ln1_b=jnp.zeros((1, C), jnp.float32),
        ln2_g=jnp.ones((1, C), jnp.float32), ln2_b=jnp.zeros((1, C), jnp.float32),
        wq=nrm(ks[0], (C, D), 0.1), bq=nrm(ks[1], (1, D), 0.05),
        wk=nrm(ks[2], (C, D), 0.1), bk=nrm(ks[3], (1, D), 0.05),
        wv=nrm(ks[4], (C, D), 0.1), bv=nrm(ks[5], (1, D), 0.05),
        wp=nrm(ks[6], (D, C), 0.1), bp=nrm(ks[7], (1, C), 0.05),
        w1=nrm(ks[8], (C, hidden), 0.1), b1=nrm(ks[9], (1, hidden), 0.05),
        w2=nrm(ks[10], (hidden, C), 0.1), b2=nrm(ks[11], (1, C), 0.05),
        rel_table=nrm(ks[12], (table_len, num_heads), 0.02),
    )


if __name__ == "__main__":
    cfg = dict(embed_dim=32, num_heads=2, head_dim=16,   # head_dim hard-coded to 16 in module
               window_size=4, shift_size=2, mlp_ratio=2.0)
    B, H, W = 2, 8, 8
    C = cfg["embed_dim"]
    hidden = int(C * cfg["mlp_ratio"])

    key = jax.random.PRNGKey(0)
    kx, kp = jax.random.split(key)
    x = jax.random.normal(kx, (B, H * W, C), jnp.float32)
    params = init_params(kp, C, cfg["num_heads"], cfg["head_dim"],
                         hidden, cfg["window_size"])

    # (shift, compute_dtype): exercise masked + unmasked kernel variants, and both
    # the exact-f32 and bf16-operand paths (reference mirrors the operand dtype).
    configs = [(2, jnp.float32), (2, jnp.bfloat16), (0, jnp.bfloat16)]
    for shift, cd in configs:
        c = dict(cfg, shift_size=shift)
        out = jax.block_until_ready(
            swin_block_forward(x, (H, W), params, c, compute_dtype=cd))
        ref = jax.block_until_ready(
            reference_forward(x, (H, W), params, c, compute_dtype=cd))
        assert out.shape == (B, H * W, C)
        np.testing.assert_allclose(np.asarray(out), np.asarray(ref),
                                   rtol=2e-2, atol=2e-2)
    print("KERNEL_OK")
</pallas_src>

<mosaic_0001>
module attributes {stable_mosaic.version = 11 : i64} {
  func.func @_attn_kernel(%arg0: i32, %arg1: memref<8x16x32xf32, #tpu.memory_space<vmem>>, %arg2: memref<4x16x16xf32, #tpu.memory_space<vmem>>, %arg3: memref<2x16x16xf32, #tpu.memory_space<vmem>>, %arg4: memref<1x32xf32, #tpu.memory_space<vmem>>, %arg5: memref<1x32xf32, #tpu.memory_space<vmem>>, %arg6: memref<32x96xf32, #tpu.memory_space<vmem>>, %arg7: memref<1x96xf32, #tpu.memory_space<vmem>>, %arg8: memref<32x32xf32, #tpu.memory_space<vmem>>, %arg9: memref<1x32xf32, #tpu.memory_space<vmem>>, %arg10: memref<8x16x32xf32, #tpu.memory_space<vmem>>, %arg11: memref<128x96xf32, #tpu.memory_space<vmem>>, %arg12: memref<128x32xf32, #tpu.memory_space<vmem>>) attributes {dimension_semantics = [#tpu.dimension_semantics<parallel>], iteration_bounds = array<i64: 1>, scalar_prefetch = 0 : i64, scratch_operands = 2 : i64, tpu.core_type = #tpu.core_type<tc>, window_params = [{transform_indices = @transform_0, window_bounds = array<i64: 8, 16, 32>}, {pipeline_mode = #tpu.pipeline_mode<synchronous>, transform_indices = @transform_1, window_bounds = array<i64: 4, 16, 16>}, {pipeline_mode = #tpu.pipeline_mode<synchronous>, transform_indices = @transform_2, window_bounds = array<i64: 2, 16, 16>}, {pipeline_mode = #tpu.pipeline_mode<synchronous>, transform_indices = @transform_3, window_bounds = array<i64: 1, 32>}, {pipeline_mode = #tpu.pipeline_mode<synchronous>, transform_indices = @transform_4, window_bounds = array<i64: 1, 32>}, {pipeline_mode = #tpu.pipeline_mode<synchronous>, transform_indices = @transform_5, window_bounds = array<i64: 32, 96>}, {pipeline_mode = #tpu.pipeline_mode<synchronous>, transform_indices = @transform_6, window_bounds = array<i64: 1, 96>}, {pipeline_mode = #tpu.pipeline_mode<synchronous>, transform_indices = @transform_7, window_bounds = array<i64: 32, 32>}, {pipeline_mode = #tpu.pipeline_mode<synchronous>, transform_indices = @transform_8, window_bounds = array<i64: 1, 32>}, {transform_indices = @transform_9, window_bounds = array<i64: 8, 16, 32>}]} {
    %c0 = arith.constant 0 : index
    %c0_0 = arith.constant 0 : index
    %c0_1 = arith.constant 0 : index
    %0 = vector.load %arg1[%c0, %c0_0, %c0_1] : memref<8x16x32xf32, #tpu.memory_space<vmem>>, vector<8x16x32xf32>
    %1 = vector.shape_cast %0 : vector<8x16x32xf32> to vector<128x32xf32>
    %c0_2 = arith.constant 0 : index
    %c0_3 = arith.constant 0 : index
    %2 = vector.load %arg4[%c0_2, %c0_3] : memref<1x32xf32, #tpu.memory_space<vmem>>, vector<1x32xf32>
    %c0_4 = arith.constant 0 : index
    %c0_5 = arith.constant 0 : index
    %3 = vector.load %arg5[%c0_4, %c0_5] : memref<1x32xf32, #tpu.memory_space<vmem>>, vector<1x32xf32>
    %cst = arith.constant dense<0.000000e+00> : vector<128xf32>
    %4 = vector.multi_reduction <add>, %1, %cst [1] : vector<128x32xf32> to vector<128xf32>
    %5 = vector.shape_cast %4 : vector<128xf32> to vector<128x1xf32>
    %cst_6 = arith.constant 3.200000e+01 : f32
    %6 = vector.broadcast %cst_6 : f32 to vector<128x1xf32>
    %7 = arith.divf %5, %6 : vector<128x1xf32>
    %8 = vector.broadcast %7 : vector<128x1xf32> to vector<128x32xf32>
    %9 = arith.subf %1, %8 : vector<128x32xf32>
    %10 = arith.mulf %9, %9 : vector<128x32xf32>
    %cst_7 = arith.constant dense<0.000000e+00> : vector<128xf32>
    %11 = vector.multi_reduction <add>, %10, %cst_7 [1] : vector<128x32xf32> to vector<128xf32>
    %12 = vector.shape_cast %11 : vector<128xf32> to vector<128x1xf32>
    %cst_8 = arith.constant 3.200000e+01 : f32
    %13 = vector.broadcast %cst_8 : f32 to vector<128x1xf32>
    %14 = arith.divf %12, %13 : vector<128x1xf32>
    %15 = vector.broadcast %7 : vector<128x1xf32> to vector<128x32xf32>
    %16 = arith.subf %1, %15 : vector<128x32xf32>
    %cst_9 = arith.constant 9.99999974E-6 : f32
    %17 = vector.broadcast %cst_9 : f32 to vector<128x1xf32>
    %18 = arith.addf %14, %17 : vector<128x1xf32>
    %19 = math.rsqrt %18 : vector<128x1xf32>
    %20 = vector.broadcast %19 : vector<128x1xf32> to vector<128x32xf32>
    %21 = arith.mulf %16, %20 : vector<128x32xf32>
    %22 = vector.broadcast %2 : vector<1x32xf32> to vector<128x32xf32>
    %23 = arith.mulf %21, %22 : vector<128x32xf32>
    %24 = vector.broadcast %3 : vector<1x32xf32> to vector<128x32xf32>
    %25 = arith.addf %23, %24 : vector<128x32xf32>
    %c0_10 = arith.constant 0 : index
    %c0_11 = arith.constant 0 : index
    %26 = vector.load %arg6[%c0_10, %c0_11] : memref<32x96xf32, #tpu.memory_space<vmem>>, vector<32x96xf32>
    %cst_12 = arith.constant dense<0.000000e+00> : vector<128x96xf32>
    %27 = tpu.matmul %25, %26, %cst_12 {dimension_numbers = #tpu.dot_dimension_numbers<[1], [0], [0], [1], [0, 0, 1, 1], [], []>} : vector<128x32xf32>, vector<32x96xf32>, vector<128x96xf32> -> vector<128x96xf32>
    %c0_13 = arith.constant 0 : index
    %c0_14 = arith.constant 0 : index
    %28 = vector.load %arg7[%c0_13, %c0_14] : memref<1x96xf32, #tpu.memory_space<vmem>>, vector<1x96xf32>
    %29 = vector.broadcast %28 : vector<1x96xf32> to vector<128x96xf32>
    %30 = arith.addf %27, %29 : vector<128x96xf32>
    %c0_15 = arith.constant 0 : index
    %c0_16 = arith.constant 0 : index
    %31 = vector.load %arg11[%c0_15, %c0_16] : memref<128x96xf32, #tpu.memory_space<vmem>>, vector<128x96xf32>
    tpu.vector_store %arg11[%c0_15, %c0_16], %30 {strides = array<i32>} : memref<128x96xf32, #tpu.memory_space<vmem>>, vector<128x96xf32>,
    %c0_17 = arith.constant 0 : index
    %c0_18 = arith.constant 0 : index
    %32 = vector.load %arg11[%c0_17, %c0_18] : memref<128x96xf32, #tpu.memory_space<vmem>>, vector<16x16xf32>
    %c0_19 = arith.constant 0 : index
    %c32 = arith.constant 32 : index
    %33 = vector.load %arg11[%c0_19, %c32] : memref<128x96xf32, #tpu.memory_space<vmem>>, vector<16x16xf32>
    %c0_20 = arith.constant 0 : index
    %c64 = arith.constant 64 : index
    %34 = vector.load %arg11[%c0_20, %c64] : memref<128x96xf32, #tpu.memory_space<vmem>>, vector<16x16xf32>
    %cst_21 = arith.constant dense<0.000000e+00> : vector<16x16xf32>
    %35 = tpu.matmul %32, %33, %cst_21 {dimension_numbers = #tpu.dot_dimension_numbers<[1], [1], [0], [0], [0, 0, 1, 0], [], []>} : vector<16x16xf32>, vector<16x16xf32>, vector<16x16xf32> -> vector<16x16xf32>
    %cst_22 = arith.constant 2.500000e-01 : f32
    %36 = vector.broadcast %cst_22 : f32 to vector<16x16xf32>
    %37 = arith.mulf %35, %36 : vector<16x16xf32>
    %c0_23 = arith.constant 0 : index
    %c0_24 = arith.constant 0 : index
    %c0_25 = arith.constant 0 : index
    %38 = vector.load %arg3[%c0_23, %c0_24, %c0_25] : memref<2x16x16xf32, #tpu.memory_space<vmem>>, vector<1x16x16xf32>
    %39 = vector.shape_cast %38 : vector<1x16x16xf32> to vector<16x16xf32>
    %40 = arith.addf %37, %39 : vector<16x16xf32>
    %c0_26 = arith.constant 0 : index
    %c0_27 = arith.constant 0 : index
    %c0_28 = arith.constant 0 : index
    %41 = vector.load %arg2[%c0_26, %c0_27, %c0_28] : memref<4x16x16xf32, #tpu.memory_space<vmem>>, vector<1x16x16xf32>
    %42 = vector.shape_cast %41 : vector<1x16x16xf32> to vector<16x16xf32>
    %43 = arith.addf %40, %42 : vector<16x16xf32>
    %cst_29 = arith.constant dense<0xFF800000> : vector<16xf32>
    %44 = vector.multi_reduction <maximumf>, %43, %cst_29 [1] : vector<16x16xf32> to vector<16xf32>
    %45 = vector.shape_cast %44 : vector<16xf32> to vector<16x1xf32>
    %46 = vector.broadcast %45 : vector<16x1xf32> to vector<16x16xf32>
    %47 = arith.subf %43, %46 : vector<16x16xf32>
    %48 = math.exp %47 : vector<16x16xf32>
    %cst_30 = arith.constant dense<0.000000e+00> : vector<16xf32>
    %49 = vector.multi_reduction <add>, %48, %cst_30 [1] : vector<16x16xf32> to vector<16xf32>
    %50 = vector.shape_cast %49 : vector<16xf32> to vector<16x1xf32>
    %51 = tpu.reciprocal %50 {approx = true} : vector<16x1xf32> -> vector<16x1xf32>
    %52 = vector.broadcast %51 : vector<16x1xf32> to vector<16x16xf32>
    %53 = arith.mulf %48, %52 : vector<16x16xf32>
    %cst_31 = arith.constant dense<0.000000e+00> : vector<16x16xf32>
    %54 = tpu.matmul %53, %34, %cst_31 {dimension_numbers = #tpu.dot_dimension_numbers<[1], [0], [0], [1], [0, 0, 1, 1], [], []>} : vector<16x16xf32>, vector<16x16xf32>, vector<16x16xf32> -> vector<16x16xf32>
    %c0_32 = arith.constant 0 : index
    %c0_33 = arith.constant 0 : index
    %55 = vector.load %arg12[%c0_32, %c0_33] : memref<128x32xf32, #tpu.memory_space<vmem>>, vector<16x16xf32>
    tpu.vector_store %arg12[%c0_32, %c0_33], %54 {strides = array<i32>} : memref<128x32xf32, #tpu.memory_space<vmem>>, vector<16x16xf32>,
    %c0_34 = arith.constant 0 : index
    %c16 = arith.constant 16 : index
    %56 = vector.load %arg11[%c0_34, %c16] : memref<128x96xf32, #tpu.memory_space<vmem>>, vector<16x16xf32>
    %c0_35 = arith.constant 0 : index
    %c48 = arith.constant 48 : index
    %57 = vector.load %arg11[%c0_35, %c48] : memref<128x96xf32, #tpu.memory_space<vmem>>, vector<16x16xf32>
    %c0_36 = arith.constant 0 : index
    %c80 = arith.constant 80 : index
    %58 = vector.load %arg11[%c0_36, %c80] : memref<128x96xf32, #tpu.memory_space<vmem>>, vector<16x16xf32>
    %cst_37 = arith.constant dense<0.000000e+00> : vector<16x16xf32>
    %59 = tpu.matmul %56, %57, %cst_37 {dimension_numbers = #tpu.dot_dimension_numbers<[1], [1], [0], [0], [0, 0, 1, 0], [], []>} : vector<16x16xf32>, vector<16x16xf32>, vector<16x16xf32> -> vector<16x16xf32>
    %cst_38 = arith.constant 2.500000e-01 : f32
    %60 = vector.broadcast %cst_38 : f32 to vector<16x16xf32>
    %61 = arith.mulf %59, %60 : vector<16x16xf32>
    %c1 = arith.constant 1 : index
    %c0_39 = arith.constant 0 : index
    %c0_40 = arith.constant 0 : index
    %62 = vector.load %arg3[%c1, %c0_39, %c0_40] : memref<2x16x16xf32, #tpu.memory_space<vmem>>, vector<1x16x16xf32>
    %63 = vector.shape_cast %62 : vector<1x16x16xf32> to vector<16x16xf32>
    %64 = arith.addf %61, %63 : vector<16x16xf32>
    %c0_41 = arith.constant 0 : index
    %c0_42 = arith.constant 0 : index
    %c0_43 = arith.constant 0 : index
    %65 = vector.load %arg2[%c0_41, %c0_42, %c0_43] : memref<4x16x16xf32, #tpu.memory_space<vmem>>, vector<1x16x16xf32>
    %66 = vector.shape_cast %65 : vector<1x16x16xf32> to vector<16x16xf32>
    %67 = arith.addf %64, %66 : vector<16x16xf32>
    %cst_44 = arith.constant dense<0xFF800000> : vector<16xf32>
    %68 = vector.multi_reduction <maximumf>, %67, %cst_44 [1] : vector<16x16xf32> to vector<16xf32>
    %69 = vector.shape_cast %68 : vector<16xf32> to vector<16x1xf32>
    %70 = vector.broadcast %69 : vector<16x1xf32> to vector<16x16xf32>
    %71 = arith.subf %67, %70 : vector<16x16xf32>
    %72 = math.exp %71 : vector<16x16xf32>
    %cst_45 = arith.constant dense<0.000000e+00> : vector<16xf32>
    %73 = vector.multi_reduction <add>, %72, %cst_45 [1] : vector<16x16xf32> to vector<16xf32>
    %74 = vector.shape_cast %73 : vector<16xf32> to vector<16x1xf32>
    %75 = tpu.reciprocal %74 {approx = true} : vector<16x1xf32> -> vector<16x1xf32>
    %76 = vector.broadcast %75 : vector<16x1xf32> to vector<16x16xf32>
    %77 = arith.mulf %72, %76 : vector<16x16xf32>
    %cst_46 = arith.constant dense<0.000000e+00> : vector<16x16xf32>
    %78 = tpu.matmul %77, %58, %cst_46 {dimension_numbers = #tpu.dot_dimension_numbers<[1], [0], [0], [1], [0, 0, 1, 1], [], []>} : vector<16x16xf32>, vector<16x16xf32>, vector<16x16xf32> -> vector<16x16xf32>
    %c0_47 = arith.constant 0 : index
    %c16_48 = arith.constant 16 : index
    %79 = vector.load %arg12[%c0_47, %c16_48] : memref<128x32xf32, #tpu.memory_space<vmem>>, vector<16x16xf32>
    tpu.vector_store %arg12[%c0_47, %c16_48], %78 {strides = array<i32>} : memref<128x32xf32, #tpu.memory_space<vmem>>, vector<16x16xf32>,
    %c16_49 = arith.constant 16 : index
    %c0_50 = arith.constant 0 : index
    %80 = vector.load %arg11[%c16_49, %c0_50] : memref<128x96xf32, #tpu.memory_space<vmem>>, vector<16x16xf32>
    %c16_51 = arith.constant 16 : index
    %c32_52 = arith.constant 32 : index
    %81 = vector.load %arg11[%c16_51, %c32_52] : memref<128x96xf32, #tpu.memory_space<vmem>>, vector<16x16xf32>
    %c16_53 = arith.constant 16 : index
    %c64_54 = arith.constant 64 : index
    %82 = vector.load %arg11[%c16_53, %c64_54] : memref<128x96xf32, #tpu.memory_space<vmem>>, vector<16x16xf32>
    %cst_55 = arith.constant dense<0.000000e+00> : vector<16x16xf32>
    %83 = tpu.matmul %80, %81, %cst_55 {dimension_numbers = #tpu.dot_dimension_numbers<[1], [1], [0], [0], [0, 0, 1, 0], [], []>} : vector<16x16xf32>, vector<16x16xf32>, vector<16x16xf32> -> vector<16x16xf32>
    %cst_56 = arith.constant 2.500000e-01 : f32
    %84 = vector.broadcast %cst_56 : f32 to vector<16x16xf32>
    %85 = arith.mulf %83, %84 : vector<16x16xf32>
    %c0_57 = arith.constant 0 : index
    %c0_58 = arith.constant 0 : index
    %c0_59 = arith.constant 0 : index
    %86 = vector.load %arg3[%c0_57, %c0_58, %c0_59] : memref<2x16x16xf32, #tpu.memory_space<vmem>>, vector<1x16x16xf32>
    %87 = vector.shape_cast %86 : vector<1x16x16xf32> to vector<16x16xf32>
    %88 = arith.addf %85, %87 : vector<16x16xf32>
    %c1_60 = arith.constant 1 : index
    %c0_61 = arith.constant 0 : index
    %c0_62 = arith.constant 0 : index
    %89 = vector.load %arg2[%c1_60, %c0_61, %c0_62] : memref<4x16x16xf32, #tpu.memory_space<vmem>>, vector<1x16x16xf32>
    %90 = vector.shape_cast %89 : vector<1x16x16xf32> to vector<16x16xf32>
    %91 = arith.addf %88, %90 : vector<16x16xf32>
    %cst_63 = arith.constant dense<0xFF800000> : vector<16xf32>
    %92 = vector.multi_reduction <maximumf>, %91, %cst_63 [1] : vector<16x16xf32> to vector<16xf32>
    %93 = vector.shape_cast %92 : vector<16xf32> to vector<16x1xf32>
    %94 = vector.broadcast %93 : vector<16x1xf32> to vector<16x16xf32>
    %95 = arith.subf %91, %94 : vector<16x16xf32>
    %96 = math.exp %95 : vector<16x16xf32>
    %cst_64 = arith.constant dense<0.000000e+00> : vector<16xf32>
    %97 = vector.multi_reduction <add>, %96, %cst_64 [1] : vector<16x16xf32> to vector<16xf32>
    %98 = vector.shape_cast %97 : vector<16xf32> to vector<16x1xf32>
    %99 = tpu.reciprocal %98 {approx = true} : vector<16x1xf32> -> vector<16x1xf32>
    %100 = vector.broadcast %99 : vector<16x1xf32> to vector<16x16xf32>
    %101 = arith.mulf %96, %100 : vector<16x16xf32>
    %cst_65 = arith.constant dense<0.000000e+00> : vector<16x16xf32>
    %102 = tpu.matmul %101, %82, %cst_65 {dimension_numbers = #tpu.dot_dimension_numbers<[1], [0], [0], [1], [0, 0, 1, 1], [], []>} : vector<16x16xf32>, vector<16x16xf32>, vector<16x16xf32> -> vector<16x16xf32>
    %c16_66 = arith.constant 16 : index
    %c0_67 = arith.constant 0 : index
    %103 = vector.load %arg12[%c16_66, %c0_67] : memref<128x32xf32, #tpu.memory_space<vmem>>, vector<16x16xf32>
    tpu.vector_store %arg12[%c16_66, %c0_67], %102 {strides = array<i32>} : memref<128x32xf32, #tpu.memory_space<vmem>>, vector<16x16xf32>,
    %c16_68 = arith.constant 16 : index
    %c16_69 = arith.constant 16 : index
    %104 = vector.load %arg11[%c16_68, %c16_69] : memref<128x96xf32, #tpu.memory_space<vmem>>, vector<16x16xf32>
    %c16_70 = arith.constant 16 : index
    %c48_71 = arith.constant 48 : index
    %105 = vector.load %arg11[%c16_70, %c48_71] : memref<128x96xf32, #tpu.memory_space<vmem>>, vector<16x16xf32>
    %c16_72 = arith.constant 16 : index
    %c80_73 = arith.constant 80 : index
    %106 = vector.load %arg11[%c16_72, %c80_73] : memref<128x96xf32, #tpu.memory_space<vmem>>, vector<16x16xf32>
    %cst_74 = arith.constant dense<0.000000e+00> : vector<16x16xf32>
    %107 = tpu.matmul %104, %105, %cst_74 {dimension_numbers = #tpu.dot_dimension_numbers<[1], [1], [0], [0], [0, 0, 1, 0], [], []>} : vector<16x16xf32>, vector<16x16xf32>, vector<16x16xf32> -> vector<16x16xf32>
    %cst_75 = arith.constant 2.500000e-01 : f32
    %108 = vector.broadcast %cst_75 : f32 to vector<16x16xf32>
    %109 = arith.mulf %107, %108 : vector<16x16xf32>
    %c1_76 = arith.constant 1 : index
    %c0_77 = arith.constant 0 : index
    %c0_78 = arith.constant 0 : index
    %110 = vector.load %arg3[%c1_76, %c0_77, %c0_78] : memref<2x16x16xf32, #tpu.memory_space<vmem>>, vector<1x16x16xf32>
    %111 = vector.shape_cast %110 : vector<1x16x16xf32> to vector<16x16xf32>
    %112 = arith.addf %109, %111 : vector<16x16xf32>
    %c1_79 = arith.constant 1 : index
    %c0_80 = arith.constant 0 : index
    %c0_81 = arith.constant 0 : index
    %113 = vector.load %arg2[%c1_79, %c0_80, %c0_81] : memref<4x16x16xf32, #tpu.memory_space<vmem>>, vector<1x16x16xf32>
    %114 = vector.shape_cast %113 : vector<1x16x16xf32> to vector<16x16xf32>
    %115 = arith.addf %112, %114 : vector<16x16xf32>
    %cst_82 = arith.constant dense<0xFF800000> : vector<16xf32>
    %116 = vector.multi_reduction <maximumf>, %115, %cst_82 [1] : vector<16x16xf32> to vector<16xf32>
    %117 = vector.shape_cast %116 : vector<16xf32> to vector<16x1xf32>
    %118 = vector.broadcast %117 : vector<16x1xf32> to vector<16x16xf32>
    %119 = arith.subf %115, %118 : vector<16x16xf32>
    %120 = math.exp %119 : vector<16x16xf32>
    %cst_83 = arith.constant dense<0.000000e+00> : vector<16xf32>
    %121 = vector.multi_reduction <add>, %120, %cst_83 [1] : vector<16x16xf32> to vector<16xf32>
    %122 = vector.shape_cast %121 : vector<16xf32> to vector<16x1xf32>
    %123 = tpu.reciprocal %122 {approx = true} : vector<16x1xf32> -> vector<16x1xf32>
    %124 = vector.broadcast %123 : vector<16x1xf32> to vector<16x16xf32>
    %125 = arith.mulf %120, %124 : vector<16x16xf32>
    %cst_84 = arith.constant dense<0.000000e+00> : vector<16x16xf32>
    %126 = tpu.matmul %125, %106, %cst_84 {dimension_numbers = #tpu.dot_dimension_numbers<[1], [0], [0], [1], [0, 0, 1, 1], [], []>} : vector<16x16xf32>, vector<16x16xf32>, vector<16x16xf32> -> vector<16x16xf32>
    %c16_85 = arith.constant 16 : index
    %c16_86 = arith.constant 16 : index
    %127 = vector.load %arg12[%c16_85, %c16_86] : memref<128x32xf32, #tpu.memory_space<vmem>>, vector<16x16xf32>
    tpu.vector_store %arg12[%c16_85, %c16_86], %126 {strides = array<i32>} : memref<128x32xf32, #tpu.memory_space<vmem>>, vector<16x16xf32>,
    %c32_87 = arith.constant 32 : index
    %c0_88 = arith.constant 0 : index
    %128 = vector.load %arg11[%c32_87, %c0_88] : memref<128x96xf32, #tpu.memory_space<vmem>>, vector<16x16xf32>
    %c32_89 = arith.constant 32 : index
    %c32_90 = arith.constant 32 : index
    %129 = vector.load %arg11[%c32_89, %c32_90] : memref<128x96xf32, #tpu.memory_space<vmem>>, vector<16x16xf32>
    %c32_91 = arith.constant 32 : index
    %c64_92 = arith.constant 64 : index
    %130 = vector.load %arg11[%c32_91, %c64_92] : memref<128x96xf32, #tpu.memory_space<vmem>>, vector<16x16xf32>
    %cst_93 = arith.constant dense<0.000000e+00> : vector<16x16xf32>
    %131 = tpu.matmul %128, %129, %cst_93 {dimension_numbers = #tpu.dot_dimension_numbers<[1], [1], [0], [0], [0, 0, 1, 0], [], []>} : vector<16x16xf32>, vector<16x16xf32>, vector<16x16xf32> -> vector<16x16xf32>
    %cst_94 = arith.constant 2.500000e-01 : f32
    %132 = vector.broadcast %cst_94 : f32 to vector<16x16xf32>
    %133 = arith.mulf %131, %132 : vector<16x16xf32>
    %c0_95 = arith.constant 0 : index
    %c0_96 = arith.constant 0 : index
    %c0_97 = arith.constant 0 : index
    %134 = vector.load %arg3[%c0_95, %c0_96, %c0_97] : memref<2x16x16xf32, #tpu.memory_space<vmem>>, vector<1x16x16xf32>
    %135 = vector.shape_cast %134 : vector<1x16x16xf32> to vector<16x16xf32>
    %136 = arith.addf %133, %135 : vector<16x16xf32>
    %c2 = arith.constant 2 : index
    %c0_98 = arith.constant 0 : index
    %c0_99 = arith.constant 0 : index
    %137 = vector.load %arg2[%c2, %c0_98, %c0_99] : memref<4x16x16xf32, #tpu.memory_space<vmem>>, vector<1x16x16xf32>
    %138 = vector.shape_cast %137 : vector<1x16x16xf32> to vector<16x16xf32>
    %139 = arith.addf %136, %138 : vector<16x16xf32>
    %cst_100 = arith.constant dense<0xFF800000> : vector<16xf32>
    %140 = vector.multi_reduction <maximumf>, %139, %cst_100 [1] : vector<16x16xf32> to vector<16xf32>
    %141 = vector.shape_cast %140 : vector<16xf32> to vector<16x1xf32>
    %142 = vector.broadcast %141 : vector<16x1xf32> to vector<16x16xf32>
    %143 = arith.subf %139, %142 : vector<16x16xf32>
    %144 = math.exp %143 : vector<16x16xf32>
    %cst_101 = arith.constant dense<0.000000e+00> : vector<16xf32>
    %145 = vector.multi_reduction <add>, %144, %cst_101 [1] : vector<16x16xf32> to vector<16xf32>
    %146 = vector.shape_cast %145 : vector<16xf32> to vector<16x1xf32>
    %147 = tpu.reciprocal %146 {approx = true} : vector<16x1xf32> -> vector<16x1xf32>
    %148 = vector.broadcast %147 : vector<16x1xf32> to vector<16x16xf32>
    %149 = arith.mulf %144, %148 : vector<16x16xf32>
    %cst_102 = arith.constant dense<0.000000e+00> : vector<16x16xf32>
    %150 = tpu.matmul %149, %130, %cst_102 {dimension_numbers = #tpu.dot_dimension_numbers<[1], [0], [0], [1], [0, 0, 1, 1], [], []>} : vector<16x16xf32>, vector<16x16xf32>, vector<16x16xf32> -> vector<16x16xf32>
    %c32_103 = arith.constant 32 : index
    %c0_104 = arith.constant 0 : index
    %151 = vector.load %arg12[%c32_103, %c0_104] : memref<128x32xf32, #tpu.memory_space<vmem>>, vector<16x16xf32>
    tpu.vector_store %arg12[%c32_103, %c0_104], %150 {strides = array<i32>} : memref<128x32xf32, #tpu.memory_space<vmem>>, vector<16x16xf32>,
    %c32_105 = arith.constant 32 : index
    %c16_106 = arith.constant 16 : index
    %152 = vector.load %arg11[%c32_105, %c16_106] : memref<128x96xf32, #tpu.memory_space<vmem>>, vector<16x16xf32>
    %c32_107 = arith.constant 32 : index
    %c48_108 = arith.constant 48 : index
    %153 = vector.load %arg11[%c32_107, %c48_108] : memref<128x96xf32, #tpu.memory_space<vmem>>, vector<16x16xf32>
    %c32_109 = arith.constant 32 : index
    %c80_110 = arith.constant 80 : index
    %154 = vector.load %arg11[%c32_109, %c80_110] : memref<128x96xf32, #tpu.memory_space<vmem>>, vector<16x16xf32>
    %cst_111 = arith.constant dense<0.000000e+00> : vector<16x16xf32>
    %155 = tpu.matmul %152, %153, %cst_111 {dimension_numbers = #tpu.dot_dimension_numbers<[1], [1], [0], [0], [0, 0, 1, 0], [], []>} : vector<16x16xf32>, vector<16x16xf32>, vector<16x16xf32> -> vector<16x16xf32>
    %cst_112 = arith.constant 2.500000e-01 : f32
    %156 = vector.broadcast %cst_112 : f32 to vector<16x16xf32>
    %157 = arith.mulf %155, %156 : vector<16x16xf32>
    %c1_113 = arith.constant 1 : index
    %c0_114 = arith.constant 0 : index
    %c0_115 = arith.constant 0 : index
    %158 = vector.load %arg3[%c1_113, %c0_114, %c0_115] : memref<2x16x16xf32, #tpu.memory_space<vmem>>, vector<1x16x16xf32>
    %159 = vector.shape_cast %158 : vector<1x16x16xf32> to vector<16x16xf32>
    %160 = arith.addf %157, %159 : vector<16x16xf32>
    %c2_116 = arith.constant 2 : index
    %c0_117 = arith.constant 0 : index
    %c0_118 = arith.constant 0 : index
    %161 = vector.load %arg2[%c2_116, %c0_117, %c0_118] : memref<4x16x16xf32, #tpu.memory_space<vmem>>, vector<1x16x16xf32>
    %162 = vector.shape_cast %161 : vector<1x16x16xf32> to vector<16x16xf32>
    %163 = arith.addf %160, %162 : vector<16x16xf32>
    %cst_119 = arith.constant dense<0xFF800000> : vector<16xf32>
    %164 = vector.multi_reduction <maximumf>, %163, %cst_119 [1] : vector<16x16xf32> to vector<16xf32>
    %165 = vector.shape_cast %164 : vector<16xf32> to vector<16x1xf32>
    %166 = vector.broadcast %165 : vector<16x1xf32> to vector<16x16xf32>
    %167 = arith.subf %163, %166 : vector<16x16xf32>
    %168 = math.exp %167 : vector<16x16xf32>
    %cst_120 = arith.constant dense<0.000000e+00> : vector<16xf32>
    %169 = vector.multi_reduction <add>, %168, %cst_120 [1] : vector<16x16xf32> to vector<16xf32>
    %170 = vector.shape_cast %169 : vector<16xf32> to vector<16x1xf32>
    %171 = tpu.reciprocal %170 {approx = true} : vector<16x1xf32> -> vector<16x1xf32>
    %172 = vector.broadcast %171 : vector<16x1xf32> to vector<16x16xf32>
    %173 = arith.mulf %168, %172 : vector<16x16xf32>
    %cst_121 = arith.constant dense<0.000000e+00> : vector<16x16xf32>
    %174 = tpu.matmul %173, %154, %cst_121 {dimension_numbers = #tpu.dot_dimension_numbers<[1], [0], [0], [1], [0, 0, 1, 1], [], []>} : vector<16x16xf32>, vector<16x16xf32>, vector<16x16xf32> -> vector<16x16xf32>
    %c32_122 = arith.constant 32 : index
    %c16_123 = arith.constant 16 : index
    %175 = vector.load %arg12[%c32_122, %c16_123] : memref<128x32xf32, #tpu.memory_space<vmem>>, vector<16x16xf32>
    tpu.vector_store %arg12[%c32_122, %c16_123], %174 {strides = array<i32>} : memref<128x32xf32, #tpu.memory_space<vmem>>, vector<16x16xf32>,
    %c48_124 = arith.constant 48 : index
    %c0_125 = arith.constant 0 : index
    %176 = vector.load %arg11[%c48_124, %c0_125] : memref<128x96xf32, #tpu.memory_space<vmem>>, vector<16x16xf32>
    %c48_126 = arith.constant 48 : index
    %c32_127 = arith.constant 32 : index
    %177 = vector.load %arg11[%c48_126, %c32_127] : memref<128x96xf32, #tpu.memory_space<vmem>>, vector<16x16xf32>
    %c48_128 = arith.constant 48 : index
    %c64_129 = arith.constant 64 : index
    %178 = vector.load %arg11[%c48_128, %c64_129] : memref<128x96xf32, #tpu.memory_space<vmem>>, vector<16x16xf32>
    %cst_130 = arith.constant dense<0.000000e+00> : vector<16x16xf32>
    %179 = tpu.matmul %176, %177, %cst_130 {dimension_numbers = #tpu.dot_dimension_numbers<[1], [1], [0], [0], [0, 0, 1, 0], [], []>} : vector<16x16xf32>, vector<16x16xf32>, vector<16x16xf32> -> vector<16x16xf32>
    %cst_131 = arith.constant 2.500000e-01 : f32
    %180 = vector.broadcast %cst_131 : f32 to vector<16x16xf32>
    %181 = arith.mulf %179, %180 : vector<16x16xf32>
    %c0_132 = arith.constant 0 : index
    %c0_133 = arith.constant 0 : index
    %c0_134 = arith.constant 0 : index
    %182 = vector.load %arg3[%c0_132, %c0_133, %c0_134] : memref<2x16x16xf32, #tpu.memory_space<vmem>>, vector<1x16x16xf32>
    %183 = vector.shape_cast %182 : vector<1x16x16xf32> to vector<16x16xf32>
    %184 = arith.addf %181, %183 : vector<16x16xf32>
    %c3 = arith.constant 3 : index
    %c0_135 = arith.constant 0 : index
    %c0_136 = arith.constant 0 : index
    %185 = vector.load %arg2[%c3, %c0_135, %c0_136] : memref<4x16x16xf32, #tpu.memory_space<vmem>>, vector<1x16x16xf32>
    %186 = vector.shape_cast %185 : vector<1x16x16xf32> to vector<16x16xf32>
    %187 = arith.addf %184, %186 : vector<16x16xf32>
    %cst_137 = arith.constant dense<0xFF800000> : vector<16xf32>
    %188 = vector.multi_reduction <maximumf>, %187, %cst_137 [1] : vector<16x16xf32> to vector<16xf32>
    %189 = vector.shape_cast %188 : vector<16xf32> to vector<16x1xf32>
    %190 = vector.broadcast %189 : vector<16x1xf32> to vector<16x16xf32>
    %191 = arith.subf %187, %190 : vector<16x16xf32>
    %192 = math.exp %191 : vector<16x16xf32>
    %cst_138 = arith.constant dense<0.000000e+00> : vector<16xf32>
    %193 = vector.multi_reduction <add>, %192, %cst_138 [1] : vector<16x16xf32> to vector<16xf32>
    %194 = vector.shape_cast %193 : vector<16xf32> to vector<16x1xf32>
    %195 = tpu.reciprocal %194 {approx = true} : vector<16x1xf32> -> vector<16x1xf32>
    %196 = vector.broadcast %195 : vector<16x1xf32> to vector<16x16xf32>
    %197 = arith.mulf %192, %196 : vector<16x16xf32>
    %cst_139 = arith.constant dense<0.000000e+00> : vector<16x16xf32>
    %198 = tpu.matmul %197, %178, %cst_139 {dimension_numbers = #tpu.dot_dimension_numbers<[1], [0], [0], [1], [0, 0, 1, 1], [], []>} : vector<16x16xf32>, vector<16x16xf32>, vector<16x16xf32> -> vector<16x16xf32>
    %c48_140 = arith.constant 48 : index
    %c0_141 = arith.constant 0 : index
    %199 = vector.load %arg12[%c48_140, %c0_141] : memref<128x32xf32, #tpu.memory_space<vmem>>, vector<16x16xf32>
    tpu.vector_store %arg12[%c48_140, %c0_141], %198 {strides = array<i32>} : memref<128x32xf32, #tpu.memory_space<vmem>>, vector<16x16xf32>,
    %c48_142 = arith.constant 48 : index
    %c16_143 = arith.constant 16 : index
    %200 = vector.load %arg11[%c48_142, %c16_143] : memref<128x96xf32, #tpu.memory_space<vmem>>, vector<16x16xf32>
    %c48_144 = arith.constant 48 : index
    %c48_145 = arith.constant 48 : index
    %201 = vector.load %arg11[%c48_144, %c48_145] : memref<128x96xf32, #tpu.memory_space<vmem>>, vector<16x16xf32>
    %c48_146 = arith.constant 48 : index
    %c80_147 = arith.constant 80 : index
    %202 = vector.load %arg11[%c48_146, %c80_147] : memref<128x96xf32, #tpu.memory_space<vmem>>, vector<16x16xf32>
    %cst_148 = arith.constant dense<0.000000e+00> : vector<16x16xf32>
    %203 = tpu.matmul %200, %201, %cst_148 {dimension_numbers = #tpu.dot_dimension_numbers<[1], [1], [0], [0], [0, 0, 1, 0], [], []>} : vector<16x16xf32>, vector<16x16xf32>, vector<16x16xf32> -> vector<16x16xf32>
    %cst_149 = arith.constant 2.500000e-01 : f32
    %204 = vector.broadcast %cst_149 : f32 to vector<16x16xf32>
    %205 = arith.mulf %203, %204 : vector<16x16xf32>
    %c1_150 = arith.constant 1 : index
    %c0_151 = arith.constant 0 : index
    %c0_152 = arith.constant 0 : index
    %206 = vector.load %arg3[%c1_150, %c0_151, %c0_152] : memref<2x16x16xf32, #tpu.memory_space<vmem>>, vector<1x16x16xf32>
    %207 = vector.shape_cast %206 : vector<1x16x16xf32> to vector<16x16xf32>
    %208 = arith.addf %205, %207 : vector<16x16xf32>
    %c3_153 = arith.constant 3 : index
    %c0_154 = arith.constant 0 : index
    %c0_155 = arith.constant 0 : index
    %209 = vector.load %arg2[%c3_153, %c0_154, %c0_155] : memref<4x16x16xf32, #tpu.memory_space<vmem>>, vector<1x16x16xf32>
    %210 = vector.shape_cast %209 : vector<1x16x16xf32> to vector<16x16xf32>
    %211 = arith.addf %208, %210 : vector<16x16xf32>
    %cst_156 = arith.constant dense<0xFF800000> : vector<16xf32>
    %212 = vector.multi_reduction <maximumf>, %211, %cst_156 [1] : vector<16x16xf32> to vector<16xf32>
    %213 = vector.shape_cast %212 : vector<16xf32> to vector<16x1xf32>
    %214 = vector.broadcast %213 : vector<16x1xf32> to vector<16x16xf32>
    %215 = arith.subf %211, %214 : vector<16x16xf32>
    %216 = math.exp %215 : vector<16x16xf32>
    %cst_157 = arith.constant dense<0.000000e+00> : vector<16xf32>
    %217 = vector.multi_reduction <add>, %216, %cst_157 [1] : vector<16x16xf32> to vector<16xf32>
    %218 = vector.shape_cast %217 : vector<16xf32> to vector<16x1xf32>
    %219 = tpu.reciprocal %218 {approx = true} : vector<16x1xf32> -> vector<16x1xf32>
    %220 = vector.broadcast %219 : vector<16x1xf32> to vector<16x16xf32>
    %221 = arith.mulf %216, %220 : vector<16x16xf32>
    %cst_158 = arith.constant dense<0.000000e+00> : vector<16x16xf32>
    %222 = tpu.matmul %221, %202, %cst_158 {dimension_numbers = #tpu.dot_dimension_numbers<[1], [0], [0], [1], [0, 0, 1, 1], [], []>} : vector<16x16xf32>, vector<16x16xf32>, vector<16x16xf32> -> vector<16x16xf32>
    %c48_159 = arith.constant 48 : index
    %c16_160 = arith.constant 16 : index
    %223 = vector.load %arg12[%c48_159, %c16_160] : memref<128x32xf32, #tpu.memory_space<vmem>>, vector<16x16xf32>
    tpu.vector_store %arg12[%c48_159, %c16_160], %222 {strides = array<i32>} : memref<128x32xf32, #tpu.memory_space<vmem>>, vector<16x16xf32>,
    %c64_161 = arith.constant 64 : index
    %c0_162 = arith.constant 0 : index
    %224 = vector.load %arg11[%c64_161, %c0_162] : memref<128x96xf32, #tpu.memory_space<vmem>>, vector<16x16xf32>
    %c64_163 = arith.constant 64 : index
    %c32_164 = arith.constant 32 : index
    %225 = vector.load %arg11[%c64_163, %c32_164] : memref<128x96xf32, #tpu.memory_space<vmem>>, vector<16x16xf32>
    %c64_165 = arith.constant 64 : index
    %c64_166 = arith.constant 64 : index
    %226 = vector.load %arg11[%c64_165, %c64_166] : memref<128x96xf32, #tpu.memory_space<vmem>>, vector<16x16xf32>
    %cst_167 = arith.constant dense<0.000000e+00> : vector<16x16xf32>
    %227 = tpu.matmul %224, %225, %cst_167 {dimension_numbers = #tpu.dot_dimension_numbers<[1], [1], [0], [0], [0, 0, 1, 0], [], []>} : vector<16x16xf32>, vector<16x16xf32>, vector<16x16xf32> -> vector<16x16xf32>
    %cst_168 = arith.constant 2.500000e-01 : f32
    %228 = vector.broadcast %cst_168 : f32 to vector<16x16xf32>
    %229 = arith.mulf %227, %228 : vector<16x16xf32>
    %c0_169 = arith.constant 0 : index
    %c0_170 = arith.constant 0 : index
    %c0_171 = arith.constant 0 : index
    %230 = vector.load %arg3[%c0_169, %c0_170, %c0_171] : memref<2x16x16xf32, #tpu.memory_space<vmem>>, vector<1x16x16xf32>
    %231 = vector.shape_cast %230 : vector<1x16x16xf32> to vector<16x16xf32>
    %232 = arith.addf %229, %231 : vector<16x16xf32>
    %c0_172 = arith.constant 0 : index
    %c0_173 = arith.constant 0 : index
    %c0_174 = arith.constant 0 : index
    %233 = vector.load %arg2[%c0_172, %c0_173, %c0_174] : memref<4x16x16xf32, #tpu.memory_space<vmem>>, vector<1x16x16xf32>
    %234 = vector.shape_cast %233 : vector<1x16x16xf32> to vector<16x16xf32>
    %235 = arith.addf %232, %234 : vector<16x16xf32>
    %cst_175 = arith.constant dense<0xFF800000> : vector<16xf32>
    %236 = vector.multi_reduction <maximumf>, %235, %cst_175 [1] : vector<16x16xf32> to vector<16xf32>
    %237 = vector.shape_cast %236 : vector<16xf32> to vector<16x1xf32>
    %238 = vector.broadcast %237 : vector<16x1xf32> to vector<16x16xf32>
    %239 = arith.subf %235, %238 : vector<16x16xf32>
    %240 = math.exp %239 : vector<16x16xf32>
    %cst_176 = arith.constant dense<0.000000e+00> : vector<16xf32>
    %241 = vector.multi_reduction <add>, %240, %cst_176 [1] : vector<16x16xf32> to vector<16xf32>
    %242 = vector.shape_cast %241 : vector<16xf32> to vector<16x1xf32>
    %243 = tpu.reciprocal %242 {approx = true} : vector<16x1xf32> -> vector<16x1xf32>
    %244 = vector.broadcast %243 : vector<16x1xf32> to vector<16x16xf32>
    %245 = arith.mulf %240, %244 : vector<16x16xf32>
    %cst_177 = arith.constant dense<0.000000e+00> : vector<16x16xf32>
    %246 = tpu.matmul %245, %226, %cst_177 {dimension_numbers = #tpu.dot_dimension_numbers<[1], [0], [0], [1], [0, 0, 1, 1], [], []>} : vector<16x16xf32>, vector<16x16xf32>, vector<16x16xf32> -> vector<16x16xf32>
    %c64_178 = arith.constant 64 : index
    %c0_179 = arith.constant 0 : index
    %247 = vector.load %arg12[%c64_178, %c0_179] : memref<128x32xf32, #tpu.memory_space<vmem>>, vector<16x16xf32>
    tpu.vector_store %arg12[%c64_178, %c0_179], %246 {strides = array<i32>} : memref<128x32xf32, #tpu.memory_space<vmem>>, vector<16x16xf32>,
    %c64_180 = arith.constant 64 : index
    %c16_181 = arith.constant 16 : index
    %248 = vector.load %arg11[%c64_180, %c16_181] : memref<128x96xf32, #tpu.memory_space<vmem>>, vector<16x16xf32>
    %c64_182 = arith.constant 64 : index
    %c48_183 = arith.constant 48 : index
    %249 = vector.load %arg11[%c64_182, %c48_183] : memref<128x96xf32, #tpu.memory_space<vmem>>, vector<16x16xf32>
    %c64_184 = arith.constant 64 : index
    %c80_185 = arith.constant 80 : index
    %250 = vector.load %arg11[%c64_184, %c80_185] : memref<128x96xf32, #tpu.memory_space<vmem>>, vector<16x16xf32>
    %cst_186 = arith.constant dense<0.000000e+00> : vector<16x16xf32>
    %251 = tpu.matmul %248, %249, %cst_186 {dimension_numbers = #tpu.dot_dimension_numbers<[1], [1], [0], [0], [0, 0, 1, 0], [], []>} : vector<16x16xf32>, vector<16x16xf32>, vector<16x16xf32> -> vector<16x16xf32>
    %cst_187 = arith.constant 2.500000e-01 : f32
    %252 = vector.broadcast %cst_187 : f32 to vector<16x16xf32>
    %253 = arith.mulf %251, %252 : vector<16x16xf32>
    %c1_188 = arith.constant 1 : index
    %c0_189 = arith.constant 0 : index
    %c0_190 = arith.constant 0 : index
    %254 = vector.load %arg3[%c1_188, %c0_189, %c0_190] : memref<2x16x16xf32, #tpu.memory_space<vmem>>, vector<1x16x16xf32>
    %255 = vector.shape_cast %254 : vector<1x16x16xf32> to vector<16x16xf32>
    %256 = arith.addf %253, %255 : vector<16x16xf32>
    %c0_191 = arith.constant 0 : index
    %c0_192 = arith.constant 0 : index
    %c0_193 = arith.constant 0 : index
    %257 = vector.load %arg2[%c0_191, %c0_192, %c0_193] : memref<4x16x16xf32, #tpu.memory_space<vmem>>, vector<1x16x16xf32>
    %258 = vector.shape_cast %257 : vector<1x16x16xf32> to vector<16x16xf32>
    %259 = arith.addf %256, %258 : vector<16x16xf32>
    %cst_194 = arith.constant dense<0xFF800000> : vector<16xf32>
    %260 = vector.multi_reduction <maximumf>, %259, %cst_194 [1] : vector<16x16xf32> to vector<16xf32>
    %261 = vector.shape_cast %260 : vector<16xf32> to vector<16x1xf32>
    %262 = vector.broadcast %261 : vector<16x1xf32> to vector<16x16xf32>
    %263 = arith.subf %259, %262 : vector<16x16xf32>
    %264 = math.exp %263 : vector<16x16xf32>
    %cst_195 = arith.constant dense<0.000000e+00> : vector<16xf32>
    %265 = vector.multi_reduction <add>, %264, %cst_195 [1] : vector<16x16xf32> to vector<16xf32>
    %266 = vector.shape_cast %265 : vector<16xf32> to vector<16x1xf32>
    %267 = tpu.reciprocal %266 {approx = true} : vector<16x1xf32> -> vector<16x1xf32>
    %268 = vector.broadcast %267 : vector<16x1xf32> to vector<16x16xf32>
    %269 = arith.mulf %264, %268 : vector<16x16xf32>
    %cst_196 = arith.constant dense<0.000000e+00> : vector<16x16xf32>
    %270 = tpu.matmul %269, %250, %cst_196 {dimension_numbers = #tpu.dot_dimension_numbers<[1], [0], [0], [1], [0, 0, 1, 1], [], []>} : vector<16x16xf32>, vector<16x16xf32>, vector<16x16xf32> -> vector<16x16xf32>
    %c64_197 = arith.constant 64 : index
    %c16_198 = arith.constant 16 : index
    %271 = vector.load %arg12[%c64_197, %c16_198] : memref<128x32xf32, #tpu.memory_space<vmem>>, vector<16x16xf32>
    tpu.vector_store %arg12[%c64_197, %c16_198], %270 {strides = array<i32>} : memref<128x32xf32, #tpu.memory_space<vmem>>, vector<16x16xf32>,
    %c80_199 = arith.constant 80 : index
    %c0_200 = arith.constant 0 : index
    %272 = vector.load %arg11[%c80_199, %c0_200] : memref<128x96xf32, #tpu.memory_space<vmem>>, vector<16x16xf32>
    %c80_201 = arith.constant 80 : index
    %c32_202 = arith.constant 32 : index
    %273 = vector.load %arg11[%c80_201, %c32_202] : memref<128x96xf32, #tpu.memory_space<vmem>>, vector<16x16xf32>
    %c80_203 = arith.constant 80 : index
    %c64_204 = arith.constant 64 : index
    %274 = vector.load %arg11[%c80_203, %c64_204] : memref<128x96xf32, #tpu.memory_space<vmem>>, vector<16x16xf32>
    %cst_205 = arith.constant dense<0.000000e+00> : vector<16x16xf32>
    %275 = tpu.matmul %272, %273, %cst_205 {dimension_numbers = #tpu.dot_dimension_numbers<[1], [1], [0], [0], [0, 0, 1, 0], [], []>} : vector<16x16xf32>, vector<16x16xf32>, vector<16x16xf32> -> vector<16x16xf32>
    %cst_206 = arith.constant 2.500000e-01 : f32
    %276 = vector.broadcast %cst_206 : f32 to vector<16x16xf32>
    %277 = arith.mulf %275, %276 : vector<16x16xf32>
    %c0_207 = arith.constant 0 : index
    %c0_208 = arith.constant 0 : index
    %c0_209 = arith.constant 0 : index
    %278 = vector.load %arg3[%c0_207, %c0_208, %c0_209] : memref<2x16x16xf32, #tpu.memory_space<vmem>>, vector<1x16x16xf32>
    %279 = vector.shape_cast %278 : vector<1x16x16xf32> to vector<16x16xf32>
    %280 = arith.addf %277, %279 : vector<16x16xf32>
    %c1_210 = arith.constant 1 : index
    %c0_211 = arith.constant 0 : index
    %c0_212 = arith.constant 0 : index
    %281 = vector.load %arg2[%c1_210, %c0_211, %c0_212] : memref<4x16x16xf32, #tpu.memory_space<vmem>>, vector<1x16x16xf32>
    %282 = vector.shape_cast %281 : vector<1x16x16xf32> to vector<16x16xf32>
    %283 = arith.addf %280, %282 : vector<16x16xf32>
    %cst_213 = arith.constant dense<0xFF800000> : vector<16xf32>
    %284 = vector.multi_reduction <maximumf>, %283, %cst_213 [1] : vector<16x16xf32> to vector<16xf32>
    %285 = vector.shape_cast %284 : vector<16xf32> to vector<16x1xf32>
    %286 = vector.broadcast %285 : vector<16x1xf32> to vector<16x16xf32>
    %287 = arith.subf %283, %286 : vector<16x16xf32>
    %288 = math.exp %287 : vector<16x16xf32>
    %cst_214 = arith.constant dense<0.000000e+00> : vector<16xf32>
    %289 = vector.multi_reduction <add>, %288, %cst_214 [1] : vector<16x16xf32> to vector<16xf32>
    %290 = vector.shape_cast %289 : vector<16xf32> to vector<16x1xf32>
    %291 = tpu.reciprocal %290 {approx = true} : vector<16x1xf32> -> vector<16x1xf32>
    %292 = vector.broadcast %291 : vector<16x1xf32> to vector<16x16xf32>
    %293 = arith.mulf %288, %292 : vector<16x16xf32>
    %cst_215 = arith.constant dense<0.000000e+00> : vector<16x16xf32>
    %294 = tpu.matmul %293, %274, %cst_215 {dimension_numbers = #tpu.dot_dimension_numbers<[1], [0], [0], [1], [0, 0, 1, 1], [], []>} : vector<16x16xf32>, vector<16x16xf32>, vector<16x16xf32> -> vector<16x16xf32>
    %c80_216 = arith.constant 80 : index
    %c0_217 = arith.constant 0 : index
    %295 = vector.load %arg12[%c80_216, %c0_217] : memref<128x32xf32, #tpu.memory_space<vmem>>, vector<16x16xf32>
    tpu.vector_store %arg12[%c80_216, %c0_217], %294 {strides = array<i32>} : memref<128x32xf32, #tpu.memory_space<vmem>>, vector<16x16xf32>,
    %c80_218 = arith.constant 80 : index
    %c16_219 = arith.constant 16 : index
    %296 = vector.load %arg11[%c80_218, %c16_219] : memref<128x96xf32, #tpu.memory_space<vmem>>, vector<16x16xf32>
    %c80_220 = arith.constant 80 : index
    %c48_221 = arith.constant 48 : index
    %297 = vector.load %arg11[%c80_220, %c48_221] : memref<128x96xf32, #tpu.memory_space<vmem>>, vector<16x16xf32>
    %c80_222 = arith.constant 80 : index
    %c80_223 = arith.constant 80 : index
    %298 = vector.load %arg11[%c80_222, %c80_223] : memref<128x96xf32, #tpu.memory_space<vmem>>, vector<16x16xf32>
    %cst_224 = arith.constant dense<0.000000e+00> : vector<16x16xf32>
    %299 = tpu.matmul %296, %297, %cst_224 {dimension_numbers = #tpu.dot_dimension_numbers<[1], [1], [0], [0], [0, 0, 1, 0], [], []>} : vector<16x16xf32>, vector<16x16xf32>, vector<16x16xf32> -> vector<16x16xf32>
    %cst_225 = arith.constant 2.500000e-01 : f32
    %300 = vector.broadcast %cst_225 : f32 to vector<16x16xf32>
    %301 = arith.mulf %299, %300 : vector<16x16xf32>
    %c1_226 = arith.constant 1 : index
    %c0_227 = arith.constant 0 : index
    %c0_228 = arith.constant 0 : index
    %302 = vector.load %arg3[%c1_226, %c0_227, %c0_228] : memref<2x16x16xf32, #tpu.memory_space<vmem>>, vector<1x16x16xf32>
    %303 = vector.shape_cast %302 : vector<1x16x16xf32> to vector<16x16xf32>
    %304 = arith.addf %301, %303 : vector<16x16xf32>
    %c1_229 = arith.constant 1 : index
    %c0_230 = arith.constant 0 : index
    %c0_231 = arith.constant 0 : index
    %305 = vector.load %arg2[%c1_229, %c0_230, %c0_231] : memref<4x16x16xf32, #tpu.memory_space<vmem>>, vector<1x16x16xf32>
    %306 = vector.shape_cast %305 : vector<1x16x16xf32> to vector<16x16xf32>
    %307 = arith.addf %304, %306 : vector<16x16xf32>
    %cst_232 = arith.constant dense<0xFF800000> : vector<16xf32>
    %308 = vector.multi_reduction <maximumf>, %307, %cst_232 [1] : vector<16x16xf32> to vector<16xf32>
    %309 = vector.shape_cast %308 : vector<16xf32> to vector<16x1xf32>
    %310 = vector.broadcast %309 : vector<16x1xf32> to vector<16x16xf32>
    %311 = arith.subf %307, %310 : vector<16x16xf32>
    %312 = math.exp %311 : vector<16x16xf32>
    %cst_233 = arith.constant dense<0.000000e+00> : vector<16xf32>
    %313 = vector.multi_reduction <add>, %312, %cst_233 [1] : vector<16x16xf32> to vector<16xf32>
    %314 = vector.shape_cast %313 : vector<16xf32> to vector<16x1xf32>
    %315 = tpu.reciprocal %314 {approx = true} : vector<16x1xf32> -> vector<16x1xf32>
    %316 = vector.broadcast %315 : vector<16x1xf32> to vector<16x16xf32>
    %317 = arith.mulf %312, %316 : vector<16x16xf32>
    %cst_234 = arith.constant dense<0.000000e+00> : vector<16x16xf32>
    %318 = tpu.matmul %317, %298, %cst_234 {dimension_numbers = #tpu.dot_dimension_numbers<[1], [0], [0], [1], [0, 0, 1, 1], [], []>} : vector<16x16xf32>, vector<16x16xf32>, vector<16x16xf32> -> vector<16x16xf32>
    %c80_235 = arith.constant 80 : index
    %c16_236 = arith.constant 16 : index
    %319 = vector.load %arg12[%c80_235, %c16_236] : memref<128x32xf32, #tpu.memory_space<vmem>>, vector<16x16xf32>
    tpu.vector_store %arg12[%c80_235, %c16_236], %318 {strides = array<i32>} : memref<128x32xf32, #tpu.memory_space<vmem>>, vector<16x16xf32>,
    %c96 = arith.constant 96 : index
    %c0_237 = arith.constant 0 : index
    %320 = vector.load %arg11[%c96, %c0_237] : memref<128x96xf32, #tpu.memory_space<vmem>>, vector<16x16xf32>
    %c96_238 = arith.constant 96 : index
    %c32_239 = arith.constant 32 : index
    %321 = vector.load %arg11[%c96_238, %c32_239] : memref<128x96xf32, #tpu.memory_space<vmem>>, vector<16x16xf32>
    %c96_240 = arith.constant 96 : index
    %c64_241 = arith.constant 64 : index
    %322 = vector.load %arg11[%c96_240, %c64_241] : memref<128x96xf32, #tpu.memory_space<vmem>>, vector<16x16xf32>
    %cst_242 = arith.constant dense<0.000000e+00> : vector<16x16xf32>
    %323 = tpu.matmul %320, %321, %cst_242 {dimension_numbers = #tpu.dot_dimension_numbers<[1], [1], [0], [0], [0, 0, 1, 0], [], []>} : vector<16x16xf32>, vector<16x16xf32>, vector<16x16xf32> -> vector<16x16xf32>
    %cst_243 = arith.constant 2.500000e-01 : f32
    %324 = vector.broadcast %cst_243 : f32 to vector<16x16xf32>
    %325 = arith.mulf %323, %324 : vector<16x16xf32>
    %c0_244 = arith.constant 0 : index
    %c0_245 = arith.constant 0 : index
    %c0_246 = arith.constant 0 : index
    %326 = vector.load %arg3[%c0_244, %c0_245, %c0_246] : memref<2x16x16xf32, #tpu.memory_space<vmem>>, vector<1x16x16xf32>
    %327 = vector.shape_cast %326 : vector<1x16x16xf32> to vector<16x16xf32>
    %328 = arith.addf %325, %327 : vector<16x16xf32>
    %c2_247 = arith.constant 2 : index
    %c0_248 = arith.constant 0 : index
    %c0_249 = arith.constant 0 : index
    %329 = vector.load %arg2[%c2_247, %c0_248, %c0_249] : memref<4x16x16xf32, #tpu.memory_space<vmem>>, vector<1x16x16xf32>
    %330 = vector.shape_cast %329 : vector<1x16x16xf32> to vector<16x16xf32>
    %331 = arith.addf %328, %330 : vector<16x16xf32>
    %cst_250 = arith.constant dense<0xFF800000> : vector<16xf32>
    %332 = vector.multi_reduction <maximumf>, %331, %cst_250 [1] : vector<16x16xf32> to vector<16xf32>
    %333 = vector.shape_cast %332 : vector<16xf32> to vector<16x1xf32>
    %334 = vector.broadcast %333 : vector<16x1xf32> to vector<16x16xf32>
    %335 = arith.subf %331, %334 : vector<16x16xf32>
    %336 = math.exp %335 : vector<16x16xf32>
    %cst_251 = arith.constant dense<0.000000e+00> : vector<16xf32>
    %337 = vector.multi_reduction <add>, %336, %cst_251 [1] : vector<16x16xf32> to vector<16xf32>
    %338 = vector.shape_cast %337 : vector<16xf32> to vector<16x1xf32>
    %339 = tpu.reciprocal %338 {approx = true} : vector<16x1xf32> -> vector<16x1xf32>
    %340 = vector.broadcast %339 : vector<16x1xf32> to vector<16x16xf32>
    %341 = arith.mulf %336, %340 : vector<16x16xf32>
    %cst_252 = arith.constant dense<0.000000e+00> : vector<16x16xf32>
    %342 = tpu.matmul %341, %322, %cst_252 {dimension_numbers = #tpu.dot_dimension_numbers<[1], [0], [0], [1], [0, 0, 1, 1], [], []>} : vector<16x16xf32>, vector<16x16xf32>, vector<16x16xf32> -> vector<16x16xf32>
    %c96_253 = arith.constant 96 : index
    %c0_254 = arith.constant 0 : index
    %343 = vector.load %arg12[%c96_253, %c0_254] : memref<128x32xf32, #tpu.memory_space<vmem>>, vector<16x16xf32>
    tpu.vector_store %arg12[%c96_253, %c0_254], %342 {strides = array<i32>} : memref<128x32xf32, #tpu.memory_space<vmem>>, vector<16x16xf32>,
    %c96_255 = arith.constant 96 : index
    %c16_256 = arith.constant 16 : index
    %344 = vector.load %arg11[%c96_255, %c16_256] : memref<128x96xf32, #tpu.memory_space<vmem>>, vector<16x16xf32>
    %c96_257 = arith.constant 96 : index
    %c48_258 = arith.constant 48 : index
    %345 = vector.load %arg11[%c96_257, %c48_258] : memref<128x96xf32, #tpu.memory_space<vmem>>, vector<16x16xf32>
    %c96_259 = arith.constant 96 : index
    %c80_260 = arith.constant 80 : index
    %346 = vector.load %arg11[%c96_259, %c80_260] : memref<128x96xf32, #tpu.memory_space<vmem>>, vector<16x16xf32>
    %cst_261 = arith.constant dense<0.000000e+00> : vector<16x16xf32>
    %347 = tpu.matmul %344, %345, %cst_261 {dimension_numbers = #tpu.dot_dimension_numbers<[1], [1], [0], [0], [0, 0, 1, 0], [], []>} : vector<16x16xf32>, vector<16x16xf32>, vector<16x16xf32> -> vector<16x16xf32>
    %cst_262 = arith.constant 2.500000e-01 : f32
    %348 = vector.broadcast %cst_262 : f32 to vector<16x16xf32>
    %349 = arith.mulf %347, %348 : vector<16x16xf32>
    %c1_263 = arith.constant 1 : index
    %c0_264 = arith.constant 0 : index
    %c0_265 = arith.constant 0 : index
    %350 = vector.load %arg3[%c1_263, %c0_264, %c0_265] : memref<2x16x16xf32, #tpu.memory_space<vmem>>, vector<1x16x16xf32>
    %351 = vector.shape_cast %350 : vector<1x16x16xf32> to vector<16x16xf32>
    %352 = arith.addf %349, %351 : vector<16x16xf32>
    %c2_266 = arith.constant 2 : index
    %c0_267 = arith.constant 0 : index
    %c0_268 = arith.constant 0 : index
    %353 = vector.load %arg2[%c2_266, %c0_267, %c0_268] : memref<4x16x16xf32, #tpu.memory_space<vmem>>, vector<1x16x16xf32>
    %354 = vector.shape_cast %353 : vector<1x16x16xf32> to vector<16x16xf32>
    %355 = arith.addf %352, %354 : vector<16x16xf32>
    %cst_269 = arith.constant dense<0xFF800000> : vector<16xf32>
    %356 = vector.multi_reduction <maximumf>, %355, %cst_269 [1] : vector<16x16xf32> to vector<16xf32>
    %357 = vector.shape_cast %356 : vector<16xf32> to vector<16x1xf32>
    %358 = vector.broadcast %357 : vector<16x1xf32> to vector<16x16xf32>
    %359 = arith.subf %355, %358 : vector<16x16xf32>
    %360 = math.exp %359 : vector<16x16xf32>
    %cst_270 = arith.constant dense<0.000000e+00> : vector<16xf32>
    %361 = vector.multi_reduction <add>, %360, %cst_270 [1] : vector<16x16xf32> to vector<16xf32>
    %362 = vector.shape_cast %361 : vector<16xf32> to vector<16x1xf32>
    %363 = tpu.reciprocal %362 {approx = true} : vector<16x1xf32> -> vector<16x1xf32>
    %364 = vector.broadcast %363 : vector<16x1xf32> to vector<16x16xf32>
    %365 = arith.mulf %360, %364 : vector<16x16xf32>
    %cst_271 = arith.constant dense<0.000000e+00> : vector<16x16xf32>
    %366 = tpu.matmul %365, %346, %cst_271 {dimension_numbers = #tpu.dot_dimension_numbers<[1], [0], [0], [1], [0, 0, 1, 1], [], []>} : vector<16x16xf32>, vector<16x16xf32>, vector<16x16xf32> -> vector<16x16xf32>
    %c96_272 = arith.constant 96 : index
    %c16_273 = arith.constant 16 : index
    %367 = vector.load %arg12[%c96_272, %c16_273] : memref<128x32xf32, #tpu.memory_space<vmem>>, vector<16x16xf32>
    tpu.vector_store %arg12[%c96_272, %c16_273], %366 {strides = array<i32>} : memref<128x32xf32, #tpu.memory_space<vmem>>, vector<16x16xf32>,
    %c112 = arith.constant 112 : index
    %c0_274 = arith.constant 0 : index
    %368 = vector.load %arg11[%c112, %c0_274] : memref<128x96xf32, #tpu.memory_space<vmem>>, vector<16x16xf32>
    %c112_275 = arith.constant 112 : index
    %c32_276 = arith.constant 32 : index
    %369 = vector.load %arg11[%c112_275, %c32_276] : memref<128x96xf32, #tpu.memory_space<vmem>>, vector<16x16xf32>
    %c112_277 = arith.constant 112 : index
    %c64_278 = arith.constant 64 : index
    %370 = vector.load %arg11[%c112_277, %c64_278] : memref<128x96xf32, #tpu.memory_space<vmem>>, vector<16x16xf32>
    %cst_279 = arith.constant dense<0.000000e+00> : vector<16x16xf32>
    %371 = tpu.matmul %368, %369, %cst_279 {dimension_numbers = #tpu.dot_dimension_numbers<[1], [1], [0], [0], [0, 0, 1, 0], [], []>} : vector<16x16xf32>, vector<16x16xf32>, vector<16x16xf32> -> vector<16x16xf32>
    %cst_280 = arith.constant 2.500000e-01 : f32
    %372 = vector.broadcast %cst_280 : f32 to vector<16x16xf32>
    %373 = arith.mulf %371, %372 : vector<16x16xf32>
    %c0_281 = arith.constant 0 : index
    %c0_282 = arith.constant 0 : index
    %c0_283 = arith.constant 0 : index
    %374 = vector.load %arg3[%c0_281, %c0_282, %c0_283] : memref<2x16x16xf32, #tpu.memory_space<vmem>>, vector<1x16x16xf32>
    %375 = vector.shape_cast %374 : vector<1x16x16xf32> to vector<16x16xf32>
    %376 = arith.addf %373, %375 : vector<16x16xf32>
    %c3_284 = arith.constant 3 : index
    %c0_285 = arith.constant 0 : index
    %c0_286 = arith.constant 0 : index
    %377 = vector.load %arg2[%c3_284, %c0_285, %c0_286] : memref<4x16x16xf32, #tpu.memory_space<vmem>>, vector<1x16x16xf32>
    %378 = vector.shape_cast %377 : vector<1x16x16xf32> to vector<16x16xf32>
    %379 = arith.addf %376, %378 : vector<16x16xf32>
    %cst_287 = arith.constant dense<0xFF800000> : vector<16xf32>
    %380 = vector.multi_reduction <maximumf>, %379, %cst_287 [1] : vector<16x16xf32> to vector<16xf32>
    %381 = vector.shape_cast %380 : vector<16xf32> to vector<16x1xf32>
    %382 = vector.broadcast %381 : vector<16x1xf32> to vector<16x16xf32>
    %383 = arith.subf %379, %382 : vector<16x16xf32>
    %384 = math.exp %383 : vector<16x16xf32>
    %cst_288 = arith.constant dense<0.000000e+00> : vector<16xf32>
    %385 = vector.multi_reduction <add>, %384, %cst_288 [1] : vector<16x16xf32> to vector<16xf32>
    %386 = vector.shape_cast %385 : vector<16xf32> to vector<16x1xf32>
    %387 = tpu.reciprocal %386 {approx = true} : vector<16x1xf32> -> vector<16x1xf32>
    %388 = vector.broadcast %387 : vector<16x1xf32> to vector<16x16xf32>
    %389 = arith.mulf %384, %388 : vector<16x16xf32>
    %cst_289 = arith.constant dense<0.000000e+00> : vector<16x16xf32>
    %390 = tpu.matmul %389, %370, %cst_289 {dimension_numbers = #tpu.dot_dimension_numbers<[1], [0], [0], [1], [0, 0, 1, 1], [], []>} : vector<16x16xf32>, vector<16x16xf32>, vector<16x16xf32> -> vector<16x16xf32>
    %c112_290 = arith.constant 112 : index
    %c0_291 = arith.constant 0 : index
    %391 = vector.load %arg12[%c112_290, %c0_291] : memref<128x32xf32, #tpu.memory_space<vmem>>, vector<16x16xf32>
    tpu.vector_store %arg12[%c112_290, %c0_291], %390 {strides = array<i32>} : memref<128x32xf32, #tpu.memory_space<vmem>>, vector<16x16xf32>,
    %c112_292 = arith.constant 112 : index
    %c16_293 = arith.constant 16 : index
    %392 = vector.load %arg11[%c112_292, %c16_293] : memref<128x96xf32, #tpu.memory_space<vmem>>, vector<16x16xf32>
    %c112_294 = arith.constant 112 : index
    %c48_295 = arith.constant 48 : index
    %393 = vector.load %arg11[%c112_294, %c48_295] : memref<128x96xf32, #tpu.memory_space<vmem>>, vector<16x16xf32>
    %c112_296 = arith.constant 112 : index
    %c80_297 = arith.constant 80 : index
    %394 = vector.load %arg11[%c112_296, %c80_297] : memref<128x96xf32, #tpu.memory_space<vmem>>, vector<16x16xf32>
    %cst_298 = arith.constant dense<0.000000e+00> : vector<16x16xf32>
    %395 = tpu.matmul %392, %393, %cst_298 {dimension_numbers = #tpu.dot_dimension_numbers<[1], [1], [0], [0], [0, 0, 1, 0], [], []>} : vector<16x16xf32>, vector<16x16xf32>, vector<16x16xf32> -> vector<16x16xf32>
    %cst_299 = arith.constant 2.500000e-01 : f32
    %396 = vector.broadcast %cst_299 : f32 to vector<16x16xf32>
    %397 = arith.mulf %395, %396 : vector<16x16xf32>
    %c1_300 = arith.constant 1 : index
    %c0_301 = arith.constant 0 : index
    %c0_302 = arith.constant 0 : index
    %398 = vector.load %arg3[%c1_300, %c0_301, %c0_302] : memref<2x16x16xf32, #tpu.memory_space<vmem>>, vector<1x16x16xf32>
    %399 = vector.shape_cast %398 : vector<1x16x16xf32> to vector<16x16xf32>
    %400 = arith.addf %397, %399 : vector<16x16xf32>
    %c3_303 = arith.constant 3 : index
    %c0_304 = arith.constant 0 : index
    %c0_305 = arith.constant 0 : index
    %401 = vector.load %arg2[%c3_303, %c0_304, %c0_305] : memref<4x16x16xf32, #tpu.memory_space<vmem>>, vector<1x16x16xf32>
    %402 = vector.shape_cast %401 : vector<1x16x16xf32> to vector<16x16xf32>
    %403 = arith.addf %400, %402 : vector<16x16xf32>
    %cst_306 = arith.constant dense<0xFF800000> : vector<16xf32>
    %404 = vector.multi_reduction <maximumf>, %403, %cst_306 [1] : vector<16x16xf32> to vector<16xf32>
    %405 = vector.shape_cast %404 : vector<16xf32> to vector<16x1xf32>
    %406 = vector.broadcast %405 : vector<16x1xf32> to vector<16x16xf32>
    %407 = arith.subf %403, %406 : vector<16x16xf32>
    %408 = math.exp %407 : vector<16x16xf32>
    %cst_307 = arith.constant dense<0.000000e+00> : vector<16xf32>
    %409 = vector.multi_reduction <add>, %408, %cst_307 [1] : vector<16x16xf32> to vector<16xf32>
    %410 = vector.shape_cast %409 : vector<16xf32> to vector<16x1xf32>
    %411 = tpu.reciprocal %410 {approx = true} : vector<16x1xf32> -> vector<16x1xf32>
    %412 = vector.broadcast %411 : vector<16x1xf32> to vector<16x16xf32>
    %413 = arith.mulf %408, %412 : vector<16x16xf32>
    %cst_308 = arith.constant dense<0.000000e+00> : vector<16x16xf32>
    %414 = tpu.matmul %413, %394, %cst_308 {dimension_numbers = #tpu.dot_dimension_numbers<[1], [0], [0], [1], [0, 0, 1, 1], [], []>} : vector<16x16xf32>, vector<16x16xf32>, vector<16x16xf32> -> vector<16x16xf32>
    %c112_309 = arith.constant 112 : index
    %c16_310 = arith.constant 16 : index
    %415 = vector.load %arg12[%c112_309, %c16_310] : memref<128x32xf32, #tpu.memory_space<vmem>>, vector<16x16xf32>
    tpu.vector_store %arg12[%c112_309, %c16_310], %414 {strides = array<i32>} : memref<128x32xf32, #tpu.memory_space<vmem>>, vector<16x16xf32>,
    %c0_311 = arith.constant 0 : index
    %c0_312 = arith.constant 0 : index
    %416 = vector.load %arg12[%c0_311, %c0_312] : memref<128x32xf32, #tpu.memory_space<vmem>>, vector<128x32xf32>
    %c0_313 = arith.constant 0 : index
    %c0_314 = arith.constant 0 : index
    %417 = vector.load %arg8[%c0_313, %c0_314] : memref<32x32xf32, #tpu.memory_space<vmem>>, vector<32x32xf32>
    %cst_315 = arith.constant dense<0.000000e+00> : vector<128x32xf32>
    %418 = tpu.matmul %416, %417, %cst_315 {dimension_numbers = #tpu.dot_dimension_numbers<[1], [0], [0], [1], [0, 0, 1, 1], [], []>} : vector<128x32xf32>, vector<32x32xf32>, vector<128x32xf32> -> vector<128x32xf32>
    %c0_316 = arith.constant 0 : index
    %c0_317 = arith.constant 0 : index
    %419 = vector.load %arg9[%c0_316, %c0_317] : memref<1x32xf32, #tpu.memory_space<vmem>>, vector<1x32xf32>
    %420 = vector.broadcast %419 : vector<1x32xf32> to vector<128x32xf32>
    %421 = arith.addf %418, %420 : vector<128x32xf32>
    %422 = vector.shape_cast %421 : vector<128x32xf32> to vector<8x16x32xf32>
    %c0_318 = arith.constant 0 : index
    %c0_319 = arith.constant 0 : index
    %c0_320 = arith.constant 0 : index
    %423 = vector.load %arg10[%c0_318, %c0_319, %c0_320] : memref<8x16x32xf32, #tpu.memory_space<vmem>>, vector<8x16x32xf32>
    tpu.vector_store %arg10[%c0_318, %c0_319, %c0_320], %422 {strides = array<i32>} : memref<8x16x32xf32, #tpu.memory_space<vmem>>, vector<8x16x32xf32>,
    return
  }
  func.func @transform_0(%arg0: i32) -> (i32, i32, i32) {
    %c0_i32 = arith.constant 0 : i32
    %c0_i32_0 = arith.constant 0 : i32
    %c0_i32_1 = arith.constant 0 : i32
    return %arg0, %c0_i32, %c0_i32_0 : i32, i32, i32
  }
  func.func @transform_1(%arg0: i32) -> (i32, i32, i32) {
    %c0_i32 = arith.constant 0 : i32
    %c0_i32_0 = arith.constant 0 : i32
    %c0_i32_1 = arith.constant 0 : i32
    %c0_i32_2 = arith.constant 0 : i32
    return %c0_i32, %c0_i32_0, %c0_i32_1 : i32, i32, i32
  }
  func.func @transform_2(%arg0: i32) -> (i32, i32, i32) {
    %c0_i32 = arith.constant 0 : i32
    %c0_i32_0 = arith.constant 0 : i32
    %c0_i32_1 = arith.constant 0 : i32
    %c0_i32_2 = arith.constant 0 : i32
    return %c0_i32, %c0_i32_0, %c0_i32_1 : i32, i32, i32
  }
  func.func @transform_3(%arg0: i32) -> (i32, i32) {
    %c0_i32 = arith.constant 0 : i32
    %c0_i32_0 = arith.constant 0 : i32
    %c0_i32_1 = arith.constant 0 : i32
    return %c0_i32, %c0_i32_0 : i32, i32
  }
  func.func @transform_4(%arg0: i32) -> (i32, i32) {
    %c0_i32 = arith.constant 0 : i32
    %c0_i32_0 = arith.constant 0 : i32
    %c0_i32_1 = arith.constant 0 : i32
    return %c0_i32, %c0_i32_0 : i32, i32
  }
  func.func @transform_5(%arg0: i32) -> (i32, i32) {
    %c0_i32 = arith.constant 0 : i32
    %c0_i32_0 = arith.constant 0 : i32
    %c0_i32_1 = arith.constant 0 : i32
    return %c0_i32, %c0_i32_0 : i32, i32
  }
  func.func @transform_6(%arg0: i32) -> (i32, i32) {
    %c0_i32 = arith.constant 0 : i32
    %c0_i32_0 = arith.constant 0 : i32
    %c0_i32_1 = arith.constant 0 : i32
    return %c0_i32, %c0_i32_0 : i32, i32
  }
  func.func @transform_7(%arg0: i32) -> (i32, i32) {
    %c0_i32 = arith.constant 0 : i32
    %c0_i32_0 = arith.constant 0 : i32
    %c0_i32_1 = arith.constant 0 : i32
    return %c0_i32, %c0_i32_0 : i32, i32
  }
  func.func @transform_8(%arg0: i32) -> (i32, i32) {
    %c0_i32 = arith.constant 0 : i32
    %c0_i32_0 = arith.constant 0 : i32
    %c0_i32_1 = arith.constant 0 : i32
    return %c0_i32, %c0_i32_0 : i32, i32
  }
  func.func @transform_9(%arg0: i32) -> (i32, i32, i32) {
    %c0_i32 = arith.constant 0 : i32
    %c0_i32_0 = arith.constant 0 : i32
    %c0_i32_1 = arith.constant 0 : i32
    return %arg0, %c0_i32, %c0_i32_0 : i32, i32, i32
  }
}

</mosaic_0001>

<bundles_post_ra>
// kernel: tpu_custom_call.1
= control target key start
LH: loop header
LB: loop body
LE: loop exit
PB: predicated region body
PF: predicated region fallthrough
CT: control target
= control target key end

     0   :  { %14 = vsyncpa [#allocation5], 0  ;;  %s6518_s0 = inlined_call_operand.hbm [shape: f32[8,16,32], index: 0, kind: input, shape index: {}]   ;;  %s6519_s1 = inlined_call_operand.hbm [shape: f32[4,16,16], index: 1, kind: input, shape index: {}]   ;;  %s6520_s2 = inlined_call_operand.hbm [shape: f32[2,16,16], index: 2, kind: input, shape index: {}]   ;;  %s6521_s3 = inlined_call_operand.vmem [shape: f32[1,32], index: 3, kind: input, shape index: {}]   ;;  %s6522_s4 = inlined_call_operand.vmem [shape: f32[1,32], index: 4, kind: input, shape index: {}]   ;;  %s6523_s5 = inlined_call_operand.hbm [shape: f32[32,96], index: 5, kind: input, shape index: {}]   ;;  %s6524_s6 = inlined_call_operand.vmem [shape: f32[1,96], index: 6, kind: input, shape index: {}]   ;;  %s6525_s7 = inlined_call_operand.hbm [shape: f32[32,32], index: 7, kind: input, shape index: {}]   ;;  %s6526_s8 = inlined_call_operand.vmem [shape: f32[1,32], index: 8, kind: input, shape index: {}]   ;;  %s6527_s9 = inlined_call_operand.hbm [shape: f32[8,16,32], index: 9, kind: output, shape index: {}]  }
   0x1   :  { %15 = vsyncpa [#allocation8], 0 }
   0x2   :  { %16 = vsyncpa [#allocation11], 0 }
   0x3   :  { %17 = vsyncpa [#allocation6], 0  ;;  %s5585_s30 = smov [#allocation7]   ;;  %s5586_s11 = smov [#allocation10]  }
   0x4   :  { %s35_s10 = sshll.u32 %s5585_s30, 4  ;;  %s63_s12 = sshll.u32 %s5586_s11, 4  ;;  %s36_s10 = int_to_ptr.vmem [resolvable:$true] %s35_s10  ;;  %s5649_s12 = int_to_ptr.vmem [resolvable:$true] %s63_s12 }
   0x5   :  { %s5445_s15 = scalar_lea.hbm %s6519_s1, 1024 }
   0x6   :  { %p5446_p0 = scmp.ne.s32.totalorder %s6519_s1, %s5445_s15  ;;  %p5449_p1 = scmp.lt.u32.totalorder %s5445_s15, %s6519_s1 }
   0x8   :  { %p5451_p2 = pnand %p5449_p1, %p5446_p0 }
   0xa   :  { %5454 = shalt.err (!%p5451_p2)
}
   0xb   :  { %s5455_s20 = scalar_lea.vmem %s36_s10, 1024  ;;  %p5460_p4 = scmp.lt.s32.totalorder %s36_s10, %s36_s10 }
   0xc   :  { %p5456_p3 = scmp.ne.s32.totalorder %s36_s10, %s5455_s20  ;;  %p5461_p5 = scmp.lt.s32.totalorder %s5455_s20, %s5455_s20 }
   0xe   :  { %p5462_p6 = por %p5461_p5, %p5460_p4 }
  0x10   :  { %p5463_p7 = pnand %p5462_p6, %p5456_p3 }
  0x12   :  { %5466 = shalt.err (!%p5463_p7)
}
  0x13   :  { %s5587_s21 = smov 128   ;;  %s5588_s22 = smov 8  }
  0x14   :  { %41 = dma.hbm_to_vmem [thread:$0]  %s6519_s1, 1024, %s36_s10, [#allocation8], %s5587_s21, %s5587_s21, %s5588_s22  }
  0x15   :  { %s5467_s27 = scalar_lea.hbm %s6523_s5, 512 }
  0x16   :  { %p5468_p8 = scmp.ne.s32.totalorder %s6523_s5, %s5467_s27  ;;  %p5471_p9 = scmp.lt.u32.totalorder %s5467_s27, %s6523_s5 }
  0x18   :  { %p5473_p10 = pnand %p5471_p9, %p5468_p8 }
  0x1a   :  { %5476 = shalt.err (!%p5473_p10)
}
  0x1b   :  { %s5477_s13 = scalar_lea.vmem %s5649_s12, 512  ;;  %p5482_p12 = scmp.lt.s32.totalorder %s5649_s12, %s5649_s12 }
  0x1c   :  { %p5478_p11 = scmp.ne.s32.totalorder %s5649_s12, %s5477_s13  ;;  %p5483_p13 = scmp.lt.s32.totalorder %s5477_s13, %s5477_s13 }
  0x1e   :  { %p5484_p0 = por %p5483_p13, %p5482_p12 }
  0x20   :  { %p5485_p1 = pnand %p5484_p0, %p5478_p11 }
  0x22   :  { %5488 = shalt.err (!%p5485_p1)
}
  0x23   :  { %69 = dma.hbm_to_vmem [thread:$0]  %s6523_s5, 512, %s5649_s12, [#allocation11], %s5587_s21, %s5587_s21, %s5588_s22  }
  0x24   :  { %s5589_s14 = smov [#allocation4]   ;;  %s5590_s16 = smov [#allocation9]  }
  0x25   :  { %s23_s15 = sshll.u32 %s5589_s14, 4  ;;  %s47_s17 = sshll.u32 %s5590_s16, 4  ;;  %s24_s15 = int_to_ptr.vmem [resolvable:$true] %s23_s15  ;;  %s5686_s17 = int_to_ptr.vmem [resolvable:$true] %s47_s17 }
  0x26   :  { %s5489_s20 = scalar_lea.hbm %s6518_s0, 2048 }
  0x27   :  { %p5490_p2 = scmp.ne.s32.totalorder %s6518_s0, %s5489_s20  ;;  %p5493_p3 = scmp.lt.u32.totalorder %s5489_s20, %s6518_s0 }
  0x29   :  { %p5495_p4 = pnand %p5493_p3, %p5490_p2 }
  0x2b   :  { %5498 = shalt.err (!%p5495_p4)
}
  0x2c   :  { %s5499_s5 = scalar_lea.vmem %s24_s15, 2048  ;;  %p5504_p6 = scmp.lt.s32.totalorder %s24_s15, %s24_s15 }
  0x2d   :  { %p5500_p5 = scmp.ne.s32.totalorder %s24_s15, %s5499_s5  ;;  %p5505_p7 = scmp.lt.s32.totalorder %s5499_s5, %s5499_s5 }
  0x2f   :  { %p5506_p8 = por %p5505_p7, %p5504_p6 }
  0x31   :  { %p5507_p9 = pnand %p5506_p8, %p5500_p5 }
  0x33   :  { %5510 = shalt.err (!%p5507_p9)
}
  0x34   :  { %29 = dma.hbm_to_vmem [thread:$0]  %s6518_s0, 2048, %s24_s15, [#allocation5], %s5587_s21, %s5587_s21, %s5588_s22  }
  0x35   :  { %s5511_s30 = scalar_lea.hbm %s6520_s2, 512 }
  0x36   :  { %p5512_p10 = scmp.ne.s32.totalorder %s6520_s2, %s5511_s30  ;;  %p5515_p11 = scmp.lt.u32.totalorder %s5511_s30, %s6520_s2 }
  0x38   :  { %p5517_p12 = pnand %p5515_p11, %p5512_p10 }
  0x3a   :  { %5520 = shalt.err (!%p5517_p12)
}
  0x3b   :  { %s5521_s14 = scalar_lea.vmem %s5686_s17, 512  ;;  %p5526_p0 = scmp.lt.s32.totalorder %s5686_s17, %s5686_s17 }
  0x3c   :  { %p5522_p13 = scmp.ne.s32.totalorder %s5686_s17, %s5521_s14  ;;  %p5527_p1 = scmp.lt.s32.totalorder %s5521_s14, %s5521_s14 }
  0x3e   :  { %p5528_p2 = por %p5527_p1, %p5526_p0 }
  0x40   :  { %p5529_p3 = pnand %p5528_p2, %p5522_p13 }
  0x42   :  { %5532 = shalt.err (!%p5529_p3)
}
  0x43   :  { %53 = dma.hbm_to_vmem [thread:$0]  %s6520_s2, 512, %s5686_s17, [#allocation8], %s5587_s21, %s5587_s21, %s5588_s22  }
  0x44   :  { %s5591_s16 = smov [#allocation12]   ;;  %s5533_s23 = scalar_lea.hbm %s6525_s7, 512 }
  0x45   :  { %s77_s18 = sshll.u32 %s5591_s16, 4  ;;  %p5534_p4 = scmp.ne.s32.totalorder %s6525_s7, %s5533_s23  ;;  %s78_s18 = int_to_ptr.vmem [resolvable:$true] %s77_s18 }
  0x46   :  { %p5537_p5 = scmp.lt.u32.totalorder %s5533_s23, %s6525_s7 }
  0x48   :  { %p5539_p6 = pnand %p5537_p5, %p5534_p4 }
  0x4a   :  { %5542 = shalt.err (!%p5539_p6)
}
  0x4b   :  { %s5543_s12 = scalar_lea.vmem %s78_s18, 512  ;;  %p5548_p8 = scmp.lt.s32.totalorder %s78_s18, %s78_s18 }
  0x4c   :  { %p5544_p7 = scmp.ne.s32.totalorder %s78_s18, %s5543_s12  ;;  %p5549_p9 = scmp.lt.s32.totalorder %s5543_s12, %s5543_s12 }
  0x4e   :  { %p5550_p10 = por %p5549_p9, %p5548_p8 }
  0x50   :  { %p5551_p11 = pnand %p5550_p10, %p5544_p7 }
  0x52   :  { %5554 = shalt.err (!%p5551_p11)
}
  0x53   :  { %83 = dma.hbm_to_vmem [thread:$0]  %s6525_s7, 512, %s78_s18, [#allocation11], %s5587_s21, %s5587_s21, %s5588_s22  }
  0x54   :  { %5577 = dma.done.wait [#allocation5], 2048  }
  0x55   :  { %5578 = vsyncadd [#allocation5], 4294965248 }
  0x56   :  { %5579 = dma.done.wait [#allocation8], 1536  }
  0x57   :  { %5580 = vsyncadd [#allocation8], 4294965760 }
  0x58   :  { %5581 = dma.done.wait [#allocation11], 1024  }
  0x59   :  { %5582 = vsyncadd [#allocation11], 4294966272  ;;  %vm119_vm0 = vcmask 261120   ;;  %v101_v0 = vld [vmem:[#allocation4] sm:$0xff]  ;;  %v102_v1 = vld [vmem:[#allocation4 + $0x8] sm:$0xff]  ;;  %vm577_vm1 = vcmask 785408  }
  0x5a   :  { %v120_v2 = vsel %vm119_vm0, %v101_v0, 0.0  ;;  %v123_v3 = vsel %vm119_vm0, %v102_v1, 0.0  ;;  %v109_v4 = vld [vmem:[#allocation4 + $0x40] sm:$0xff]  ;;  %v111_v6 = vld [vmem:[#allocation4 + $0x50] sm:$0xff]  ;;  %v110_v21 = vld [vmem:[#allocation4 + $0x48] sm:$0xff]  ;;  %vm602_vm2 = vcmask 130048  }
  0x5b   :  { %121 = vadd.xlane.f32.xlu0 %v120_v2  ;;  %v144_v5 = vsel %vm119_vm0, %v109_v4, 0.0  ;;  %v150_v7 = vsel %vm119_vm0, %v111_v6, 0.0  ;;  %v113_v8 = vld [vmem:[#allocation4 + $0x60] sm:$0xff]  ;;  %v115_v10 = vld [vmem:[#allocation4 + $0x70] sm:$0xff]  ;;  %v147_v23 = vsel %vm119_vm0, %v110_v21, 0.0  ;;  %v5755_v24 = vld [vmem:[#allocation4 + $0x58] sm:$0xff] }
  0x5c   :  { %v156_v9 = vsel %vm119_vm0, %v113_v8, 0.0  ;;  %v162_v11 = vsel %vm119_vm0, %v115_v10, 0.0  ;;  %v153_v25 = vsel %vm119_vm0, %v5755_v24, 0.0  ;;  %v5759_v26 = vld [vmem:[#allocation4 + $0x68] sm:$0xff]  ;;  %v5763_v28 = vld [vmem:[#allocation4 + $0x78] sm:$0xff]  ;;  %v373_v30 = vld [vmem:[#allocation10] sm:$0xff] }
  0x5d   :  { %v159_v27 = vsel %vm119_vm0, %v5759_v26, 0.0  ;;  %v165_v29 = vsel %vm119_vm0, %v5763_v28, 0.0  ;;  %v374_v31 = vld [vmem:[#allocation10 + $0x8] sm:$0xff]  ;;  %v375_v32 = vld [vmem:[#allocation10 + $0x10] sm:$0xff]  ;;  %v376_v34 = vld [vmem:[#allocation10 + $0x18] sm:$0xff]  ;;  %s5593_s30 = smov 80  }
  0x5e   :  { %v4931_v33 = vpack.c.bf16 %v374_v31, %v373_v30  ;;  %v4935_v35 = vpack.c.bf16 %v376_v34, %v375_v32  ;;  %s5594_s11 = smov 112   ;;  %vm5883_vm3 = vmpackc.low %vm602_vm2, %vm602_vm2  ;;  %s5595_s13 = smov 64   ;;  %vm1030_vm4 = vcmask 261248  }
  0x5f   :  { %124 = vadd.xlane.f32.xlu0 %v123_v3  ;;  %s5596_s1 = smov 48   ;;  %s5597_s10 = smov 16  }
  0x60   :  { %4932 = vmatprep.subr.bf16.mxu0 %v4931_v33  ;;  %5107 = vmatprep.subr.bf16.mxu1 %v4931_v33 }
  0x61   :  { %4934 = vmatpush3.bf16.msra.mxu0 %v4931_v33  ;;  %5109 = vmatpush3.bf16.msra.mxu1 %v4931_v33 }
  0x62   :  { %4936 = vmatprep.subr.bf16.mxu0 %v4935_v35  ;;  %5108 = vmatprep.subr.bf16.mxu1 %v4935_v35 }
  0x63   :  { %145 = vadd.xlane.f32.xlu0 %v144_v5  ;;  %v5794_v5 = vld [vmem:[%s6521_s3] ss:$0 sm:$0xff] }
  0x65   :  { %4938 = vmatpush3.bf16.msra.mxu0 %v4935_v35  ;;  %5110 = vmatpush3.bf16.msra.mxu1 %v4935_v35 }
  0x67   :  { %151 = vadd.xlane.f32.xlu0 %v150_v7 }
  0x6b   :  { %157 = vadd.xlane.f32.xlu0 %v156_v9 }
  0x6f   :  { %163 = vadd.xlane.f32.xlu0 %v162_v11 }
  0xe8   :  { %v122_v12 = vpop.xlane.xlu0 %121 }
  0xe9   :  { %v169_v13 = vmul.f32 0.03125, %v122_v12 }
  0xeb   :  { %v5744_v14 = vsub.f32 %v101_v0, %v169_v13 }
  0xec   :  { %v125_v15 = vpop.xlane.xlu0 %124 }
  0xed   :  { %v170_v16 = vmul.f32 0.03125, %v125_v15  ;;  %v201_v17 = vmul.f32 %v5744_v14, %v5744_v14 }
  0xef   :  { %v5748_v18 = vsub.f32 %v102_v1, %v170_v16  ;;  %v217_v19 = vsel %vm119_vm0, %v201_v17, 0.0 }
  0xf0   :  { %218 = vadd.xlane.f32.xlu1 %v217_v19  ;;  %v146_v36 = vpop.xlane.xlu0 %145 }
  0xf1   :  { %v202_v20 = vmul.f32 %v5748_v18, %v5748_v18  ;;  %v177_v37 = vmul.f32 0.03125, %v146_v36 }
  0xf3   :  { %v220_v22 = vsel %vm119_vm0, %v202_v20, 0.0  ;;  %v5767_v38 = vsub.f32 %v109_v4, %v177_v37 }
  0xf4   :  { %221 = vadd.xlane.f32.xlu1 %v220_v22  ;;  %v152_v39 = vpop.xlane.xlu0 %151 }
  0xf5   :  { %v179_v40 = vmul.f32 0.03125, %v152_v39  ;;  %v209_v41 = vmul.f32 %v5767_v38, %v5767_v38 }
  0xf7   :  { %v5771_v42 = vsub.f32 %v111_v6, %v179_v40  ;;  %v241_v43 = vsel %vm119_vm0, %v209_v41, 0.0 }
  0xf8   :  { %148 = vadd.xlane.f32.xlu1 %v147_v23  ;;  %242 = vadd.xlane.f32.xlu0 %v241_v43  ;;  %v158_v44 = vpop.xlane.xlu0 %157 }
  0xf9   :  { %v181_v45 = vmul.f32 0.03125, %v158_v44  ;;  %v211_v46 = vmul.f32 %v5771_v42, %v5771_v42 }
  0xfb   :  { %v5776_v47 = vsub.f32 %v113_v8, %v181_v45  ;;  %v247_v48 = vsel %vm119_vm0, %v211_v46, 0.0 }
  0xfc   :  { %154 = vadd.xlane.f32.xlu1 %v153_v25  ;;  %248 = vadd.xlane.f32.xlu0 %v247_v48  ;;  %v164_v49 = vpop.xlane.xlu0 %163 }
  0xfd   :  { %v183_v50 = vmul.f32 0.03125, %v164_v49  ;;  %v213_v51 = vmul.f32 %v5776_v47, %v5776_v47 }
  0xff   :  { %v5781_v52 = vsub.f32 %v115_v10, %v183_v50  ;;  %v253_v53 = vsel %vm119_vm0, %v213_v51, 0.0  ;;  %v5804_v10 = vld [vmem:[%s6522_s4] ss:$0 sm:$0xff] }
 0x100   :  { %160 = vadd.xlane.f32.xlu1 %v159_v27  ;;  %254 = vadd.xlane.f32.xlu0 %v253_v53 }
 0x101   :  { %v215_v54 = vmul.f32 %v5781_v52, %v5781_v52 }
 0x103   :  { %v259_v55 = vsel %vm119_vm0, %v215_v54, 0.0 }
 0x104   :  { %166 = vadd.xlane.f32.xlu1 %v165_v29  ;;  %260 = vadd.xlane.f32.xlu0 %v259_v55 }
 0x17d   :  { %v219_v56 = vpop.xlane.xlu1 %218 }
 0x17e   :  { %v265_v57 = vmul.f32 0.03125, %v219_v56 }
 0x180   :  { %v281_v58 = vadd.f32 1e-05, %v265_v57 }
 0x181   :  { %v222_v59 = vpop.xlane.xlu1 %221 }
 0x182   :  { %5285 = vrsqrt.f32 %v281_v58  ;;  %v266_v60 = vmul.f32 0.03125, %v222_v59 }
 0x184   :  { %v282_v61 = vadd.f32 1e-05, %v266_v60 }
 0x185   :  { %v149_v62 = vpop.xlane.xlu1 %148  ;;  %v243_v29 = vpop.xlane.xlu0 %242 }
 0x186   :  { %5287 = vrsqrt.f32 %v282_v61  ;;  %v178_v63 = vmul.f32 0.03125, %v149_v62  ;;  %v273_v30 = vmul.f32 0.03125, %v243_v29 }
 0x188   :  { %v5787_v0 = vsub.f32 %v110_v21, %v178_v63  ;;  %v289_v31 = vadd.f32 1e-05, %v273_v30 }
 0x189   :  { %v155_v1 = vpop.xlane.xlu1 %154  ;;  %v249_v35 = vpop.xlane.xlu0 %248 }
 0x18a   :  { %v180_v2 = vmul.f32 0.03125, %v155_v1  ;;  %v210_v3 = vmul.f32 %v5787_v0, %v5787_v0  ;;  %5289 = vrsqrt.f32 %v289_v31  ;;  %v275_v37 = vmul.f32 0.03125, %v249_v35  ;;  %v103_v31 = vld [vmem:[#allocation4 + $0x10] sm:$0xff] }
 0x18b   :  { %v3965_v35 = vld [vmem:[#allocation7 + $0x30] sm:$0xff] }
 0x18c   :  { %v5286_v4 = vpop.eup %5285  ;;  %v5797_v6 = vsub.f32 %v5755_v24, %v180_v2  ;;  %v244_v7 = vsel %vm119_vm0, %v210_v3, 0.0  ;;  %v291_v39 = vadd.f32 1e-05, %v275_v37 }
 0x18d   :  { %v313_v8 = vmul.f32 %v5286_v4, %v5744_v14  ;;  %245 = vadd.xlane.f32.xlu1 %v244_v7  ;;  %v161_v9 = vpop.xlane.xlu1 %160  ;;  %v255_v36 = vpop.xlane.xlu0 %254 }
 0x18e   :  { %v182_v11 = vmul.f32 0.03125, %v161_v9  ;;  %v212_v12 = vmul.f32 %v5797_v6, %v5797_v6  ;;  %v277_v40 = vmul.f32 0.03125, %v255_v36  ;;  %5291 = vrsqrt.f32 %v291_v39 }
 0x18f   :  { %v335_v13 = vmul.f32 %v5794_v5, %v313_v8 }
 0x190   :  { %v5288_v15 = vpop.eup %5287  ;;  %v5810_v16 = vsub.f32 %v5759_v26, %v182_v11  ;;  %v250_v17 = vsel %vm119_vm0, %v212_v12, 0.0  ;;  %v293_v43 = vadd.f32 1e-05, %v277_v40 }
 0x191   :  { %v357_v14 = vadd.f32 %v5804_v10, %v335_v13  ;;  %v314_v19 = vmul.f32 %v5288_v15, %v5748_v18  ;;  %251 = vadd.xlane.f32.xlu1 %v250_v17  ;;  %v167_v20 = vpop.xlane.xlu1 %166  ;;  %v261_v41 = vpop.xlane.xlu0 %260 }
 0x192   :  { %v184_v21 = vmul.f32 0.03125, %v167_v20  ;;  %v214_v22 = vmul.f32 %v5810_v16, %v5810_v16  ;;  %v279_v44 = vmul.f32 0.03125, %v261_v41  ;;  %5293 = vrsqrt.f32 %v293_v43 }
 0x193   :  { %4651 = vmatprep.mubr.msk.f32.mxu0 %vm119_vm0, %v357_v14  ;;  %v336_v23 = vmul.f32 %v5794_v5, %v314_v19 }
 0x194   :  { %v5820_v24 = vsub.f32 %v5763_v28, %v184_v21  ;;  %v256_v25 = vsel %vm119_vm0, %v214_v22, 0.0  ;;  %v5290_v32 = vpop.eup %5289  ;;  %v295_v48 = vadd.f32 1e-05, %v279_v44 }
 0x195   :  { %v358_v26 = vadd.f32 %v5804_v10, %v336_v23  ;;  %257 = vadd.xlane.f32.xlu1 %v256_v25  ;;  %v321_v28 = vmul.f32 %v5290_v32, %v5767_v38  ;;  %v5863_v23 = vld [vmem:[%s6524_s6] ss:$0 sm:$0xff]  ;;  %s5592_s6 = smov 96   ;;  %v126_v32 = vsel %vm119_vm0, %v103_v31, 0.0 }
 0x196   :  { %v216_v18 = vmul.f32 %v5820_v24, %v5820_v24 }
 0x197   :  { %4652 = vmatmul.mubr.msk.f32.vlgmr.msra.gmra.mrb[0].mxu0 %vm119_vm0, %v358_v26  ;;  %v343_v33 = vmul.f32 %v5794_v5, %v321_v28 }
 0x198   :  { %v262_v27 = vsel %vm119_vm0, %v216_v18, 0.0  ;;  %v5292_v53 = vpop.eup %5291 }
 0x199   :  { %263 = vadd.xlane.f32.xlu1 %v262_v27  ;;  %v365_v34 = vadd.f32 %v5804_v10, %v343_v33  ;;  %v323_v57 = vmul.f32 %v5292_v53, %v5771_v42 }
 0x19b   :  { %4663 = vmatprep.mubr.msk.f32.mxu1 %vm119_vm0, %v365_v34  ;;  %v345_v63 = vmul.f32 %v5794_v5, %v323_v57 }
 0x19c   :  { %v5294_v58 = vpop.eup %5293 }
 0x19d   :  { %v325_v1 = vmul.f32 %v5294_v58, %v5776_v47  ;;  %v367_v8 = vadd.f32 %v5804_v10, %v345_v63 }
 0x19f   :  { %v347_v42 = vmul.f32 %v5794_v5, %v325_v1  ;;  %v5917_v1 = vld [vmem:[#allocation7] sm:$0xff] }
 0x21a   :  { %v246_v45 = vpop.xlane.xlu1 %245 }
 0x21b   :  { %v274_v46 = vmul.f32 0.03125, %v246_v45 }
 0x21d   :  { %v290_v38 = vadd.f32 1e-05, %v274_v46 }
 0x21e   :  { %v252_v49 = vpop.xlane.xlu1 %251 }
 0x21f   :  { %5295 = vrsqrt.f32 %v290_v38  ;;  %v276_v50 = vmul.f32 0.03125, %v252_v49 }
 0x220   :  { %5297 = vrsqrt.f32 %v295_v48 }
 0x221   :  { %v292_v51 = vadd.f32 1e-05, %v276_v50 }
 0x222   :  { %v258_v54 = vpop.xlane.xlu1 %257 }
 0x223   :  { %5299 = vrsqrt.f32 %v292_v51  ;;  %v278_v55 = vmul.f32 0.03125, %v258_v54 }
 0x225   :  { %v294_v56 = vadd.f32 1e-05, %v278_v55 }
 0x226   :  { %v264_v59 = vpop.xlane.xlu1 %263 }
 0x227   :  { %5301 = vrsqrt.f32 %v294_v56  ;;  %v280_v60 = vmul.f32 0.03125, %v264_v59  ;;  %v5909_v56 = vld [vmem:[#allocation4 + $0x20] sm:$0xff] }
 0x228   :  { %v132_v57 = vsel %vm119_vm0, %v5909_v56, 0.0 }
 0x229   :  { %v5296_v61 = vpop.eup %5295  ;;  %v296_v62 = vadd.f32 1e-05, %v280_v60  ;;  %v5913_v60 = vld [vmem:[#allocation9 + $0x8] sm:$0xff] }
 0x22a   :  { %v5298_v2 = vpop.eup %5297  ;;  %v322_v3 = vmul.f32 %v5296_v61, %v5787_v0  ;;  %v369_v0 = vadd.f32 %v5804_v10, %v347_v42 }
 0x22b   :  { %5303 = vrsqrt.f32 %v296_v62  ;;  %v327_v9 = vmul.f32 %v5298_v2, %v5781_v52  ;;  %v5915_v62 = vld [vmem:[#allocation9] sm:$0xff] }
 0x22c   :  { %v344_v4 = vmul.f32 %v5794_v5, %v322_v3 }
 0x22d   :  { %v5300_v7 = vpop.eup %5299  ;;  %v349_v15 = vmul.f32 %v5794_v5, %v327_v9 }
 0x22e   :  { %v366_v11 = vadd.f32 %v5804_v10, %v344_v4  ;;  %v324_v12 = vmul.f32 %v5300_v7, %v5797_v6  ;;  %v5921_v4 = vld [vmem:[#allocation7 + $0x8] sm:$0xff] }
 0x22f   :  { %v371_v19 = vadd.f32 %v5804_v10, %v349_v15 }
 0x230   :  { %4664 = vmatmul.mubr.msk.f32.vlgmr.msra.gmra.mrb[0].mxu1 %vm119_vm0, %v366_v11  ;;  %v346_v47 = vmul.f32 %v5794_v5, %v324_v12 }
 0x231   :  { %v5302_v13 = vpop.eup %5301  ;;  %4666 = vmatprep.mubr.msk.f32.mxu1 %vm119_vm0, %v367_v8 }
 0x232   :  { %v368_v17 = vadd.f32 %v5804_v10, %v346_v47  ;;  %v326_v14 = vmul.f32 %v5302_v13, %v5810_v16 }
 0x234   :  { %4667 = vmatmul.mubr.msk.f32.gmra.mrb[2].mxu1 %vm119_vm0, %v368_v17  ;;  %v348_v52 = vmul.f32 %v5794_v5, %v326_v14  ;;  %v104_v17 = vld [vmem:[#allocation4 + $0x18] sm:$0xff] }
 0x235   :  { %v5304_v6 = vpop.eup %5303  ;;  %4669 = vmatprep.mubr.msk.f32.mxu1 %vm119_vm0, %v369_v0  ;;  %v129_v14 = vsel %vm119_vm0, %v104_v17, 0.0 }
 0x236   :  { %v370_v20 = vadd.f32 %v5804_v10, %v348_v52  ;;  %v328_v21 = vmul.f32 %v5304_v6, %v5820_v24 }
 0x238   :  { %4670 = vmatmul.mubr.msk.f32.gmra.mrb[4].mxu1 %vm119_vm0, %v370_v20  ;;  %v350_v22 = vmul.f32 %v5794_v5, %v328_v21 }
 0x239   :  { %4672 = vmatprep.mubr.msk.f32.mxu1 %vm119_vm0, %v371_v19 }
 0x23a   :  { %v372_v16 = vadd.f32 %v5804_v10, %v350_v22 }
 0x23c   :  { %4673 = vmatmul.mubr.msk.f32.gmra.mrb[6].mxu1 %vm119_vm0, %v372_v16 }
 0x26a   :  { %v4653_v25 = vpop.f32.mrb[0].mxu0 }
 0x26b   :  { %v504_v26 = vadd.f32 %v4653_v25, %v5863_v23  ;;  %v498_v24 = vpop.f32.mrb[1].mxu0 }
 0x26c   :  { %v499_v18 = vadd.f32 %v5863_v23, %v498_v24 }
 0x26d   :  { %579 = vst.msk [vmem:[#allocation2 + $0x8] sm:$0xff] %vm577_vm1, %v504_v26 }
 0x26e   :  { %578 = vst.msk [vmem:[#allocation2] sm:$0xff] %vm577_vm1, %v499_v18 }
 0x274   :  { %v5869_v27 = vld [vmem:[#allocation2 + $0x8] sm:$0xff] }
 0x275   :  { %v594_v29 = vld [vmem:[#allocation2] sm:$0xff] }
 0x276   :  { %4679 = vmatprep.mubr.msk.f32.mxu1 %vm602_vm2, %v594_v29  ;;  %v5873_v30 = vpack.i.bf16 %v5869_v27, %v594_v29 }
 0x278   :  { %5126 = vrot.lane.b32.xlu0 %v5873_v30, %s5592_s6 }
 0x27c   :  { %5136 = vrot.lane.b32.xlu0 %v5873_v30, %s5593_s30 }
 0x29b   :  { %127 = vadd.xlane.f32.xlu0 %v126_v32 }
 0x2b1   :  { %811 = vrot.lane.b32.xlu0 %v594_v29, %s5594_s11 }
 0x2d0   :  { %133 = vadd.xlane.f32.xlu0 %v132_v57  ;;  %v106_v57 = vld [vmem:[#allocation4 + $0x28] sm:$0xff] }
 0x2ea   :  { %v5127_v28 = vpop.permute.xlu0 %5126 }
 0x2eb   :  { %v5129_v33 = vunpack.i.h.bf16 %v5127_v28  ;;  %v5128_v34 = vunpack.i.l.bf16 %v5127_v28 }
 0x2ed   :  { %v4939_v36 = vpack.c.bf16 %v5129_v33, %v5128_v34 }
 0x2ee   :  { %v5137_v11 = vpop.permute.xlu0 %5136 }
 0x2ef   :  { %4941 = vmatprep.subr.msk.bf16.mxu1 %vm5883_vm3, %v4939_v36  ;;  %v5139_v16 = vunpack.i.h.bf16 %v5137_v11  ;;  %v5138_v26 = vunpack.i.l.bf16 %v5137_v11 }
 0x2f0   :  { %4944 = vmatpush3.bf16.xpose.msk.msra.mxu1 %vm5883_vm3, %v4939_v36 }
 0x2f7   :  { %4680 = vmatmul.mubr.msk.f32.vlgmr.msra.gmra.mrb[8].mxu1 %vm602_vm2, %v5869_v27 }
 0x303   :  { %v4665_v37 = vpop.f32.mrb[0].mxu1 }
 0x304   :  { %v544_v39 = vadd.f32 %v4665_v37, %v5863_v23  ;;  %v538_v40 = vpop.f32.mrb[1].mxu1 }
 0x305   :  { %v539_v41 = vadd.f32 %v5863_v23, %v538_v40 }
 0x306   :  { %587 = vst.msk [vmem:[#allocation2 + $0x48] sm:$0xff] %vm577_vm1, %v544_v39 }
 0x307   :  { %586 = vst.msk [vmem:[#allocation2 + $0x40] sm:$0xff] %vm577_vm1, %v539_v41  ;;  %v4668_v43 = vpop.f32.mrb[2].mxu1 }
 0x308   :  { %v554_v44 = vadd.f32 %v4668_v43, %v5863_v23  ;;  %v548_v45 = vpop.f32.mrb[3].mxu1 }
 0x309   :  { %v549_v46 = vadd.f32 %v5863_v23, %v548_v45 }
 0x30a   :  { %589 = vst.msk [vmem:[#allocation2 + $0x58] sm:$0xff] %vm577_vm1, %v554_v44 }
 0x30b   :  { %588 = vst.msk [vmem:[#allocation2 + $0x50] sm:$0xff] %vm577_vm1, %v549_v46  ;;  %v4671_v48 = vpop.f32.mrb[4].mxu1 }
 0x30c   :  { %v564_v38 = vadd.f32 %v4671_v48, %v5863_v23  ;;  %v558_v49 = vpop.f32.mrb[5].mxu1 }
 0x30d   :  { %v559_v50 = vadd.f32 %v5863_v23, %v558_v49 }
 0x30e   :  { %591 = vst.msk [vmem:[#allocation2 + $0x68] sm:$0xff] %vm577_vm1, %v564_v38 }
 0x30f   :  { %590 = vst.msk [vmem:[#allocation2 + $0x60] sm:$0xff] %vm577_vm1, %v559_v50  ;;  %v4674_v51 = vpop.f32.mrb[6].mxu1 }
 0x310   :  { %v574_v53 = vadd.f32 %v4674_v51, %v5863_v23  ;;  %v568_v54 = vpop.f32.mrb[7].mxu1 }
 0x311   :  { %v569_v55 = vadd.f32 %v5863_v23, %v568_v54 }
 0x312   :  { %593 = vst.msk [vmem:[#allocation2 + $0x78] sm:$0xff] %vm577_vm1, %v574_v53 }
 0x313   :  { %592 = vst.msk [vmem:[#allocation2 + $0x70] sm:$0xff] %vm577_vm1, %v569_v55 }
 0x328   :  { %v128_v12 = vpop.xlane.xlu0 %127 }
 0x329   :  { %v171_v47 = vmul.f32 0.03125, %v128_v12 }
 0x32b   :  { %v187_v13 = vsub.f32 %v103_v31, %v171_v47  ;;  %v4949_v31 = vpack.c.bf16 %v5139_v16, %v5138_v26 }
 0x32c   :  { %v812_v36 = vpop.permute.xlu0 %811 }
 0x32d   :  { %v203_v0 = vmul.f32 %v187_v13, %v187_v13 }
 0x32f   :  { %v223_v15 = vsel %vm119_vm0, %v203_v0, 0.0 }
 0x330   :  { %224 = vadd.xlane.f32.xlu0 %v223_v15 }
 0x35d   :  { %v134_v37 = vpop.xlane.xlu0 %133 }
 0x35e   :  { %v173_v43 = vmul.f32 0.03125, %v134_v37  ;;  %v5962_v37 = vld [vmem:[#allocation9 + $0x18] sm:$0xff] }
 0x360   :  { %v189_v48 = vsub.f32 %v5909_v56, %v173_v43 }
 0x362   :  { %v205_v51 = vmul.f32 %v189_v48, %v189_v48 }
 0x364   :  { %v229_v55 = vsel %vm119_vm0, %v205_v51, 0.0 }
 0x3bd   :  { %v225_v39 = vpop.xlane.xlu0 %224 }
 0x3be   :  { %v267_v40 = vmul.f32 0.03125, %v225_v39 }
 0x3c0   :  { %v283_v41 = vadd.f32 1e-05, %v267_v40 }
 0x3ca   :  { %v4681_v58 = vpop.f32.mrb[8].mxu1 }
 0x3cb   :  { %v687_v59 = vmul.f32 0.25, %v4681_v58  ;;  %v677_v61 = vpop.f32.mrb[9].mxu1  ;;  %v135_v58 = vsel %vm119_vm0, %v106_v57, 0.0 }
 0x3cc   :  { %v686_v63 = vmul.f32 0.25, %v677_v61 }
 0x3cd   :  { %v691_v2 = vadd.f32 %v5913_v60, %v687_v59 }
 0x3ce   :  { %v690_v3 = vadd.f32 %v5915_v62, %v686_v63 }
 0x3cf   :  { %v695_v42 = vadd.f32 %v5921_v4, %v691_v2 }
 0x3d0   :  { %v694_v7 = vadd.f32 %v5917_v1, %v690_v3 }
 0x3d1   :  { %v699_v9 = vsel %vm602_vm2, %v695_v42, -inf }
 0x3d2   :  { %v696_v8 = vsel %vm602_vm2, %v694_v7, -inf }
 0x3d3   :  { %697 = vmax.xlane.f32.xlu1 %v696_v8 }
 0x3d7   :  { %700 = vmax.xlane.f32.xlu1 %v699_v9 }
 0x3e8   :  { %5131 = vrot.lane.b32.xlu1 %v5873_v30, %s5595_s13 }
 0x40c   :  { %130 = vadd.xlane.f32.xlu1 %v129_v14 }
 0x460   :  { %v698_v52 = vpop.xlane.xlu1 %697 }
 0x461   :  { %v702_v6 = vsub.f32 %v694_v7, %v698_v52 }
 0x463   :  { %v704_v21 = vmul.f32 1.442695, %v702_v6 }
 0x464   :  { %v701_v19 = vpop.xlane.xlu1 %700 }
 0x465   :  { %v703_v20 = vsub.f32 %v695_v42, %v701_v19 }
 0x467   :  { %v706_v22 = vmul.f32 1.442695, %v703_v20 }
 0x468   :  { %v5132_v25 = vpop.permute.xlu1 %5131 }
 0x469   :  { %5305 = vpow2.f32 %v706_v22  ;;  %v5134_v24 = vunpack.i.h.bf16 %v5132_v25  ;;  %v5133_v18 = vunpack.i.l.bf16 %v5132_v25 }
 0x46a   :  { %5307 = vpow2.f32 %v704_v21 }
 0x46b   :  { %v4945_v29 = vpack.c.bf16 %v5134_v24, %v5133_v18  ;;  %5309 = vrsqrt.f32 %v283_v41  ;;  %v5964_v41 = vld [vmem:[#allocation9 + $0x10] sm:$0xff] }
 0x46d   :  { %4946 = vmatprep.subr.bf16.mxu1 %v4945_v29 }
 0x46e   :  { %4948 = vmatpush3.bf16.msra.mxu1 %v4945_v29 }
 0x46f   :  { %4951 = vmatprep.subr.msk.bf16.mxu1 %vm5883_vm3, %v4949_v31 }
 0x473   :  { %v5306_v32 = vpop.eup %5305 }
 0x474   :  { %v711_v28 = vsel %vm602_vm2, %v5306_v32, 0.0  ;;  %v5308_v33 = vpop.eup %5307 }
 0x475   :  { %712 = vadd.xlane.f32.xlu1 %v711_v28  ;;  %v708_v34 = vsel %vm602_vm2, %v5308_v33, 0.0  ;;  %v5310_v44 = vpop.eup %5309 }
 0x476   :  { %v315_v49 = vmul.f32 %v5310_v44, %v187_v13 }
 0x478   :  { %v337_v53 = vmul.f32 %v5794_v5, %v315_v49 }
 0x479   :  { %709 = vadd.xlane.f32.xlu1 %v708_v34 }
 0x48a   :  { %813 = vrot.lane.b32.xlu1 %v5869_v27, %s5594_s11  ;;  %v359_v27 = vadd.f32 %v5804_v10, %v337_v53 }
 0x48c   :  { %4654 = vmatprep.mubr.msk.f32.mxu0 %vm119_vm0, %v359_v27 }
 0x499   :  { %v131_v45 = vpop.xlane.xlu1 %130 }
 0x49a   :  { %v172_v46 = vmul.f32 0.03125, %v131_v45 }
 0x49c   :  { %v188_v38 = vsub.f32 %v104_v17, %v172_v46 }
 0x49e   :  { %v204_v50 = vmul.f32 %v188_v38, %v188_v38 }
 0x4a0   :  { %v226_v54 = vsel %vm119_vm0, %v204_v50, 0.0  ;;  %v107_v50 = vld [vmem:[#allocation4 + $0x30] sm:$0xff] }
 0x4a1   :  { %227 = vadd.xlane.f32.xlu0 %v226_v54  ;;  %v138_v54 = vsel %vm119_vm0, %v107_v50, 0.0 }
 0x4a5   :  { %230 = vadd.xlane.f32.xlu0 %v229_v55 }
 0x4ae   :  { %136 = vadd.xlane.f32.xlu1 %v135_v58 }
 0x502   :  { %v713_v56 = vpop.xlane.xlu1 %712 }
 0x503   :  { %5311 = vrcp.f32 %v713_v56 }
 0x506   :  { %v710_v59 = vpop.xlane.xlu1 %709 }
 0x507   :  { %5313 = vrcp.f32 %v710_v59 }
 0x50a   :  { %v814_v7 = vpop.permute.xlu1 %813 }
 0x50d   :  { %v5312_v61 = vpop.eup %5311 }
 0x50e   :  { %v717_v3 = vmul.f32 %v5312_v61, %v5306_v32 }
 0x511   :  { %v5314_v63 = vpop.eup %5313 }
 0x512   :  { %v716_v2 = vmul.f32 %v5314_v63, %v5308_v33 }
 0x514   :  { %4686 = vmatprep.mubr.msk.f32.mxu1 %vm602_vm2, %v716_v2 }
 0x515   :  { %4687 = vmatmul.mubr.msk.f32.vlgmr.msra.gmra.mrb[10].mxu1 %vm602_vm2, %v717_v3 }
 0x516   :  { %4954 = vmatpush3.bf16.xpose.msk.msra.mxu1 %vm5883_vm3, %v4949_v31  ;;  %4693 = vmatprep.mubr.msk.f32.mxu1 %vm602_vm2, %v812_v36 }
 0x51d   :  { %4694 = vmatmul.mubr.msk.f32.vlgmr.msra.gmra.mrb[12].mxu1 %vm602_vm2, %v814_v7 }
 0x52e   :  { %v228_v8 = vpop.xlane.xlu0 %227 }
 0x52f   :  { %v268_v42 = vmul.f32 0.03125, %v228_v8 }
 0x531   :  { %v284_v9 = vadd.f32 1e-05, %v268_v42 }
 0x532   :  { %v231_v11 = vpop.xlane.xlu0 %230 }
 0x533   :  { %5315 = vrsqrt.f32 %v284_v9  ;;  %v269_v12 = vmul.f32 0.03125, %v231_v11 }
 0x535   :  { %v285_v47 = vadd.f32 1e-05, %v269_v12 }
 0x537   :  { %5317 = vrsqrt.f32 %v285_v47 }
 0x53b   :  { %v137_v13 = vpop.xlane.xlu1 %136 }
 0x53c   :  { %v174_v0 = vmul.f32 0.03125, %v137_v13 }
 0x53d   :  { %v5316_v15 = vpop.eup %5315 }
 0x53e   :  { %v190_v17 = vsub.f32 %v106_v57, %v174_v0  ;;  %v316_v14 = vmul.f32 %v5316_v15, %v188_v38  ;;  %v108_v38 = vld [vmem:[#allocation4 + $0x38] sm:$0xff] }
 0x53f   :  { %v141_v53 = vsel %vm119_vm0, %v108_v38, 0.0 }
 0x540   :  { %v206_v52 = vmul.f32 %v190_v17, %v190_v17  ;;  %v338_v6 = vmul.f32 %v5794_v5, %v316_v14 }
 0x541   :  { %v5318_v19 = vpop.eup %5317 }
 0x542   :  { %v232_v20 = vsel %vm119_vm0, %v206_v52, 0.0  ;;  %v360_v21 = vadd.f32 %v5804_v10, %v338_v6  ;;  %v317_v22 = vmul.f32 %v5318_v19, %v189_v48 }
 0x543   :  { %233 = vadd.xlane.f32.xlu0 %v232_v20 }
 0x544   :  { %4655 = vmatmul.mubr.msk.f32.gmra.mrb[2].mxu0 %vm119_vm0, %v360_v21  ;;  %v339_v16 = vmul.f32 %v5794_v5, %v317_v22 }
 0x546   :  { %v361_v25 = vadd.f32 %v5804_v10, %v339_v16 }
 0x548   :  { %4657 = vmatprep.mubr.msk.f32.mxu0 %vm119_vm0, %v361_v25 }
 0x5d0   :  { %v234_v26 = vpop.xlane.xlu0 %233 }
 0x5d1   :  { %v270_v24 = vmul.f32 0.03125, %v234_v26 }
 0x5d3   :  { %v286_v18 = vadd.f32 1e-05, %v270_v24 }
 0x5d5   :  { %5319 = vrsqrt.f32 %v286_v18 }
 0x5df   :  { %v5320_v29 = vpop.eup %5319 }
 0x5e0   :  { %v318_v31 = vmul.f32 %v5320_v29, %v190_v17 }
 0x5e2   :  { %v340_v32 = vmul.f32 %v5794_v5, %v318_v31 }
 0x5e4   :  { %v362_v28 = vadd.f32 %v5804_v10, %v340_v32 }
 0x5e6   :  { %4658 = vmatmul.mubr.msk.f32.gmra.mrb[4].mxu0 %vm119_vm0, %v362_v28 }
 0x5e8   :  { %v4688_v33 = vpop.f32.mrb[10].mxu1 }
 0x5e9   :  { %806 = vst.msk [vmem:[#allocation3 + $0x8] sm:$0xff] %vm602_vm2, %v4688_v33  ;;  %v796_v34 = vpop.f32.mrb[11].mxu1 }
 0x5ea   :  { %805 = vst.msk [vmem:[#allocation3] sm:$0xff] %vm602_vm2, %v796_v34 }
 0x5f0   :  { %v4695_v36 = vpop.f32.mrb[12].mxu1 }
 0x5f1   :  { %v903_v39 = vmul.f32 0.25, %v4695_v36  ;;  %v893_v40 = vpop.f32.mrb[13].mxu1 }
 0x5f2   :  { %v902_v43 = vmul.f32 0.25, %v893_v40 }
 0x5f3   :  { %v908_v44 = vadd.f32 %v5962_v37, %v903_v39 }
 0x5f4   :  { %v907_v45 = vadd.f32 %v5964_v41, %v902_v43 }
 0x5f5   :  { %v912_v46 = vadd.f32 %v908_v44, %v5921_v4 }
 0x5f6   :  { %v911_v48 = vadd.f32 %v907_v45, %v5917_v1 }
 0x5f7   :  { %v916_v49 = vsel %vm602_vm2, %v912_v46, -inf }
 0x5f8   :  { %917 = vmax.xlane.f32.xlu0 %v916_v49  ;;  %v913_v51 = vsel %vm602_vm2, %v911_v48, -inf }
 0x5f9   :  { %914 = vmax.xlane.f32.xlu1 %v913_v51 }
 0x5fc   :  { %142 = vadd.xlane.f32.xlu0 %v141_v53 }
 0x5fd   :  { %139 = vadd.xlane.f32.xlu1 %v138_v54 }
 0x617   :  { %v4656_v27 = vpop.f32.mrb[2].mxu0 }
 0x618   :  { %v514_v55 = vadd.f32 %v4656_v27, %v5863_v23  ;;  %v508_v4 = vpop.f32.mrb[3].mxu0 }
 0x619   :  { %v509_v1 = vadd.f32 %v5863_v23, %v508_v4 }
 0x61a   :  { %581 = vst.msk [vmem:[#allocation2 + $0x18] sm:$0xff] %vm577_vm1, %v514_v55 }
 0x61b   :  { %580 = vst.msk [vmem:[#allocation2 + $0x10] sm:$0xff] %vm577_vm1, %v509_v1 }
 0x621   :  { %v5994_v15 = vld [vmem:[#allocation2 + $0x18] sm:$0xff] }
 0x622   :  { %v5992_v0 = vld [vmem:[#allocation2 + $0x10] sm:$0xff] }
 0x623   :  { %v6000_v17 = vpack.i.bf16 %v5994_v15, %v5992_v0 }
 0x685   :  { %v918_v57 = vpop.xlane.xlu0 %917 }
 0x686   :  { %v920_v58 = vsub.f32 %v912_v46, %v918_v57  ;;  %v915_v56 = vpop.xlane.xlu1 %914 }
 0x687   :  { %v919_v14 = vsub.f32 %v911_v48, %v915_v56 }
 0x688   :  { %v923_v59 = vmul.f32 1.442695, %v920_v58 }
 0x689   :  { %v143_v61 = vpop.xlane.xlu0 %142  ;;  %v921_v52 = vmul.f32 1.442695, %v919_v14 }
 0x68a   :  { %5321 = vpow2.f32 %v923_v59  ;;  %v176_v63 = vmul.f32 0.03125, %v143_v61  ;;  %v140_v2 = vpop.xlane.xlu1 %139 }
 0x68b   :  { %v175_v3 = vmul.f32 0.03125, %v140_v2  ;;  %5323 = vpow2.f32 %v921_v52 }
 0x68c   :  { %v5978_v7 = vsub.f32 %v108_v38, %v176_v63 }
 0x68d   :  { %v5980_v8 = vsub.f32 %v107_v50, %v175_v3 }
 0x68e   :  { %v208_v42 = vmul.f32 %v5978_v7, %v5978_v7 }
 0x68f   :  { %v207_v9 = vmul.f32 %v5980_v8, %v5980_v8 }
 0x690   :  { %v238_v11 = vsel %vm119_vm0, %v208_v42, 0.0 }
 0x691   :  { %239 = vadd.xlane.f32.xlu0 %v238_v11  ;;  %v235_v12 = vsel %vm119_vm0, %v207_v9, 0.0 }
 0x692   :  { %236 = vadd.xlane.f32.xlu1 %v235_v12 }
 0x694   :  { %v5988_v47 = vpop.eup %5321 }
 0x695   :  { %v928_v13 = vsel %vm602_vm2, %v5988_v47, 0.0  ;;  %v5324_v21 = vpop.eup %5323 }
 0x696   :  { %929 = vadd.xlane.f32.xlu0 %v928_v13  ;;  %v925_v22 = vsel %vm602_vm2, %v5324_v21, 0.0 }
 0x6a3   :  { %5141 = vrot.lane.b32.xlu1 %v5873_v30, %s5596_s1 }
 0x6a7   :  { %5151 = vrot.lane.b32.xlu1 %v6000_v17, %s5593_s30 }
 0x6ac   :  { %5146 = vrot.lane.b32.xlu0 %v6000_v17, %s5592_s6 }
 0x6b0   :  { %1252 = vrot.lane.b32.xlu0 %v5994_v15, %s5594_s11 }
 0x6b9   :  { %v4659_v6 = vpop.f32.mrb[4].mxu0 }
 0x6ba   :  { %v524_v19 = vadd.f32 %v4659_v6, %v5863_v23  ;;  %v518_v20 = vpop.f32.mrb[5].mxu0 }
 0x6bb   :  { %v519_v30 = vadd.f32 %v5863_v23, %v518_v20 }
 0x6bc   :  { %583 = vst.msk [vmem:[#allocation2 + $0x28] sm:$0xff] %vm577_vm1, %v524_v19 }
 0x6bd   :  { %582 = vst.msk [vmem:[#allocation2 + $0x20] sm:$0xff] %vm577_vm1, %v519_v30 }
 0x6c3   :  { %v6015_v25 = vld [vmem:[#allocation2 + $0x28] sm:$0xff] }
 0x6c4   :  { %v6013_v16 = vld [vmem:[#allocation2 + $0x20] sm:$0xff] }
 0x6c5   :  { %v6021_v26 = vpack.i.bf16 %v6015_v25, %v6013_v16 }
 0x6cb   :  { %926 = vadd.xlane.f32.xlu1 %v925_v22 }
 0x6dc   :  { %1250 = vrot.lane.b32.xlu1 %v5992_v0, %s5594_s11 }
 0x6e0   :  { %5156 = vrot.lane.b32.xlu1 %v6021_v26, %s5592_s6 }
 0x71e   :  { %v240_v24 = vpop.xlane.xlu0 %239 }
 0x71f   :  { %v272_v18 = vmul.f32 0.03125, %v240_v24  ;;  %v237_v29 = vpop.xlane.xlu1 %236 }
 0x720   :  { %v271_v31 = vmul.f32 0.03125, %v237_v29 }
 0x721   :  { %v288_v32 = vadd.f32 1e-05, %v272_v18 }
 0x722   :  { %v287_v28 = vadd.f32 1e-05, %v271_v31 }
 0x723   :  { %5325 = vrsqrt.f32 %v288_v32  ;;  %v930_v33 = vpop.xlane.xlu0 %929  ;;  %v5142_v34 = vpop.permute.xlu1 %5141  ;;  %v6070_v32 = vld [vmem:[#allocation7 + $0x18] sm:$0xff] }
 0x724   :  { %5327 = vrsqrt.f32 %v287_v28  ;;  %v5144_v36 = vunpack.i.h.bf16 %v5142_v34  ;;  %v5143_v39 = vunpack.i.l.bf16 %v5142_v34  ;;  %v6072_v28 = vld [vmem:[#allocation7 + $0x10] sm:$0xff]  ;;  %v6075_v34 = vld [vmem:[#allocation7 + $0x20] sm:$0xff] }
 0x725   :  { %5329 = vrcp.f32 %v930_v33 }
 0x726   :  { %v4955_v40 = vpack.c.bf16 %v5144_v36, %v5143_v39 }
 0x727   :  { %v5147_v43 = vpop.permute.xlu0 %5146  ;;  %v5152_v44 = vpop.permute.xlu1 %5151 }
 0x728   :  { %v5149_v45 = vunpack.i.h.bf16 %v5147_v43  ;;  %v5148_v46 = vunpack.i.l.bf16 %v5147_v43  ;;  %v5154_v48 = vunpack.i.h.bf16 %v5152_v44  ;;  %v5153_v38 = vunpack.i.l.bf16 %v5152_v44  ;;  %4956 = vmatprep.subr.bf16.mxu1 %v4955_v40 }
 0x729   :  { %4958 = vmatpush3.bf16.msra.mxu1 %v4955_v40 }
 0x72a   :  { %v4959_v49 = vpack.c.bf16 %v5149_v45, %v5148_v46  ;;  %v4969_v50 = vpack.c.bf16 %v5154_v48, %v5153_v38 }
 0x72b   :  { %v1253_v59 = vpop.permute.xlu0 %1252 }
 0x72c   :  { %4961 = vmatprep.subr.msk.bf16.mxu1 %vm5883_vm3, %v4959_v49  ;;  %4971 = vmatprep.subr.msk.bf16.mxu0 %vm5883_vm3, %v4969_v50 }
 0x72d   :  { %v5326_v51 = vpop.eup %5325  ;;  %4974 = vmatpush3.bf16.xpose.msk.msra.mxu0 %vm5883_vm3, %v4969_v50 }
 0x72e   :  { %v5328_v53 = vpop.eup %5327  ;;  %v320_v54 = vmul.f32 %v5326_v51, %v5978_v7  ;;  %v6087_v51 = vld [vmem:[#allocation7 + $0x28] sm:$0xff] }
 0x72f   :  { %v319_v27 = vmul.f32 %v5328_v53, %v5980_v8 }
 0x730   :  { %v342_v55 = vmul.f32 %v5794_v5, %v320_v54 }
 0x731   :  { %v341_v4 = vmul.f32 %v5794_v5, %v319_v27 }
 0x732   :  { %v364_v57 = vadd.f32 %v5804_v10, %v342_v55 }
 0x733   :  { %v363_v1 = vadd.f32 %v5804_v10, %v341_v4  ;;  %v5330_v10 = vpop.eup %5329 }
 0x734   :  { %v934_v8 = vmul.f32 %v5330_v10, %v5988_v47 }
 0x735   :  { %4660 = vmatprep.mubr.msk.f32.mxu0 %vm119_vm0, %v363_v1 }
 0x736   :  { %4661 = vmatmul.mubr.msk.f32.gmra.mrb[6].mxu0 %vm119_vm0, %v364_v57 }
 0x758   :  { %v927_v58 = vpop.xlane.xlu1 %926 }
 0x759   :  { %5331 = vrcp.f32 %v927_v58 }
 0x75c   :  { %v1251_v56 = vpop.permute.xlu1 %1250 }
 0x75d   :  { %4721 = vmatprep.mubr.msk.f32.mxu0 %vm602_vm2, %v1251_v56 }
 0x75e   :  { %4722 = vmatmul.mubr.msk.f32.vlgmr.msra.gmra.mrb[8].mxu0 %vm602_vm2, %v1253_v59 }
 0x75f   :  { %4735 = vmatprep.mubr.msk.f32.mxu0 %vm602_vm2, %v6013_v16 }
 0x760   :  { %v5157_v5 = vpop.permute.xlu1 %5156 }
 0x761   :  { %v5159_v61 = vunpack.i.h.bf16 %v5157_v5  ;;  %v5158_v63 = vunpack.i.l.bf16 %v5157_v5 }
 0x763   :  { %v5332_v2 = vpop.eup %5331  ;;  %v4979_v3 = vpack.c.bf16 %v5159_v61, %v5158_v63 }
 0x764   :  { %v933_v7 = vmul.f32 %v5332_v2, %v5324_v21 }
 0x765   :  { %4981 = vmatprep.subr.msk.bf16.mxu0 %vm5883_vm3, %v4979_v3 }
 0x766   :  { %4700 = vmatprep.mubr.msk.f32.mxu1 %vm602_vm2, %v933_v7  ;;  %4984 = vmatpush3.bf16.xpose.msk.msra.mxu0 %vm5883_vm3, %v4979_v3 }
 0x767   :  { %4701 = vmatmul.mubr.msk.f32.vlgmr.msra.gmra.mrb[14].mxu1 %vm602_vm2, %v934_v8 }
 0x768   :  { %4964 = vmatpush3.bf16.xpose.msk.msra.mxu1 %vm5883_vm3, %v4959_v49  ;;  %4707 = vmatprep.mubr.msk.f32.mxu1 %vm602_vm2, %v5992_v0 }
 0x76d   :  { %4736 = vmatmul.mubr.msk.f32.vlgmr.msra.gmra.mrb[10].mxu0 %vm602_vm2, %v6015_v25 }
 0x76f   :  { %4708 = vmatmul.mubr.msk.f32.vlgmr.msra.gmra.mrb[16].mxu1 %vm602_vm2, %v5994_v15 }
 0x809   :  { %v4662_v42 = vpop.f32.mrb[6].mxu0 }
 0x80a   :  { %v534_v9 = vadd.f32 %v4662_v42, %v5863_v23  ;;  %v528_v11 = vpop.f32.mrb[7].mxu0 }
 0x80b   :  { %v529_v12 = vadd.f32 %v5863_v23, %v528_v11 }
 0x80c   :  { %585 = vst.msk [vmem:[#allocation2 + $0x38] sm:$0xff] %vm577_vm1, %v534_v9 }
 0x80d   :  { %584 = vst.msk [vmem:[#allocation2 + $0x30] sm:$0xff] %vm577_vm1, %v529_v12 }
 0x831   :  { %v4723_v47 = vpop.f32.mrb[8].mxu0 }
 0x832   :  { %v1332_v13 = vpop.f32.mrb[9].mxu0  ;;  %v1342_v24 = vmul.f32 0.25, %v4723_v47 }
 0x833   :  { %v1341_v6 = vmul.f32 0.25, %v1332_v13 }
 0x834   :  { %v1346_v39 = vadd.f32 %v1342_v24, %v5962_v37 }
 0x835   :  { %v1345_v23 = vadd.f32 %v1341_v6, %v5964_v41 }
 0x836   :  { %v1350_v49 = vadd.f32 %v1346_v39, %v6070_v32 }
 0x837   :  { %v1349_v44 = vadd.f32 %v1345_v23, %v6072_v28 }
 0x838   :  { %v1354_v53 = vsel %vm602_vm2, %v1350_v49, -inf }
 0x839   :  { %v1351_v38 = vsel %vm602_vm2, %v1349_v44, -inf }
 0x83a   :  { %v6062_v14 = vpop.f32.mrb[14].mxu1 }
 0x83b   :  { %v6064_v0 = vpop.f32.mrb[15].mxu1 }
 0x840   :  { %v4737_v52 = vpop.f32.mrb[10].mxu0 }
 0x841   :  { %v1552_v19 = vpop.f32.mrb[11].mxu0  ;;  %v1562_v40 = vmul.f32 0.25, %v4737_v52 }
 0x842   :  { %v4709_v15 = vpop.f32.mrb[16].mxu1  ;;  %v1561_v20 = vmul.f32 0.25, %v1552_v19 }
 0x843   :  { %v1125_v30 = vmul.f32 0.25, %v4709_v15  ;;  %v1115_v21 = vpop.f32.mrb[17].mxu1  ;;  %v1566_v48 = vadd.f32 %v1562_v40, %v5913_v60 }
 0x844   :  { %v1124_v22 = vmul.f32 0.25, %v1115_v21  ;;  %v1565_v29 = vadd.f32 %v1561_v20, %v5915_v62 }
 0x845   :  { %v1129_v18 = vadd.f32 %v1125_v30, %v5913_v60  ;;  %v1571_v54 = vadd.f32 %v6087_v51, %v1566_v48 }
 0x846   :  { %v1128_v31 = vadd.f32 %v1124_v22, %v5915_v62  ;;  %v1570_v46 = vadd.f32 %v6075_v34, %v1565_v29 }
 0x847   :  { %v1134_v33 = vadd.f32 %v6070_v32, %v1129_v18  ;;  %v1575_v27 = vsel %vm602_vm2, %v1571_v54, -inf }
 0x848   :  { %v1133_v36 = vadd.f32 %v6072_v28, %v1128_v31  ;;  %v1572_v50 = vsel %vm602_vm2, %v1570_v46, -inf }
 0x849   :  { %v1138_v43 = vsel %vm602_vm2, %v1134_v33, -inf }
 0x84a   :  { %1139 = vmax.xlane.f32.xlu0 %v1138_v43  ;;  %v1135_v45 = vsel %vm602_vm2, %v1133_v36, -inf }
 0x84b   :  { %1136 = vmax.xlane.f32.xlu1 %v1135_v45 }
 0x84e   :  { %1352 = vmax.xlane.f32.xlu0 %v1351_v38 }
 0x84f   :  { %1573 = vmax.xlane.f32.xlu1 %v1572_v50 }
 0x852   :  { %1355 = vmax.xlane.f32.xlu0 %v1354_v53 }
 0x856   :  { %1576 = vmax.xlane.f32.xlu0 %v1575_v27 }
 0x8d7   :  { %v1140_v55 = vpop.xlane.xlu0 %1139 }
 0x8d8   :  { %v1137_v4 = vpop.xlane.xlu1 %1136  ;;  %v1142_v10 = vsub.f32 %v1134_v33, %v1140_v55 }
 0x8d9   :  { %v1141_v30 = vsub.f32 %v1133_v36, %v1137_v4 }
 0x8da   :  { %v1145_v8 = vmul.f32 1.442695, %v1142_v10 }
 0x8db   :  { %v1353_v1 = vpop.xlane.xlu0 %1352  ;;  %v1143_v21 = vmul.f32 1.442695, %v1141_v30 }
 0x8dc   :  { %v1357_v57 = vsub.f32 %v1349_v44, %v1353_v1  ;;  %v1574_v58 = vpop.xlane.xlu1 %1573 }
 0x8dd   :  { %v1578_v56 = vsub.f32 %v1570_v46, %v1574_v58 }
 0x8de   :  { %v1359_v59 = vmul.f32 1.442695, %v1357_v57 }
 0x8df   :  { %v1580_v5 = vmul.f32 1.442695, %v1578_v56  ;;  %v1356_v61 = vpop.xlane.xlu0 %1355 }
 0x8e0   :  { %5333 = vpow2.f32 %v1359_v59  ;;  %v1358_v63 = vsub.f32 %v1350_v49, %v1356_v61 }
 0x8e1   :  { %5335 = vpow2.f32 %v1580_v5 }
 0x8e2   :  { %v1361_v2 = vmul.f32 1.442695, %v1358_v63 }
 0x8e3   :  { %v1577_v3 = vpop.xlane.xlu0 %1576 }
 0x8e4   :  { %5337 = vpow2.f32 %v1361_v2  ;;  %v1579_v7 = vsub.f32 %v1571_v54, %v1577_v3 }
 0x8e6   :  { %v1582_v42 = vmul.f32 1.442695, %v1579_v7 }
 0x8e8   :  { %5339 = vpow2.f32 %v1582_v42 }
 0x8e9   :  { %5341 = vpow2.f32 %v1145_v8 }
 0x8ea   :  { %v5334_v9 = vpop.eup %5333  ;;  %5343 = vpow2.f32 %v1143_v21 }
 0x8eb   :  { %v1363_v11 = vsel %vm602_vm2, %v5334_v9, 0.0  ;;  %v6093_v12 = vpop.eup %5335 }
 0x8ec   :  { %1364 = vadd.xlane.f32.xlu1 %v1363_v11  ;;  %v1584_v52 = vsel %vm602_vm2, %v6093_v12, 0.0 }
 0x8ee   :  { %v6095_v47 = vpop.eup %5337 }
 0x8ef   :  { %v1366_v13 = vsel %vm602_vm2, %v6095_v47, 0.0 }
 0x8f0   :  { %1367 = vadd.xlane.f32.xlu0 %v1366_v13  ;;  %1585 = vadd.xlane.f32.xlu1 %v1584_v52 }
 0x8f2   :  { %v6101_v6 = vpop.eup %5339 }
 0x8f3   :  { %v1587_v19 = vsel %vm602_vm2, %v6101_v6, 0.0  ;;  %v5342_v15 = vpop.eup %5341 }
 0x8f4   :  { %1588 = vadd.xlane.f32.xlu0 %v1587_v19  ;;  %v1150_v20 = vsel %vm602_vm2, %v5342_v15, 0.0  ;;  %v5344_v22 = vpop.eup %5343 }
 0x8f5   :  { %v1147_v24 = vsel %vm602_vm2, %v5344_v22, 0.0 }
 0x8f8   :  { %1151 = vadd.xlane.f32.xlu0 %v1150_v20 }
 0x901   :  { %5161 = vrot.lane.b32.xlu1 %v6000_v17, %s5595_s13 }
 0x90e   :  { %5166 = vrot.lane.b32.xlu0 %v6000_v17, %s5596_s1 }
 0x912   :  { %1689 = vrot.lane.b32.xlu0 %v6015_v25, %s5594_s11 }
 0x925   :  { %1148 = vadd.xlane.f32.xlu1 %v1147_v24 }
 0x936   :  { %5171 = vrot.lane.b32.xlu1 %v6021_v26, %s5595_s13 }
 0x93a   :  { %5176 = vrot.lane.b32.xlu1 %v6021_v26, %s5593_s30 }
 0x93e   :  { %1687 = vrot.lane.b32.xlu1 %v6013_v16, %s5594_s11 }
 0x979   :  { %v1365_v17 = vpop.xlane.xlu1 %1364 }
 0x97a   :  { %5345 = vrcp.f32 %v1365_v17 }
 0x97d   :  { %v1368_v23 = vpop.xlane.xlu0 %1367  ;;  %v1586_v18 = vpop.xlane.xlu1 %1585 }
 0x981   :  { %v1589_v29 = vpop.xlane.xlu0 %1588  ;;  %v5162_v25 = vpop.permute.xlu1 %5161 }
 0x982   :  { %v5164_v31 = vunpack.i.h.bf16 %v5162_v25  ;;  %v5163_v33 = vunpack.i.l.bf16 %v5162_v25 }
 0x984   :  { %v4965_v36 = vpack.c.bf16 %v5164_v31, %v5163_v33  ;;  %v5346_v48 = vpop.eup %5345 }
 0x985   :  { %v1152_v39 = vpop.xlane.xlu0 %1151  ;;  %v1371_v1 = vmul.f32 %v5346_v48, %v5334_v9 }
 0x986   :  { %4966 = vmatprep.subr.bf16.mxu1 %v4965_v36  ;;  %5347 = vrcp.f32 %v1152_v39 }
 0x987   :  { %4968 = vmatpush3.bf16.msra.mxu1 %v4965_v36 }
 0x989   :  { %v5167_v40 = vpop.permute.xlu0 %5166 }
 0x98a   :  { %v5169_v43 = vunpack.i.h.bf16 %v5167_v40  ;;  %v5168_v44 = vunpack.i.l.bf16 %v5167_v40 }
 0x98c   :  { %v4975_v45 = vpack.c.bf16 %v5169_v43, %v5168_v44  ;;  %v1907_v44 = vld [vmem:[#allocation2 + $0x30] sm:$0xff] }
 0x98d   :  { %v1690_v7 = vpop.permute.xlu0 %1689 }
 0x98e   :  { %4976 = vmatprep.subr.bf16.mxu1 %v4975_v45 }
 0x990   :  { %v5348_v38 = vpop.eup %5347 }
 0x991   :  { %v1156_v55 = vmul.f32 %v5348_v38, %v5342_v15 }
 0x9b2   :  { %v1149_v46 = vpop.xlane.xlu1 %1148 }
 0x9b3   :  { %5349 = vrcp.f32 %v1149_v46 }
 0x9b4   :  { %5351 = vrcp.f32 %v1368_v23 }
 0x9b5   :  { %5353 = vrcp.f32 %v1586_v18 }
 0x9b6   :  { %v5172_v16 = vpop.permute.xlu1 %5171  ;;  %5355 = vrcp.f32 %v1589_v29 }
 0x9b7   :  { %v5174_v50 = vunpack.i.h.bf16 %v5172_v16  ;;  %v5173_v53 = vunpack.i.l.bf16 %v5172_v16 }
 0x9b9   :  { %v4985_v58 = vpack.c.bf16 %v5174_v50, %v5173_v53 }
 0x9ba   :  { %v5177_v54 = vpop.permute.xlu1 %5176 }
 0x9bb   :  { %v5179_v56 = vunpack.i.h.bf16 %v5177_v54  ;;  %v5178_v59 = vunpack.i.l.bf16 %v5177_v54 }
 0x9bd   :  { %v5350_v49 = vpop.eup %5349  ;;  %v4989_v10 = vpack.c.bf16 %v5179_v56, %v5178_v59 }
 0x9be   :  { %v1155_v27 = vmul.f32 %v5350_v49, %v5344_v22  ;;  %v5352_v4 = vpop.eup %5351  ;;  %v1688_v3 = vpop.permute.xlu1 %1687 }
 0x9bf   :  { %v5354_v57 = vpop.eup %5353  ;;  %v1372_v5 = vmul.f32 %v5352_v4, %v6095_v47 }
 0x9c0   :  { %4714 = vmatprep.mubr.msk.f32.mxu1 %vm602_vm2, %v1155_v27  ;;  %v5356_v61 = vpop.eup %5355  ;;  %v1592_v63 = vmul.f32 %v5354_v57, %v6093_v12 }
 0x9c1   :  { %4715 = vmatmul.mubr.msk.f32.vlgmr.msra.gmra.mrb[18].mxu1 %vm602_vm2, %v1156_v55  ;;  %v1593_v2 = vmul.f32 %v5356_v61, %v6101_v6  ;;  %v6168_v61 = vld [vmem:[#allocation7 + $0x38] sm:$0xff] }
 0x9c2   :  { %4978 = vmatpush3.bf16.msra.mxu1 %v4975_v45  ;;  %4728 = vmatprep.mubr.msk.f32.mxu1 %vm602_vm2, %v1371_v1  ;;  %v1908_v45 = vld [vmem:[#allocation2 + $0x38] sm:$0xff] }
 0x9c3   :  { %4986 = vmatprep.subr.bf16.mxu1 %v4985_v58  ;;  %v6152_v46 = vpack.i.bf16 %v1908_v45, %v1907_v44 }
 0x9c5   :  { %4729 = vmatmul.mubr.msk.f32.vlgmr.msra.gmra.mrb[20].mxu1 %vm602_vm2, %v1372_v5 }
 0x9c6   :  { %4988 = vmatpush3.bf16.msra.mxu1 %v4985_v58  ;;  %4742 = vmatprep.mubr.msk.f32.mxu1 %vm602_vm2, %v1592_v63 }
 0x9c7   :  { %4991 = vmatprep.subr.msk.bf16.mxu1 %vm5883_vm3, %v4989_v10 }
 0x9c9   :  { %4743 = vmatmul.mubr.msk.f32.vlgmr.msra.gmra.mrb[22].mxu1 %vm602_vm2, %v1593_v2 }
 0x9ca   :  { %4749 = vmatprep.mubr.msk.f32.mxu1 %vm602_vm2, %v1688_v3 }
 0x9cf   :  { %4994 = vmatpush3.bf16.xpose.msk.msra.mxu1 %vm5883_vm3, %v4989_v10  ;;  %v6171_v10 = vld [vmem:[#allocation7 + $0x30] sm:$0xff] }
 0x9d6   :  { %4750 = vmatmul.mubr.msk.f32.vlgmr.msra.gmra.mrb[24].mxu1 %vm602_vm2, %v1690_v7 }
 0xa94   :  { %v4716_v8 = vpop.f32.mrb[18].mxu1 }
 0xa95   :  { %1245 = vst.msk [vmem:[#allocation3 + $0x18] sm:$0xff] %vm602_vm2, %v4716_v8  ;;  %v1235_v42 = vpop.f32.mrb[19].mxu1 }
 0xa96   :  { %1244 = vst.msk [vmem:[#allocation3 + $0x10] sm:$0xff] %vm602_vm2, %v1235_v42 }
 0xa98   :  { %v6136_v9 = vpop.f32.mrb[20].mxu1 }
 0xa99   :  { %v6138_v11 = vpop.f32.mrb[21].mxu1 }
 0xa9c   :  { %v4744_v12 = vpop.f32.mrb[22].mxu1 }
 0xa9d   :  { %1682 = vst.msk [vmem:[#allocation3 + $0x28] sm:$0xff] %vm602_vm2, %v4744_v12  ;;  %v1672_v47 = vpop.f32.mrb[23].mxu1 }
 0xa9e   :  { %1681 = vst.msk [vmem:[#allocation3 + $0x20] sm:$0xff] %vm602_vm2, %v1672_v47 }
 0xaa9   :  { %v4751_v13 = vpop.f32.mrb[24].mxu1 }
 0xaaa   :  { %v1779_v52 = vmul.f32 0.25, %v4751_v13  ;;  %v1769_v6 = vpop.f32.mrb[25].mxu1 }
 0xaab   :  { %v1778_v19 = vmul.f32 0.25, %v1769_v6 }
 0xaac   :  { %v1783_v15 = vadd.f32 %v1779_v52, %v5962_v37 }
 0xaad   :  { %v1782_v20 = vadd.f32 %v1778_v19, %v5964_v41 }
 0xaae   :  { %v1787_v30 = vadd.f32 %v1783_v15, %v6087_v51 }
 0xaaf   :  { %v1786_v21 = vadd.f32 %v1782_v20, %v6075_v34 }
 0xab0   :  { %v1791_v22 = vsel %vm602_vm2, %v1787_v30, -inf }
 0xab1   :  { %1792 = vmax.xlane.f32.xlu0 %v1791_v22  ;;  %v1788_v24 = vsel %vm602_vm2, %v1786_v21, -inf }
 0xab2   :  { %1789 = vmax.xlane.f32.xlu1 %v1788_v24 }
 0xac3   :  { %5181 = vrot.lane.b32.xlu1 %v6021_v26, %s5596_s1 }
 0xb3e   :  { %v1793_v17 = vpop.xlane.xlu0 %1792 }
 0xb3f   :  { %v1795_v23 = vsub.f32 %v1787_v30, %v1793_v17  ;;  %v1790_v18 = vpop.xlane.xlu1 %1789 }
 0xb40   :  { %v1794_v29 = vsub.f32 %v1786_v21, %v1790_v18 }
 0xb41   :  { %v1798_v25 = vmul.f32 1.442695, %v1795_v23 }
 0xb42   :  { %v1796_v31 = vmul.f32 1.442695, %v1794_v29 }
 0xb43   :  { %5357 = vpow2.f32 %v1798_v25  ;;  %v5182_v33 = vpop.permute.xlu1 %5181 }
 0xb44   :  { %v5184_v51 = vunpack.i.h.bf16 %v5182_v33  ;;  %v5183_v36 = vunpack.i.l.bf16 %v5182_v33  ;;  %5359 = vpow2.f32 %v1796_v31 }
 0xb46   :  { %v4995_v34 = vpack.c.bf16 %v5184_v51, %v5183_v36 }
 0xb48   :  { %4996 = vmatprep.subr.bf16.mxu0 %v4995_v34 }
 0xb49   :  { %4998 = vmatpush3.bf16.msra.mxu0 %v4995_v34 }
 0xb4d   :  { %v5358_v39 = vpop.eup %5357 }
 0xb4e   :  { %v1803_v40 = vsel %vm602_vm2, %v5358_v39, 0.0  ;;  %v5360_v43 = vpop.eup %5359 }
 0xb4f   :  { %1804 = vadd.xlane.f32.xlu0 %v1803_v40  ;;  %v1800_v26 = vsel %vm602_vm2, %v5360_v43, 0.0 }
 0xb53   :  { %1801 = vadd.xlane.f32.xlu0 %v1800_v26 }
 0xb69   :  { %5186 = vrot.lane.b32.xlu0 %v6152_v46, %s5592_s6 }
 0xbdc   :  { %v1805_v16 = vpop.xlane.xlu0 %1804 }
 0xbdd   :  { %5361 = vrcp.f32 %v1805_v16 }
 0xbe0   :  { %v1802_v48 = vpop.xlane.xlu0 %1801 }
 0xbe1   :  { %5363 = vrcp.f32 %v1802_v48 }
 0xbe4   :  { %v5187_v38 = vpop.permute.xlu0 %5186 }
 0xbe5   :  { %v5189_v49 = vunpack.i.h.bf16 %v5187_v38  ;;  %v5188_v50 = vunpack.i.l.bf16 %v5187_v38 }
 0xbe7   :  { %v4999_v53 = vpack.c.bf16 %v5189_v49, %v5188_v50  ;;  %v5362_v54 = vpop.eup %5361 }
 0xbe8   :  { %v1809_v4 = vmul.f32 %v5362_v54, %v5358_v39 }
 0xbe9   :  { %5001 = vmatprep.subr.msk.bf16.mxu0 %vm5883_vm3, %v4999_v53 }
 0xbeb   :  { %v5364_v27 = vpop.eup %5363 }
 0xbec   :  { %v1808_v55 = vmul.f32 %v5364_v27, %v5360_v43 }
 0xbee   :  { %4756 = vmatprep.mubr.msk.f32.mxu0 %vm602_vm2, %v1808_v55 }
 0xbef   :  { %4757 = vmatmul.mubr.msk.f32.vlgmr.msra.gmra.mrb[12].mxu0 %vm602_vm2, %v1809_v4 }
 0xbf0   :  { %5004 = vmatpush3.bf16.xpose.msk.msra.mxu0 %vm5883_vm3, %v4999_v53  ;;  %4763 = vmatprep.mubr.msk.f32.mxu0 %vm602_vm2, %v1907_v44 }
 0xbf7   :  { %4764 = vmatmul.mubr.msk.f32.vlgmr.msra.gmra.mrb[14].mxu0 %vm602_vm2, %v1908_v45 }
 0xcc2   :  { %v6164_v1 = vpop.f32.mrb[12].mxu0 }
 0xcc3   :  { %v6166_v57 = vpop.f32.mrb[13].mxu0 }
 0xcca   :  { %v4765_v58 = vpop.f32.mrb[14].mxu0 }
 0xccb   :  { %v1999_v56 = vmul.f32 0.25, %v4765_v58  ;;  %v1989_v59 = vpop.f32.mrb[15].mxu0 }
 0xccc   :  { %v1998_v5 = vmul.f32 0.25, %v1989_v59 }
 0xccd   :  { %v2003_v63 = vadd.f32 %v1999_v56, %v5913_v60 }
 0xcce   :  { %v2002_v2 = vadd.f32 %v1998_v5, %v5915_v62 }
 0xccf   :  { %v2008_v3 = vadd.f32 %v6168_v61, %v2003_v63 }
 0xcd0   :  { %v2007_v7 = vadd.f32 %v6171_v10, %v2002_v2 }
 0xcd1   :  { %v2012_v8 = vsel %vm602_vm2, %v2008_v3, -inf }
 0xcd2   :  { %2013 = vmax.xlane.f32.xlu0 %v2012_v8  ;;  %v2009_v42 = vsel %vm602_vm2, %v2007_v7, -inf }
 0xcd3   :  { %2010 = vmax.xlane.f32.xlu1 %v2009_v42  ;;  %v2344_v42 = vld [vmem:[#allocation2 + $0x40] sm:$0xff] }
 0xce4   :  { %5191 = vrot.lane.b32.xlu1 %v6152_v46, %s5595_s13 }
 0xce8   :  { %2124 = vrot.lane.b32.xlu1 %v1907_v44, %s5594_s11 }
 0xd5f   :  { %v2014_v60 = vpop.xlane.xlu0 %2013 }
 0xd60   :  { %v2016_v12 = vsub.f32 %v2008_v3, %v2014_v60  ;;  %v2011_v47 = vpop.xlane.xlu1 %2010  ;;  %v2345_v60 = vld [vmem:[#allocation2 + $0x48] sm:$0xff] }
 0xd61   :  { %v2015_v13 = vsub.f32 %v2007_v7, %v2011_v47 }
 0xd62   :  { %v2019_v62 = vmul.f32 1.442695, %v2016_v12  ;;  %v6206_v12 = vpack.i.bf16 %v2345_v60, %v2344_v42 }
 0xd63   :  { %v2017_v52 = vmul.f32 1.442695, %v2015_v13 }
 0xd64   :  { %5365 = vpow2.f32 %v2019_v62  ;;  %v5192_v6 = vpop.permute.xlu1 %5191 }
 0xd65   :  { %5367 = vpow2.f32 %v2017_v52  ;;  %v5194_v19 = vunpack.i.h.bf16 %v5192_v6  ;;  %v5193_v15 = vunpack.i.l.bf16 %v5192_v6 }
 0xd67   :  { %v5005_v20 = vpack.c.bf16 %v5194_v19, %v5193_v15 }
 0xd68   :  { %v2125_v17 = vpop.permute.xlu1 %2124 }
 0xd69   :  { %5006 = vmatprep.subr.bf16.mxu1 %v5005_v20 }
 0xd6a   :  { %5008 = vmatpush3.bf16.msra.mxu1 %v5005_v20 }
 0xd6e   :  { %v5366_v30 = vpop.eup %5365 }
 0xd6f   :  { %v5368_v21 = vpop.eup %5367  ;;  %v2024_v22 = vsel %vm602_vm2, %v5366_v30, 0.0 }
 0xd70   :  { %2025 = vadd.xlane.f32.xlu0 %v2024_v22  ;;  %v2021_v24 = vsel %vm602_vm2, %v5368_v21, 0.0 }
 0xd71   :  { %2022 = vadd.xlane.f32.xlu1 %v2021_v24 }
 0xd82   :  { %2126 = vrot.lane.b32.xlu1 %v1908_v45, %s5594_s11 }
 0xd86   :  { %5196 = vrot.lane.b32.xlu0 %v6152_v46, %s5593_s30 }
 0xdfd   :  { %v2026_v23 = vpop.xlane.xlu0 %2025 }
 0xdfe   :  { %5369 = vrcp.f32 %v2026_v23  ;;  %v2023_v18 = vpop.xlane.xlu1 %2022  ;;  %v6222_v23 = vld [vmem:[#allocation9 + $0x8] sm:$0xff] }
 0xdff   :  { %5371 = vrcp.f32 %v2023_v18 }
 0xe01   :  { %v5197_v29 = vpop.permute.xlu0 %5196 }
 0xe02   :  { %v5199_v25 = vunpack.i.h.bf16 %v5197_v29  ;;  %v5198_v31 = vunpack.i.l.bf16 %v5197_v29  ;;  %v2127_v40 = vpop.permute.xlu1 %2126 }
 0xe04   :  { %v5009_v33 = vpack.c.bf16 %v5199_v25, %v5198_v31  ;;  %v6224_v25 = vld [vmem:[#allocation9] sm:$0xff] }
 0xe06   :  { %5011 = vmatprep.subr.msk.bf16.mxu1 %vm5883_vm3, %v5009_v33 }
 0xe08   :  { %v5370_v51 = vpop.eup %5369 }
 0xe09   :  { %v5372_v36 = vpop.eup %5371  ;;  %v2030_v39 = vmul.f32 %v5370_v51, %v5366_v30 }
 0xe0a   :  { %v2029_v34 = vmul.f32 %v5372_v36, %v5368_v21  ;;  %v6229_v36 = vld [vmem:[#allocation7] sm:$0xff] }
 0xe0c   :  { %4770 = vmatprep.mubr.msk.f32.mxu1 %vm602_vm2, %v2029_v34 }
 0xe0d   :  { %4771 = vmatmul.mubr.msk.f32.vlgmr.msra.gmra.mrb[26].mxu1 %vm602_vm2, %v2030_v39 }
 0xe0e   :  { %5014 = vmatpush3.bf16.xpose.msk.msra.mxu1 %vm5883_vm3, %v5009_v33  ;;  %4777 = vmatprep.mubr.msk.f32.mxu1 %vm602_vm2, %v2125_v17  ;;  %v6226_v33 = vld [vmem:[#allocation7 + $0x8] sm:$0xff] }
 0xe15   :  { %4778 = vmatmul.mubr.msk.f32.vlgmr.msra.gmra.mrb[28].mxu1 %vm602_vm2, %v2127_v40 }
 0xee0   :  { %v4772_v43 = vpop.f32.mrb[26].mxu1 }
 0xee1   :  { %2119 = vst.msk [vmem:[#allocation3 + $0x38] sm:$0xff] %vm602_vm2, %v4772_v43  ;;  %v2109_v26 = vpop.f32.mrb[27].mxu1 }
 0xee2   :  { %2118 = vst.msk [vmem:[#allocation3 + $0x30] sm:$0xff] %vm602_vm2, %v2109_v26 }
 0xee8   :  { %v4779_v44 = vpop.f32.mrb[28].mxu1 }
 0xee9   :  { %v2216_v45 = vmul.f32 0.25, %v4779_v44  ;;  %v2206_v16 = vpop.f32.mrb[29].mxu1 }
 0xeea   :  { %v2215_v48 = vmul.f32 0.25, %v2206_v16 }
 0xeeb   :  { %v2220_v38 = vadd.f32 %v2216_v45, %v5962_v37 }
 0xeec   :  { %v2219_v49 = vadd.f32 %v2215_v48, %v5964_v41 }
 0xeed   :  { %v2224_v50 = vadd.f32 %v2220_v38, %v6168_v61 }
 0xeee   :  { %v2223_v53 = vadd.f32 %v2219_v49, %v6171_v10 }
 0xeef   :  { %v2228_v54 = vsel %vm602_vm2, %v2224_v50, -inf }
 0xef0   :  { %2229 = vmax.xlane.f32.xlu0 %v2228_v54  ;;  %v2225_v27 = vsel %vm602_vm2, %v2223_v53, -inf }
 0xef1   :  { %2226 = vmax.xlane.f32.xlu1 %v2225_v27 }
 0xf02   :  { %5201 = vrot.lane.b32.xlu1 %v6152_v46, %s5596_s1 }
 0xf7d   :  { %v2230_v55 = vpop.xlane.xlu0 %2229 }
 0xf7e   :  { %v2232_v4 = vsub.f32 %v2224_v50, %v2230_v55  ;;  %v2227_v58 = vpop.xlane.xlu1 %2226 }
 0xf7f   :  { %v2231_v56 = vsub.f32 %v2223_v53, %v2227_v58 }
 0xf80   :  { %v2235_v37 = vmul.f32 1.442695, %v2232_v4 }
 0xf81   :  { %v2233_v59 = vmul.f32 1.442695, %v2231_v56 }
 0xf82   :  { %5373 = vpow2.f32 %v2235_v37  ;;  %v5202_v41 = vpop.permute.xlu1 %5201 }
 0xf83   :  { %v5204_v5 = vunpack.i.h.bf16 %v5202_v41  ;;  %v5203_v63 = vunpack.i.l.bf16 %v5202_v41  ;;  %5375 = vpow2.f32 %v2233_v59 }
 0xf85   :  { %v5015_v2 = vpack.c.bf16 %v5204_v5, %v5203_v63 }
 0xf87   :  { %5016 = vmatprep.subr.bf16.mxu0 %v5015_v2 }
 0xf88   :  { %5018 = vmatpush3.bf16.msra.mxu0 %v5015_v2 }
 0xf8c   :  { %v5374_v3 = vpop.eup %5373 }
 0xf8d   :  { %v2240_v7 = vsel %vm602_vm2, %v5374_v3, 0.0  ;;  %v5376_v8 = vpop.eup %5375 }
 0xf8e   :  { %2241 = vadd.xlane.f32.xlu0 %v2240_v7  ;;  %v2237_v46 = vsel %vm602_vm2, %v5376_v8, 0.0 }
 0xf92   :  { %2238 = vadd.xlane.f32.xlu0 %v2237_v46 }
 0xfa8   :  { %5206 = vrot.lane.b32.xlu0 %v6206_v12, %s5592_s6 }
0x101b   :  { %v2242_v47 = vpop.xlane.xlu0 %2241 }
0x101c   :  { %5377 = vrcp.f32 %v2242_v47 }
0x101f   :  { %v2239_v13 = vpop.xlane.xlu0 %2238 }
0x1020   :  { %5379 = vrcp.f32 %v2239_v13 }
0x1023   :  { %v5207_v62 = vpop.permute.xlu0 %5206 }
0x1024   :  { %v5209_v52 = vunpack.i.h.bf16 %v5207_v62  ;;  %v5208_v6 = vunpack.i.l.bf16 %v5207_v62 }
0x1026   :  { %v5019_v19 = vpack.c.bf16 %v5209_v52, %v5208_v6  ;;  %v5378_v15 = vpop.eup %5377  ;;  %v6254_v52 = vld [vmem:[#allocation9 + $0x18] sm:$0xff] }
0x1027   :  { %v2246_v21 = vmul.f32 %v5378_v15, %v5374_v3  ;;  %v6256_v15 = vld [vmem:[#allocation9 + $0x10] sm:$0xff] }
0x1028   :  { %5021 = vmatprep.subr.msk.bf16.mxu0 %vm5883_vm3, %v5019_v19 }
0x102a   :  { %v5380_v20 = vpop.eup %5379 }
0x102b   :  { %v2245_v30 = vmul.f32 %v5380_v20, %v5376_v8 }
0x102d   :  { %4784 = vmatprep.mubr.msk.f32.mxu0 %vm602_vm2, %v2245_v30 }
0x102e   :  { %4785 = vmatmul.mubr.msk.f32.vlgmr.msra.gmra.mrb[16].mxu0 %vm602_vm2, %v2246_v21 }
0x102f   :  { %5024 = vmatpush3.bf16.xpose.msk.msra.mxu0 %vm5883_vm3, %v5019_v19  ;;  %4791 = vmatprep.mubr.msk.f32.mxu0 %vm602_vm2, %v2344_v42 }
0x1036   :  { %4792 = vmatmul.mubr.msk.f32.vlgmr.msra.gmra.mrb[18].mxu0 %vm602_vm2, %v2345_v60 }
0x1101   :  { %v6218_v22 = vpop.f32.mrb[16].mxu0 }
0x1102   :  { %v6220_v24 = vpop.f32.mrb[17].mxu0 }
0x1109   :  { %v4793_v17 = vpop.f32.mrb[18].mxu0 }
0x110a   :  { %v2436_v18 = vmul.f32 0.25, %v4793_v17  ;;  %v2426_v29 = vpop.f32.mrb[19].mxu0 }
0x110b   :  { %v2435_v31 = vmul.f32 0.25, %v2426_v29 }
0x110c   :  { %v2440_v51 = vadd.f32 %v6222_v23, %v2436_v18 }
0x110d   :  { %v2439_v34 = vadd.f32 %v6224_v25, %v2435_v31 }
0x110e   :  { %v2444_v39 = vadd.f32 %v6226_v33, %v2440_v51 }
0x110f   :  { %v2443_v40 = vadd.f32 %v6229_v36, %v2439_v34 }
0x1110   :  { %v2448_v43 = vsel %vm602_vm2, %v2444_v39, -inf }
0x1111   :  { %2449 = vmax.xlane.f32.xlu0 %v2448_v43  ;;  %v2445_v26 = vsel %vm602_vm2, %v2443_v40, -inf }
0x1112   :  { %2446 = vmax.xlane.f32.xlu1 %v2445_v26 }
0x1123   :  { %5211 = vrot.lane.b32.xlu1 %v6206_v12, %s5595_s13 }
0x1127   :  { %2560 = vrot.lane.b32.xlu1 %v2344_v42, %s5594_s11 }
0x119e   :  { %v2450_v44 = vpop.xlane.xlu0 %2449 }
0x119f   :  { %v2452_v45 = vsub.f32 %v2444_v39, %v2450_v44  ;;  %v2447_v16 = vpop.xlane.xlu1 %2446 }
0x11a0   :  { %v2451_v48 = vsub.f32 %v2443_v40, %v2447_v16 }
0x11a1   :  { %v2455_v38 = vmul.f32 1.442695, %v2452_v45 }
0x11a2   :  { %v2453_v49 = vmul.f32 1.442695, %v2451_v48 }
0x11a3   :  { %5381 = vpow2.f32 %v2455_v38  ;;  %v5212_v50 = vpop.permute.xlu1 %5211 }
0x11a4   :  { %5383 = vpow2.f32 %v2453_v49  ;;  %v5214_v53 = vunpack.i.h.bf16 %v5212_v50  ;;  %v5213_v54 = vunpack.i.l.bf16 %v5212_v50  ;;  %v2780_v49 = vld [vmem:[#allocation2 + $0x50] sm:$0xff]  ;;  %v2781_v50 = vld [vmem:[#allocation2 + $0x58] sm:$0xff] }
0x11a6   :  { %v5025_v27 = vpack.c.bf16 %v5214_v53, %v5213_v54  ;;  %v6268_v53 = vpack.i.bf16 %v2781_v50, %v2780_v49 }
0x11a7   :  { %v2561_v37 = vpop.permute.xlu1 %2560 }
0x11a8   :  { %5026 = vmatprep.subr.bf16.mxu1 %v5025_v27 }
0x11a9   :  { %5028 = vmatpush3.bf16.msra.mxu1 %v5025_v27 }
0x11ad   :  { %v5382_v55 = vpop.eup %5381 }
0x11ae   :  { %v5384_v4 = vpop.eup %5383  ;;  %v2460_v58 = vsel %vm602_vm2, %v5382_v55, 0.0 }
0x11af   :  { %2461 = vadd.xlane.f32.xlu0 %v2460_v58  ;;  %v2457_v56 = vsel %vm602_vm2, %v5384_v4, 0.0 }
0x11b0   :  { %2458 = vadd.xlane.f32.xlu1 %v2457_v56 }
0x11c1   :  { %2562 = vrot.lane.b32.xlu1 %v2345_v60, %s5594_s11 }
0x11c5   :  { %5216 = vrot.lane.b32.xlu0 %v6206_v12, %s5593_s30 }
0x123c   :  { %v2462_v59 = vpop.xlane.xlu0 %2461 }
0x123d   :  { %5385 = vrcp.f32 %v2462_v59  ;;  %v2459_v41 = vpop.xlane.xlu1 %2458 }
0x123e   :  { %5387 = vrcp.f32 %v2459_v41 }
0x1240   :  { %v5217_v5 = vpop.permute.xlu0 %5216 }
0x1241   :  { %v5219_v63 = vunpack.i.h.bf16 %v5217_v5  ;;  %v5218_v2 = vunpack.i.l.bf16 %v5217_v5  ;;  %v2563_v60 = vpop.permute.xlu1 %2562 }
0x1243   :  { %v5029_v3 = vpack.c.bf16 %v5219_v63, %v5218_v2 }
0x1245   :  { %5031 = vmatprep.subr.msk.bf16.mxu1 %vm5883_vm3, %v5029_v3 }
0x1247   :  { %v5386_v7 = vpop.eup %5385 }
0x1248   :  { %v5388_v8 = vpop.eup %5387  ;;  %v2466_v42 = vmul.f32 %v5386_v7, %v5382_v55 }
0x1249   :  { %v2465_v46 = vmul.f32 %v5388_v8, %v5384_v4 }
0x124b   :  { %4798 = vmatprep.mubr.msk.f32.mxu1 %vm602_vm2, %v2465_v46 }
0x124c   :  { %4799 = vmatmul.mubr.msk.f32.vlgmr.msra.gmra.mrb[30].mxu1 %vm602_vm2, %v2466_v42 }
0x124d   :  { %5034 = vmatpush3.bf16.xpose.msk.msra.mxu1 %vm5883_vm3, %v5029_v3  ;;  %4805 = vmatprep.mubr.msk.f32.mxu1 %vm602_vm2, %v2561_v37 }
0x1254   :  { %4806 = vmatmul.mubr.msk.f32.vlgmr.msra.gmra.mrb[32].mxu1 %vm602_vm2, %v2563_v60 }
0x131f   :  { %v4800_v47 = vpop.f32.mrb[30].mxu1 }
0x1320   :  { %2555 = vst.msk [vmem:[#allocation3 + $0x48] sm:$0xff] %vm602_vm2, %v4800_v47  ;;  %v2545_v13 = vpop.f32.mrb[31].mxu1 }
0x1321   :  { %2554 = vst.msk [vmem:[#allocation3 + $0x40] sm:$0xff] %vm602_vm2, %v2545_v13 }
0x1327   :  { %v4807_v62 = vpop.f32.mrb[32].mxu1 }
0x1328   :  { %v2652_v6 = vmul.f32 0.25, %v4807_v62  ;;  %v2642_v19 = vpop.f32.mrb[33].mxu1 }
0x1329   :  { %v2651_v20 = vmul.f32 0.25, %v2642_v19 }
0x132a   :  { %v2656_v30 = vadd.f32 %v6254_v52, %v2652_v6 }
0x132b   :  { %v2655_v21 = vadd.f32 %v6256_v15, %v2651_v20 }
0x132c   :  { %v2660_v17 = vadd.f32 %v2656_v30, %v6226_v33 }
0x132d   :  { %v2659_v18 = vadd.f32 %v2655_v21, %v6229_v36 }
0x132e   :  { %v2664_v29 = vsel %vm602_vm2, %v2660_v17, -inf }
0x132f   :  { %2665 = vmax.xlane.f32.xlu0 %v2664_v29  ;;  %v2661_v31 = vsel %vm602_vm2, %v2659_v18, -inf }
0x1330   :  { %2662 = vmax.xlane.f32.xlu1 %v2661_v31 }
0x1341   :  { %5221 = vrot.lane.b32.xlu1 %v6206_v12, %s5596_s1 }
0x13bc   :  { %v2666_v51 = vpop.xlane.xlu0 %2665 }
0x13bd   :  { %v2668_v34 = vsub.f32 %v2660_v17, %v2666_v51  ;;  %v2663_v39 = vpop.xlane.xlu1 %2662 }
0x13be   :  { %v2667_v40 = vsub.f32 %v2659_v18, %v2663_v39 }
0x13bf   :  { %v2671_v43 = vmul.f32 1.442695, %v2668_v34 }
0x13c0   :  { %v2669_v26 = vmul.f32 1.442695, %v2667_v40 }
0x13c1   :  { %5389 = vpow2.f32 %v2671_v43  ;;  %v5222_v44 = vpop.permute.xlu1 %5221 }
0x13c2   :  { %v5224_v33 = vunpack.i.h.bf16 %v5222_v44  ;;  %v5223_v45 = vunpack.i.l.bf16 %v5222_v44  ;;  %5391 = vpow2.f32 %v2669_v26 }
0x13c4   :  { %v5035_v36 = vpack.c.bf16 %v5224_v33, %v5223_v45 }
0x13c6   :  { %5036 = vmatprep.subr.bf16.mxu0 %v5035_v36 }
0x13c7   :  { %5038 = vmatpush3.bf16.msra.mxu0 %v5035_v36 }
0x13cb   :  { %v5390_v16 = vpop.eup %5389 }
0x13cc   :  { %v2676_v48 = vsel %vm602_vm2, %v5390_v16, 0.0  ;;  %v5392_v38 = vpop.eup %5391 }
0x13cd   :  { %2677 = vadd.xlane.f32.xlu0 %v2676_v48  ;;  %v2673_v12 = vsel %vm602_vm2, %v5392_v38, 0.0 }
0x13d1   :  { %2674 = vadd.xlane.f32.xlu0 %v2673_v12 }
0x13e7   :  { %5226 = vrot.lane.b32.xlu0 %v6268_v53, %s5592_s6 }
0x145a   :  { %v2678_v54 = vpop.xlane.xlu0 %2677 }
0x145b   :  { %5393 = vrcp.f32 %v2678_v54 }
0x145e   :  { %v2675_v27 = vpop.xlane.xlu0 %2674 }
0x145f   :  { %5395 = vrcp.f32 %v2675_v27 }
0x1462   :  { %v5227_v55 = vpop.permute.xlu0 %5226 }
0x1463   :  { %v5229_v4 = vunpack.i.h.bf16 %v5227_v55  ;;  %v5228_v58 = vunpack.i.l.bf16 %v5227_v55 }
0x1465   :  { %v5039_v56 = vpack.c.bf16 %v5229_v4, %v5228_v58  ;;  %v5394_v37 = vpop.eup %5393 }
0x1466   :  { %v2682_v5 = vmul.f32 %v5394_v37, %v5390_v16 }
0x1467   :  { %5041 = vmatprep.subr.msk.bf16.mxu0 %vm5883_vm3, %v5039_v56 }
0x1469   :  { %v5396_v59 = vpop.eup %5395 }
0x146a   :  { %v2681_v41 = vmul.f32 %v5396_v59, %v5392_v38 }
0x146c   :  { %4812 = vmatprep.mubr.msk.f32.mxu0 %vm602_vm2, %v2681_v41 }
0x146d   :  { %4813 = vmatmul.mubr.msk.f32.vlgmr.msra.gmra.mrb[20].mxu0 %vm602_vm2, %v2682_v5 }
0x146e   :  { %5044 = vmatpush3.bf16.xpose.msk.msra.mxu0 %vm5883_vm3, %v5039_v56  ;;  %4819 = vmatprep.mubr.msk.f32.mxu0 %vm602_vm2, %v2780_v49 }
0x1475   :  { %4820 = vmatmul.mubr.msk.f32.vlgmr.msra.gmra.mrb[22].mxu0 %vm602_vm2, %v2781_v50 }
0x1540   :  { %v6280_v63 = vpop.f32.mrb[20].mxu0 }
0x1541   :  { %v6282_v2 = vpop.f32.mrb[21].mxu0 }
0x1548   :  { %v4821_v3 = vpop.f32.mrb[22].mxu0 }
0x1549   :  { %v2872_v7 = vmul.f32 0.25, %v4821_v3  ;;  %v2862_v8 = vpop.f32.mrb[23].mxu0 }
0x154a   :  { %v2871_v46 = vmul.f32 0.25, %v2862_v8 }
0x154b   :  { %v2876_v42 = vadd.f32 %v2872_v7, %v6222_v23 }
0x154c   :  { %v2875_v60 = vadd.f32 %v2871_v46, %v6224_v25 }
0x154d   :  { %v2880_v47 = vadd.f32 %v2876_v42, %v6070_v32 }
0x154e   :  { %v2879_v13 = vadd.f32 %v2875_v60, %v6072_v28 }
0x154f   :  { %v2884_v62 = vsel %vm602_vm2, %v2880_v47, -inf }
0x1550   :  { %2885 = vmax.xlane.f32.xlu0 %v2884_v62  ;;  %v2881_v6 = vsel %vm602_vm2, %v2879_v13, -inf }
0x1551   :  { %2882 = vmax.xlane.f32.xlu1 %v2881_v6 }
0x1562   :  { %5231 = vrot.lane.b32.xlu1 %v6268_v53, %s5595_s13 }
0x1566   :  { %2996 = vrot.lane.b32.xlu1 %v2780_v49, %s5594_s11 }
0x15dd   :  { %v2886_v19 = vpop.xlane.xlu0 %2885 }
0x15de   :  { %v2888_v20 = vsub.f32 %v2880_v47, %v2886_v19  ;;  %v2883_v30 = vpop.xlane.xlu1 %2882 }
0x15df   :  { %v2887_v21 = vsub.f32 %v2879_v13, %v2883_v30 }
0x15e0   :  { %v2891_v17 = vmul.f32 1.442695, %v2888_v20 }
0x15e1   :  { %v2889_v18 = vmul.f32 1.442695, %v2887_v21 }
0x15e2   :  { %5397 = vpow2.f32 %v2891_v17  ;;  %v5232_v29 = vpop.permute.xlu1 %5231 }
0x15e3   :  { %5399 = vpow2.f32 %v2889_v18  ;;  %v5234_v31 = vunpack.i.h.bf16 %v5232_v29  ;;  %v5233_v51 = vunpack.i.l.bf16 %v5232_v29  ;;  %v3216_v18 = vld [vmem:[#allocation2 + $0x60] sm:$0xff]  ;;  %v3217_v29 = vld [vmem:[#allocation2 + $0x68] sm:$0xff] }
0x15e5   :  { %v5045_v34 = vpack.c.bf16 %v5234_v31, %v5233_v51  ;;  %v6318_v31 = vpack.i.bf16 %v3217_v29, %v3216_v18 }
0x15e6   :  { %v2997_v44 = vpop.permute.xlu1 %2996 }
0x15e7   :  { %5046 = vmatprep.subr.bf16.mxu1 %v5045_v34 }
0x15e8   :  { %5048 = vmatpush3.bf16.msra.mxu1 %v5045_v34 }
0x15ec   :  { %v5398_v39 = vpop.eup %5397 }
0x15ed   :  { %v5400_v40 = vpop.eup %5399  ;;  %v2896_v43 = vsel %vm602_vm2, %v5398_v39, 0.0 }
0x15ee   :  { %2897 = vadd.xlane.f32.xlu0 %v2896_v43  ;;  %v2893_v26 = vsel %vm602_vm2, %v5400_v40, 0.0 }
0x15ef   :  { %2894 = vadd.xlane.f32.xlu1 %v2893_v26 }
0x1600   :  { %2998 = vrot.lane.b32.xlu1 %v2781_v50, %s5594_s11 }
0x1604   :  { %5236 = vrot.lane.b32.xlu0 %v6268_v53, %s5593_s30 }
0x167b   :  { %v2898_v33 = vpop.xlane.xlu0 %2897 }
0x167c   :  { %5401 = vrcp.f32 %v2898_v33  ;;  %v2895_v45 = vpop.xlane.xlu1 %2894 }
0x167d   :  { %5403 = vrcp.f32 %v2895_v45 }
0x167f   :  { %v5237_v36 = vpop.permute.xlu0 %5236 }
0x1680   :  { %v5239_v16 = vunpack.i.h.bf16 %v5237_v36  ;;  %v5238_v48 = vunpack.i.l.bf16 %v5237_v36  ;;  %v2999_v50 = vpop.permute.xlu1 %2998 }
0x1682   :  { %v5049_v38 = vpack.c.bf16 %v5239_v16, %v5238_v48 }
0x1684   :  { %5051 = vmatprep.subr.msk.bf16.mxu1 %vm5883_vm3, %v5049_v38 }
0x1686   :  { %v5402_v12 = vpop.eup %5401 }
0x1687   :  { %v5404_v49 = vpop.eup %5403  ;;  %v2902_v27 = vmul.f32 %v5402_v12, %v5398_v39 }
0x1688   :  { %v2901_v54 = vmul.f32 %v5404_v49, %v5400_v40 }
0x168a   :  { %4826 = vmatprep.mubr.msk.f32.mxu1 %vm602_vm2, %v2901_v54 }
0x168b   :  { %4827 = vmatmul.mubr.msk.f32.vlgmr.msra.gmra.mrb[34].mxu1 %vm602_vm2, %v2902_v27  ;;  %v6334_v27 = vld [vmem:[#allocation7 + $0x28] sm:$0xff] }
0x168c   :  { %5054 = vmatpush3.bf16.xpose.msk.msra.mxu1 %vm5883_vm3, %v5049_v38  ;;  %4833 = vmatprep.mubr.msk.f32.mxu1 %vm602_vm2, %v2997_v44 }
0x1693   :  { %4834 = vmatmul.mubr.msk.f32.vlgmr.msra.gmra.mrb[36].mxu1 %vm602_vm2, %v2999_v50 }
0x175e   :  { %v4828_v55 = vpop.f32.mrb[34].mxu1 }
0x175f   :  { %2991 = vst.msk [vmem:[#allocation3 + $0x58] sm:$0xff] %vm602_vm2, %v4828_v55  ;;  %v2981_v4 = vpop.f32.mrb[35].mxu1  ;;  %v6337_v55 = vld [vmem:[#allocation7 + $0x20] sm:$0xff] }
0x1760   :  { %2990 = vst.msk [vmem:[#allocation3 + $0x50] sm:$0xff] %vm602_vm2, %v2981_v4 }
0x1766   :  { %v4835_v58 = vpop.f32.mrb[36].mxu1 }
0x1767   :  { %v3088_v56 = vmul.f32 0.25, %v4835_v58  ;;  %v3078_v37 = vpop.f32.mrb[37].mxu1 }
0x1768   :  { %v3087_v59 = vmul.f32 0.25, %v3078_v37 }
0x1769   :  { %v3092_v41 = vadd.f32 %v3088_v56, %v6254_v52 }
0x176a   :  { %v3091_v5 = vadd.f32 %v3087_v59, %v6256_v15 }
0x176b   :  { %v3096_v3 = vadd.f32 %v3092_v41, %v6070_v32 }
0x176c   :  { %v3095_v7 = vadd.f32 %v3091_v5, %v6072_v28 }
0x176d   :  { %v3100_v8 = vsel %vm602_vm2, %v3096_v3, -inf }
0x176e   :  { %3101 = vmax.xlane.f32.xlu0 %v3100_v8  ;;  %v3097_v46 = vsel %vm602_vm2, %v3095_v7, -inf }
0x176f   :  { %3098 = vmax.xlane.f32.xlu1 %v3097_v46 }
0x1780   :  { %5241 = vrot.lane.b32.xlu1 %v6268_v53, %s5596_s1 }
0x17fb   :  { %v3102_v42 = vpop.xlane.xlu0 %3101 }
0x17fc   :  { %v3104_v60 = vsub.f32 %v3096_v3, %v3102_v42  ;;  %v3099_v47 = vpop.xlane.xlu1 %3098 }
0x17fd   :  { %v3103_v13 = vsub.f32 %v3095_v7, %v3099_v47 }
0x17fe   :  { %v3107_v62 = vmul.f32 1.442695, %v3104_v60 }
0x17ff   :  { %v3105_v6 = vmul.f32 1.442695, %v3103_v13 }
0x1800   :  { %5405 = vpow2.f32 %v3107_v62  ;;  %v5242_v19 = vpop.permute.xlu1 %5241 }
0x1801   :  { %v5244_v32 = vunpack.i.h.bf16 %v5242_v19  ;;  %v5243_v20 = vunpack.i.l.bf16 %v5242_v19  ;;  %5407 = vpow2.f32 %v3105_v6 }
0x1803   :  { %v5055_v28 = vpack.c.bf16 %v5244_v32, %v5243_v20 }
0x1805   :  { %5056 = vmatprep.subr.bf16.mxu0 %v5055_v28 }
0x1806   :  { %5058 = vmatpush3.bf16.msra.mxu0 %v5055_v28 }
0x180a   :  { %v5406_v30 = vpop.eup %5405 }
0x180b   :  { %v3112_v21 = vsel %vm602_vm2, %v5406_v30, 0.0  ;;  %v5408_v17 = vpop.eup %5407 }
0x180c   :  { %3113 = vadd.xlane.f32.xlu0 %v3112_v21  ;;  %v3109_v53 = vsel %vm602_vm2, %v5408_v17, 0.0 }
0x1810   :  { %3110 = vadd.xlane.f32.xlu0 %v3109_v53 }
0x1826   :  { %5246 = vrot.lane.b32.xlu0 %v6318_v31, %s5592_s6 }
0x1899   :  { %v3114_v51 = vpop.xlane.xlu0 %3113 }
0x189a   :  { %5409 = vrcp.f32 %v3114_v51 }
0x189d   :  { %v3111_v34 = vpop.xlane.xlu0 %3110 }
0x189e   :  { %5411 = vrcp.f32 %v3111_v34 }
0x18a1   :  { %v5247_v39 = vpop.permute.xlu0 %5246 }
0x18a2   :  { %v5249_v40 = vunpack.i.h.bf16 %v5247_v39  ;;  %v5248_v43 = vunpack.i.l.bf16 %v5247_v39 }
0x18a4   :  { %v5059_v26 = vpack.c.bf16 %v5249_v40, %v5248_v43  ;;  %v5410_v44 = vpop.eup %5409 }
0x18a5   :  { %v3118_v36 = vmul.f32 %v5410_v44, %v5406_v30 }
0x18a6   :  { %5061 = vmatprep.subr.msk.bf16.mxu0 %vm5883_vm3, %v5059_v26 }
0x18a8   :  { %v5412_v33 = vpop.eup %5411 }
0x18a9   :  { %v3117_v45 = vmul.f32 %v5412_v33, %v5408_v17 }
0x18ab   :  { %4840 = vmatprep.mubr.msk.f32.mxu0 %vm602_vm2, %v3117_v45 }
0x18ac   :  { %4841 = vmatmul.mubr.msk.f32.vlgmr.msra.gmra.mrb[24].mxu0 %vm602_vm2, %v3118_v36 }
0x18ad   :  { %5064 = vmatpush3.bf16.xpose.msk.msra.mxu0 %vm5883_vm3, %v5059_v26  ;;  %4847 = vmatprep.mubr.msk.f32.mxu0 %vm602_vm2, %v3216_v18 }
0x18b4   :  { %4848 = vmatmul.mubr.msk.f32.vlgmr.msra.gmra.mrb[26].mxu0 %vm602_vm2, %v3217_v29 }
0x197f   :  { %v6330_v16 = vpop.f32.mrb[24].mxu0 }
0x1980   :  { %v6332_v48 = vpop.f32.mrb[25].mxu0 }
0x1987   :  { %v4849_v38 = vpop.f32.mrb[26].mxu0 }
0x1988   :  { %v3308_v12 = vmul.f32 0.25, %v4849_v38  ;;  %v3298_v49 = vpop.f32.mrb[27].mxu0 }
0x1989   :  { %v3307_v54 = vmul.f32 0.25, %v3298_v49 }
0x198a   :  { %v3312_v50 = vadd.f32 %v3308_v12, %v6222_v23 }
0x198b   :  { %v3311_v4 = vadd.f32 %v3307_v54, %v6224_v25 }
0x198c   :  { %v3316_v58 = vadd.f32 %v6334_v27, %v3312_v50 }
0x198d   :  { %v3315_v56 = vadd.f32 %v6337_v55, %v3311_v4 }
0x198e   :  { %v3320_v37 = vsel %vm602_vm2, %v3316_v58, -inf }
0x198f   :  { %3321 = vmax.xlane.f32.xlu0 %v3320_v37  ;;  %v3317_v59 = vsel %vm602_vm2, %v3315_v56, -inf }
0x1990   :  { %3318 = vmax.xlane.f32.xlu1 %v3317_v59 }
0x19a1   :  { %5251 = vrot.lane.b32.xlu1 %v6318_v31, %s5595_s13 }
0x19a5   :  { %3432 = vrot.lane.b32.xlu1 %v3216_v18, %s5594_s11 }
0x1a1c   :  { %v3322_v41 = vpop.xlane.xlu0 %3321 }
0x1a1d   :  { %v3324_v5 = vsub.f32 %v3316_v58, %v3322_v41  ;;  %v3319_v3 = vpop.xlane.xlu1 %3318 }
0x1a1e   :  { %v3323_v7 = vsub.f32 %v3315_v56, %v3319_v3 }
0x1a1f   :  { %v3327_v8 = vmul.f32 1.442695, %v3324_v5 }
0x1a20   :  { %v3325_v46 = vmul.f32 1.442695, %v3323_v7 }
0x1a21   :  { %5413 = vpow2.f32 %v3327_v8  ;;  %v5252_v42 = vpop.permute.xlu1 %5251 }
0x1a22   :  { %5415 = vpow2.f32 %v3325_v46  ;;  %v5254_v60 = vunpack.i.h.bf16 %v5252_v42  ;;  %v5253_v47 = vunpack.i.l.bf16 %v5252_v42 }
0x1a24   :  { %v5065_v13 = vpack.c.bf16 %v5254_v60, %v5253_v47  ;;  %v3652_v60 = vld [vmem:[#allocation2 + $0x70] sm:$0xff]  ;;  %v3653_v47 = vld [vmem:[#allocation2 + $0x78] sm:$0xff] }
0x1a25   :  { %v3433_v20 = vpop.permute.xlu1 %3432 }
0x1a26   :  { %5066 = vmatprep.subr.bf16.mxu1 %v5065_v13 }
0x1a27   :  { %5068 = vmatpush3.bf16.msra.mxu1 %v5065_v13  ;;  %v6372_v13 = vpack.i.bf16 %v3653_v47, %v3652_v60 }
0x1a2b   :  { %v5414_v62 = vpop.eup %5413 }
0x1a2c   :  { %v5416_v6 = vpop.eup %5415  ;;  %v3332_v19 = vsel %vm602_vm2, %v5414_v62, 0.0 }
0x1a2d   :  { %3333 = vadd.xlane.f32.xlu0 %v3332_v19  ;;  %v3329_v32 = vsel %vm602_vm2, %v5416_v6, 0.0 }
0x1a2e   :  { %3330 = vadd.xlane.f32.xlu1 %v3329_v32 }
0x1a3f   :  { %3434 = vrot.lane.b32.xlu1 %v3217_v29, %s5594_s11 }
0x1a43   :  { %5256 = vrot.lane.b32.xlu0 %v6318_v31, %s5593_s30 }
0x1aba   :  { %v3334_v28 = vpop.xlane.xlu0 %3333 }
0x1abb   :  { %5417 = vrcp.f32 %v3334_v28  ;;  %v3331_v30 = vpop.xlane.xlu1 %3330 }
0x1abc   :  { %5419 = vrcp.f32 %v3331_v30 }
0x1abe   :  { %v5257_v21 = vpop.permute.xlu0 %5256 }
0x1abf   :  { %v5259_v17 = vunpack.i.h.bf16 %v5257_v21  ;;  %v5258_v53 = vunpack.i.l.bf16 %v5257_v21  ;;  %v3435_v29 = vpop.permute.xlu1 %3434 }
0x1ac1   :  { %v5069_v18 = vpack.c.bf16 %v5259_v17, %v5258_v53 }
0x1ac3   :  { %5071 = vmatprep.subr.msk.bf16.mxu1 %vm5883_vm3, %v5069_v18 }
0x1ac5   :  { %v5418_v51 = vpop.eup %5417 }
0x1ac6   :  { %v5420_v34 = vpop.eup %5419  ;;  %v3338_v40 = vmul.f32 %v5418_v51, %v5414_v62 }
0x1ac7   :  { %v3337_v39 = vmul.f32 %v5420_v34, %v5416_v6 }
0x1ac9   :  { %4854 = vmatprep.mubr.msk.f32.mxu1 %vm602_vm2, %v3337_v39 }
0x1aca   :  { %4855 = vmatmul.mubr.msk.f32.vlgmr.msra.gmra.mrb[38].mxu1 %vm602_vm2, %v3338_v40 }
0x1acb   :  { %5074 = vmatpush3.bf16.xpose.msk.msra.mxu1 %vm5883_vm3, %v5069_v18  ;;  %4861 = vmatprep.mubr.msk.f32.mxu1 %vm602_vm2, %v3433_v20 }
0x1ad2   :  { %4862 = vmatmul.mubr.msk.f32.vlgmr.msra.gmra.mrb[40].mxu1 %vm602_vm2, %v3435_v29 }
0x1b9d   :  { %v4856_v43 = vpop.f32.mrb[38].mxu1 }
0x1b9e   :  { %3427 = vst.msk [vmem:[#allocation3 + $0x68] sm:$0xff] %vm602_vm2, %v4856_v43  ;;  %v3417_v26 = vpop.f32.mrb[39].mxu1 }
0x1b9f   :  { %3426 = vst.msk [vmem:[#allocation3 + $0x60] sm:$0xff] %vm602_vm2, %v3417_v26 }
0x1ba5   :  { %v4863_v44 = vpop.f32.mrb[40].mxu1 }
0x1ba6   :  { %v3524_v33 = vmul.f32 0.25, %v4863_v44  ;;  %v3514_v45 = vpop.f32.mrb[41].mxu1 }
0x1ba7   :  { %v3523_v36 = vmul.f32 0.25, %v3514_v45 }
0x1ba8   :  { %v3528_v38 = vadd.f32 %v3524_v33, %v6254_v52 }
0x1ba9   :  { %v3527_v12 = vadd.f32 %v3523_v36, %v6256_v15 }
0x1baa   :  { %v3532_v49 = vadd.f32 %v3528_v38, %v6334_v27 }
0x1bab   :  { %v3531_v54 = vadd.f32 %v3527_v12, %v6337_v55 }
0x1bac   :  { %v3536_v50 = vsel %vm602_vm2, %v3532_v49, -inf }
0x1bad   :  { %3537 = vmax.xlane.f32.xlu0 %v3536_v50  ;;  %v3533_v4 = vsel %vm602_vm2, %v3531_v54, -inf }
0x1bae   :  { %3534 = vmax.xlane.f32.xlu1 %v3533_v4 }
0x1bbf   :  { %5261 = vrot.lane.b32.xlu1 %v6318_v31, %s5596_s1 }
0x1c3a   :  { %v3538_v58 = vpop.xlane.xlu0 %3537 }
0x1c3b   :  { %v3540_v56 = vsub.f32 %v3532_v49, %v3538_v58  ;;  %v3535_v37 = vpop.xlane.xlu1 %3534 }
0x1c3c   :  { %v3539_v59 = vsub.f32 %v3531_v54, %v3535_v37 }
0x1c3d   :  { %v3543_v41 = vmul.f32 1.442695, %v3540_v56 }
0x1c3e   :  { %v3541_v5 = vmul.f32 1.442695, %v3539_v59 }
0x1c3f   :  { %5421 = vpow2.f32 %v3543_v41  ;;  %v5262_v3 = vpop.permute.xlu1 %5261 }
0x1c40   :  { %v5264_v27 = vunpack.i.h.bf16 %v5262_v3  ;;  %v5263_v7 = vunpack.i.l.bf16 %v5262_v3  ;;  %5423 = vpow2.f32 %v3541_v5 }
0x1c42   :  { %v5075_v55 = vpack.c.bf16 %v5264_v27, %v5263_v7 }
0x1c44   :  { %5076 = vmatprep.subr.bf16.mxu0 %v5075_v55 }
0x1c45   :  { %5078 = vmatpush3.bf16.msra.mxu0 %v5075_v55 }
0x1c49   :  { %v5422_v8 = vpop.eup %5421 }
0x1c4a   :  { %v3548_v46 = vsel %vm602_vm2, %v5422_v8, 0.0  ;;  %v5424_v42 = vpop.eup %5423 }
0x1c4b   :  { %3549 = vadd.xlane.f32.xlu0 %v3548_v46  ;;  %v3545_v31 = vsel %vm602_vm2, %v5424_v42, 0.0 }
0x1c4f   :  { %3546 = vadd.xlane.f32.xlu0 %v3545_v31 }
0x1c65   :  { %5266 = vrot.lane.b32.xlu0 %v6372_v13, %s5592_s6 }
0x1cd8   :  { %v3550_v62 = vpop.xlane.xlu0 %3549 }
0x1cd9   :  { %5425 = vrcp.f32 %v3550_v62 }
0x1cdc   :  { %v3547_v6 = vpop.xlane.xlu0 %3546 }
0x1cdd   :  { %5427 = vrcp.f32 %v3547_v6 }
0x1ce0   :  { %v5267_v19 = vpop.permute.xlu0 %5266 }
0x1ce1   :  { %v5269_v32 = vunpack.i.h.bf16 %v5267_v19  ;;  %v5268_v20 = vunpack.i.l.bf16 %v5267_v19 }
0x1ce3   :  { %v5079_v28 = vpack.c.bf16 %v5269_v32, %v5268_v20  ;;  %v5426_v30 = vpop.eup %5425 }
0x1ce4   :  { %v3554_v53 = vmul.f32 %v5426_v30, %v5422_v8  ;;  %v3966_v30 = vld [vmem:[#allocation7 + $0x38] sm:$0xff] }
0x1ce5   :  { %5081 = vmatprep.subr.msk.bf16.mxu0 %vm5883_vm3, %v5079_v28 }
0x1ce7   :  { %v5428_v21 = vpop.eup %5427 }
0x1ce8   :  { %v3553_v17 = vmul.f32 %v5428_v21, %v5424_v42 }
0x1cea   :  { %4868 = vmatprep.mubr.msk.f32.mxu0 %vm602_vm2, %v3553_v17 }
0x1ceb   :  { %4869 = vmatmul.mubr.msk.f32.vlgmr.msra.gmra.mrb[28].mxu0 %vm602_vm2, %v3554_v53 }
0x1cec   :  { %5084 = vmatpush3.bf16.xpose.msk.msra.mxu0 %vm5883_vm3, %v5079_v28  ;;  %4875 = vmatprep.mubr.msk.f32.mxu0 %vm602_vm2, %v3652_v60 }
0x1cf3   :  { %4876 = vmatmul.mubr.msk.f32.vlgmr.msra.gmra.mrb[30].mxu0 %vm602_vm2, %v3653_v47 }
0x1dbe   :  { %v6384_v18 = vpop.f32.mrb[28].mxu0 }
0x1dbf   :  { %v6386_v51 = vpop.f32.mrb[29].mxu0 }
0x1dc6   :  { %v4877_v34 = vpop.f32.mrb[30].mxu0 }
0x1dc7   :  { %v3744_v39 = vmul.f32 0.25, %v4877_v34  ;;  %v3734_v40 = vpop.f32.mrb[31].mxu0 }
0x1dc8   :  { %v3743_v29 = vmul.f32 0.25, %v3734_v40 }
0x1dc9   :  { %v3748_v43 = vadd.f32 %v3744_v39, %v6222_v23 }
0x1dca   :  { %v3747_v26 = vadd.f32 %v3743_v29, %v6224_v25 }
0x1dcb   :  { %v3752_v44 = vadd.f32 %v3748_v43, %v6168_v61 }
0x1dcc   :  { %v3751_v33 = vadd.f32 %v3747_v26, %v6171_v10 }
0x1dcd   :  { %v3756_v45 = vsel %vm602_vm2, %v3752_v44, -inf }
0x1dce   :  { %3757 = vmax.xlane.f32.xlu0 %v3756_v45  ;;  %v3753_v36 = vsel %vm602_vm2, %v3751_v33, -inf }
0x1dcf   :  { %3754 = vmax.xlane.f32.xlu1 %v3753_v36 }
0x1de0   :  { %5271 = vrot.lane.b32.xlu1 %v6372_v13, %s5595_s13 }
0x1de4   :  { %3868 = vrot.lane.b32.xlu1 %v3652_v60, %s5594_s11 }
0x1e5b   :  { %v3758_v38 = vpop.xlane.xlu0 %3757 }
0x1e5c   :  { %v3760_v12 = vsub.f32 %v3752_v44, %v3758_v38  ;;  %v3755_v23 = vpop.xlane.xlu1 %3754 }
0x1e5d   :  { %v3759_v49 = vsub.f32 %v3751_v33, %v3755_v23 }
0x1e5e   :  { %v3763_v25 = vmul.f32 1.442695, %v3760_v12 }
0x1e5f   :  { %v3761_v54 = vmul.f32 1.442695, %v3759_v49 }
0x1e60   :  { %5429 = vpow2.f32 %v3763_v25  ;;  %v5272_v61 = vpop.permute.xlu1 %5271  ;;  %v4104_v25 = vld [vmem:[#allocation12] sm:$0xff] }
0x1e61   :  { %5431 = vpow2.f32 %v3761_v54  ;;  %v5274_v10 = vunpack.i.h.bf16 %v5272_v61  ;;  %v5273_v50 = vunpack.i.l.bf16 %v5272_v61  ;;  %v4105_v54 = vld [vmem:[#allocation12 + $0x8] sm:$0xff] }
0x1e62   :  { %v5099_v61 = vpack.c.bf16 %v4105_v54, %v4104_v25 }
0x1e63   :  { %v5085_v4 = vpack.c.bf16 %v5274_v10, %v5273_v50 }
0x1e64   :  { %v3869_v41 = vpop.permute.xlu1 %3868 }
0x1e65   :  { %5086 = vmatprep.subr.bf16.mxu1 %v5085_v4 }
0x1e66   :  { %5088 = vmatpush3.bf16.msra.mxu1 %v5085_v4 }
0x1e6a   :  { %v5430_v58 = vpop.eup %5429 }
0x1e6b   :  { %v5432_v56 = vpop.eup %5431  ;;  %v3768_v37 = vsel %vm602_vm2, %v5430_v58, 0.0 }
0x1e6c   :  { %3769 = vadd.xlane.f32.xlu0 %v3768_v37  ;;  %v3765_v59 = vsel %vm602_vm2, %v5432_v56, 0.0 }
0x1e6d   :  { %3766 = vadd.xlane.f32.xlu1 %v3765_v59 }
0x1e7e   :  { %3870 = vrot.lane.b32.xlu1 %v3653_v47, %s5594_s11 }
0x1e82   :  { %5276 = vrot.lane.b32.xlu0 %v6372_v13, %s5593_s30 }
0x1ef9   :  { %v3770_v5 = vpop.xlane.xlu0 %3769 }
0x1efa   :  { %5433 = vrcp.f32 %v3770_v5  ;;  %v3767_v3 = vpop.xlane.xlu1 %3766 }
0x1efb   :  { %5435 = vrcp.f32 %v3767_v3 }
0x1efd   :  { %v5277_v27 = vpop.permute.xlu0 %5276 }
0x1efe   :  { %v5279_v7 = vunpack.i.h.bf16 %v5277_v27  ;;  %v5278_v55 = vunpack.i.l.bf16 %v5277_v27  ;;  %v3871_v47 = vpop.permute.xlu1 %3870 }
0x1f00   :  { %v5089_v8 = vpack.c.bf16 %v5279_v7, %v5278_v55 }
0x1f02   :  { %5091 = vmatprep.subr.msk.bf16.mxu1 %vm5883_vm3, %v5089_v8 }
0x1f04   :  { %v5434_v46 = vpop.eup %5433 }
0x1f05   :  { %v5436_v42 = vpop.eup %5435  ;;  %v3774_v60 = vmul.f32 %v5434_v46, %v5430_v58 }
0x1f06   :  { %v3773_v31 = vmul.f32 %v5436_v42, %v5432_v56 }
0x1f08   :  { %4882 = vmatprep.mubr.msk.f32.mxu1 %vm602_vm2, %v3773_v31 }
0x1f09   :  { %4883 = vmatmul.mubr.msk.f32.vlgmr.msra.gmra.mrb[42].mxu1 %vm602_vm2, %v3774_v60 }
0x1f0a   :  { %5094 = vmatpush3.bf16.xpose.msk.msra.mxu1 %vm5883_vm3, %v5089_v8  ;;  %4889 = vmatprep.mubr.msk.f32.mxu1 %vm602_vm2, %v3869_v41 }
0x1f11   :  { %4890 = vmatmul.mubr.msk.f32.vlgmr.msra.gmra.mrb[44].mxu1 %vm602_vm2, %v3871_v47 }
0x1fdc   :  { %v4884_v62 = vpop.f32.mrb[42].mxu1 }
0x1fdd   :  { %3863 = vst.msk [vmem:[#allocation3 + $0x78] sm:$0xff] %vm602_vm2, %v4884_v62  ;;  %v3853_v6 = vpop.f32.mrb[43].mxu1 }
0x1fde   :  { %3862 = vst.msk [vmem:[#allocation3 + $0x70] sm:$0xff] %vm602_vm2, %v3853_v6 }
0x1fe4   :  { %v4891_v19 = vpop.f32.mrb[44].mxu1 }
0x1fe5   :  { %v3960_v32 = vmul.f32 0.25, %v4891_v19  ;;  %v3950_v20 = vpop.f32.mrb[45].mxu1 }
0x1fe6   :  { %v3959_v28 = vmul.f32 0.25, %v3950_v20 }
0x1fe7   :  { %v3964_v21 = vadd.f32 %v3960_v32, %v6254_v52 }
0x1fe8   :  { %v3963_v17 = vadd.f32 %v3959_v28, %v6256_v15 }
0x1fe9   :  { %v3968_v53 = vadd.f32 %v3966_v30, %v3964_v21  ;;  %v4458_v30 = vld [vmem:[%s6526_s8] ss:$0 sm:$0xff]  ;;  %s5598_s8 = smov [#allocation13]  }
0x1fea   :  { %v3967_v34 = vadd.f32 %v3965_v35, %v3963_v17  ;;  %s4329_s15 = sshll.u32 %s5598_s8, 4  ;;  %s4330_s15 = int_to_ptr.vmem [resolvable:$true] %s4329_s15 }
0x1feb   :  { %v3972_v39 = vsel %vm602_vm2, %v3968_v53, -inf  ;;  %s5555_s16 = scalar_lea.vmem %s4330_s15, 2048  ;;  %p5560_p13 = scmp.lt.s32.totalorder %s4330_s15, %s4330_s15 }
0x1fec   :  { %3973 = vmax.xlane.f32.xlu0 %v3972_v39  ;;  %v3969_v40 = vsel %vm602_vm2, %v3967_v34, -inf  ;;  %p5556_p12 = scmp.ne.s32.totalorder %s4330_s15, %s5555_s16  ;;  %p5561_p0 = scmp.lt.s32.totalorder %s5555_s16, %s5555_s16 }
0x1fed   :  { %3970 = vmax.xlane.f32.xlu1 %v3969_v40 }
0x1fee   :  { %p5562_p1 = por %p5561_p0, %p5560_p13 }
0x1ff0   :  { %p5563_p2 = pnand %p5562_p1, %p5556_p12 }
0x1ffe   :  { %5281 = vrot.lane.b32.xlu1 %v6372_v13, %s5596_s1 }
0x2002   :  { %1026 = vrot.lane.b32.xlu1 %v6062_v14, %s5597_s10 }
0x2006   :  { %1462 = vrot.lane.b32.xlu1 %v6138_v11, %s5597_s10 }
0x200a   :  { %1464 = vrot.lane.b32.xlu1 %v6136_v9, %s5597_s10 }
0x200e   :  { %1901 = vrot.lane.b32.xlu1 %v6164_v1, %s5597_s10 }
0x2012   :  { %2338 = vrot.lane.b32.xlu1 %v6218_v22, %s5597_s10 }
0x2016   :  { %2774 = vrot.lane.b32.xlu1 %v6280_v63, %s5597_s10 }
0x201a   :  { %3210 = vrot.lane.b32.xlu1 %v6330_v16, %s5597_s10 }
0x201e   :  { %3646 = vrot.lane.b32.xlu1 %v6384_v18, %s5597_s10 }
0x2079   :  { %v3974_v14 = vpop.xlane.xlu0 %3973 }
0x207a   :  { %v3976_v11 = vsub.f32 %v3968_v53, %v3974_v14  ;;  %v3971_v52 = vpop.xlane.xlu1 %3970 }
0x207b   :  { %v3975_v15 = vsub.f32 %v3967_v34, %v3971_v52 }
0x207c   :  { %v3979_v9 = vmul.f32 1.442695, %v3976_v11 }
0x207d   :  { %v3977_v13 = vmul.f32 1.442695, %v3975_v15 }
0x207e   :  { %v5282_v29 = vpop.permute.xlu1 %5281 }
0x207f   :  { %5437 = vpow2.f32 %v3977_v13  ;;  %v5284_v1 = vunpack.i.h.bf16 %v5282_v29  ;;  %v5283_v43 = vunpack.i.l.bf16 %v5282_v29 }
0x2080   :  { %5439 = vpow2.f32 %v3979_v9 }
0x2081   :  { %v5095_v22 = vpack.c.bf16 %v5284_v1, %v5283_v43 }
0x2082   :  { %v1027_v63 = vpop.permute.xlu1 %1026 }
0x2083   :  { %1032 = vst.msk [vmem:[#allocation3 + $0x8] sm:$0xff] %vm1030_vm4, %v1027_v63  ;;  %5096 = vmatprep.subr.bf16.mxu0 %v5095_v22 }
0x2084   :  { %5098 = vmatpush3.bf16.msra.mxu0 %v5095_v22 }
0x2085   :  { %5100 = vmatprep.subr.bf16.mxu0 %v5099_v61 }
0x2086   :  { %v1463_v16 = vpop.permute.xlu1 %1462 }
0x2087   :  { %1468 = vst.msk [vmem:[#allocation3 + $0x10] sm:$0xff] %vm1030_vm4, %v1463_v16 }
0x2089   :  { %v5438_v18 = vpop.eup %5437 }
0x208a   :  { %v1465_v26 = vpop.permute.xlu1 %1464  ;;  %v3981_v44 = vsel %vm602_vm2, %v5438_v18, 0.0  ;;  %v5440_v33 = vpop.eup %5439  ;;  %v4089_v3 = vld [vmem:[#allocation3 + $0x8] sm:$0xff] }
0x208b   :  { %1469 = vst.msk [vmem:[#allocation3 + $0x18] sm:$0xff] %vm1030_vm4, %v1465_v26  ;;  %3982 = vadd.xlane.f32.xlu0 %v3981_v44  ;;  %v3984_v36 = vsel %vm602_vm2, %v5440_v33, 0.0 }
0x208e   :  { %v1902_v45 = vpop.permute.xlu1 %1901  ;;  %v4090_v27 = vld [vmem:[#allocation3 + $0x10] sm:$0xff] }
0x208f   :  { %1906 = vst.msk [vmem:[#allocation3 + $0x28] sm:$0xff] %vm1030_vm4, %v1902_v45  ;;  %3985 = vadd.xlane.f32.xlu0 %v3984_v36 }
0x2092   :  { %v2339_v38 = vpop.permute.xlu1 %2338  ;;  %v4091_v55 = vld [vmem:[#allocation3 + $0x18] sm:$0xff] }
0x2093   :  { %2343 = vst.msk [vmem:[#allocation3 + $0x38] sm:$0xff] %vm1030_vm4, %v2339_v38 }
0x2096   :  { %v2775_v12 = vpop.permute.xlu1 %2774  ;;  %v4093_v46 = vld [vmem:[#allocation3 + $0x28] sm:$0xff] }
0x2097   :  { %2779 = vst.msk [vmem:[#allocation3 + $0x48] sm:$0xff] %vm1030_vm4, %v2775_v12 }
0x209a   :  { %v3211_v23 = vpop.permute.xlu1 %3210  ;;  %v4095_v31 = vld [vmem:[#allocation3 + $0x38] sm:$0xff] }
0x209b   :  { %3215 = vst.msk [vmem:[#allocation3 + $0x58] sm:$0xff] %vm1030_vm4, %v3211_v23 }
0x209e   :  { %v3647_v49 = vpop.permute.xlu1 %3646  ;;  %v4097_v47 = vld [vmem:[#allocation3 + $0x48] sm:$0xff] }
0x209f   :  { %3651 = vst.msk [vmem:[#allocation3 + $0x68] sm:$0xff] %vm1030_vm4, %v3647_v49 }
0x20a2   :  { %v4099_v6 = vld [vmem:[#allocation3 + $0x58] sm:$0xff] }
0x20a5   :  { %1024 = vrot.lane.b32.xlu0 %v6064_v0, %s5597_s10 }
0x20a6   :  { %v4101_v32 = vld [vmem:[#allocation3 + $0x68] sm:$0xff] }
0x20a9   :  { %1899 = vrot.lane.b32.xlu0 %v6166_v57, %s5597_s10 }
0x20ad   :  { %2336 = vrot.lane.b32.xlu0 %v6220_v24, %s5597_s10  ;;  %v4106_v24 = vld [vmem:[#allocation12 + $0x10] sm:$0xff] }
0x20b1   :  { %2772 = vrot.lane.b32.xlu0 %v6282_v2, %s5597_s10  ;;  %v4107_v2 = vld [vmem:[#allocation12 + $0x18] sm:$0xff] }
0x20b5   :  { %3208 = vrot.lane.b32.xlu0 %v6332_v48, %s5597_s10 }
0x20b9   :  { %3644 = vrot.lane.b32.xlu0 %v6386_v51, %s5597_s10  ;;  %v5103_v51 = vpack.c.bf16 %v4107_v2, %v4106_v24 }
0x2118   :  { %v3983_v0 = vpop.xlane.xlu0 %3982 }
0x2119   :  { %5441 = vrcp.f32 %v3983_v0 }
0x211c   :  { %v3986_v10 = vpop.xlane.xlu0 %3985 }
0x211d   :  { %5443 = vrcp.f32 %v3986_v10 }
0x2120   :  { %v1025_v50 = vpop.permute.xlu0 %1024 }
0x2121   :  { %1031 = vst.msk [vmem:[#allocation3] sm:$0xff] %vm1030_vm4, %v1025_v50 }
0x2123   :  { %v5442_v57 = vpop.eup %5441 }
0x2124   :  { %v1900_v4 = vpop.permute.xlu0 %1899  ;;  %v3989_v58 = vmul.f32 %v5442_v57, %v5438_v18 }
0x2125   :  { %1905 = vst.msk [vmem:[#allocation3 + $0x20] sm:$0xff] %vm1030_vm4, %v1900_v4 }
0x2126   :  { %4896 = vmatprep.mubr.msk.f32.mxu0 %vm602_vm2, %v3989_v58 }
0x2127   :  { %v5444_v48 = vpop.eup %5443 }
0x2128   :  { %v3990_v56 = vmul.f32 %v5444_v48, %v5440_v33  ;;  %v2337_v37 = vpop.permute.xlu0 %2336  ;;  %v4088_v59 = vld [vmem:[#allocation3] sm:$0xff] }
0x2129   :  { %2342 = vst.msk [vmem:[#allocation3 + $0x30] sm:$0xff] %vm1030_vm4, %v2337_v37 }
0x212a   :  { %4897 = vmatmul.mubr.msk.f32.vlgmr.msra.gmra.mrb[32].mxu0 %vm602_vm2, %v3990_v56 }
0x212b   :  { %5102 = vmatpush3.bf16.msra.mxu0 %v5099_v61  ;;  %4907 = vmatprep.mubr.msk.f32.mxu0 %vm119_vm0, %v4088_v59 }
0x212c   :  { %v2773_v41 = vpop.permute.xlu0 %2772  ;;  %5104 = vmatprep.subr.bf16.mxu0 %v5103_v51  ;;  %v4092_v8 = vld [vmem:[#allocation3 + $0x20] sm:$0xff] }
0x212d   :  { %2778 = vst.msk [vmem:[#allocation3 + $0x40] sm:$0xff] %vm1030_vm4, %v2773_v41 }
0x212f   :  { %5106 = vmatpush3.bf16.msra.mxu0 %v5103_v51 }
0x2130   :  { %v3209_v5 = vpop.permute.xlu0 %3208  ;;  %v4094_v42 = vld [vmem:[#allocation3 + $0x30] sm:$0xff] }
0x2131   :  { %3214 = vst.msk [vmem:[#allocation3 + $0x50] sm:$0xff] %vm1030_vm4, %v3209_v5 }
0x2132   :  { %4908 = vmatmul.mubr.msk.f32.vlgmr.msra.gmra.mrb[34].mxu0 %vm119_vm0, %v4089_v3 }
0x2133   :  { %4910 = vmatprep.mubr.msk.f32.mxu0 %vm119_vm0, %v4090_v27 }
0x2134   :  { %v3645_v7 = vpop.permute.xlu0 %3644  ;;  %v4096_v60 = vld [vmem:[#allocation3 + $0x40] sm:$0xff] }
0x2135   :  { %3650 = vst.msk [vmem:[#allocation3 + $0x60] sm:$0xff] %vm1030_vm4, %v3645_v7 }
0x2136   :  { %4911 = vmatmul.mubr.msk.f32.gmra.mrb[36].mxu0 %vm119_vm0, %v4091_v55 }
0x2137   :  { %4913 = vmatprep.mubr.msk.f32.mxu0 %vm119_vm0, %v4092_v8 }
0x2138   :  { %v4098_v62 = vld [vmem:[#allocation3 + $0x50] sm:$0xff] }
0x213a   :  { %4914 = vmatmul.mubr.msk.f32.gmra.mrb[38].mxu0 %vm119_vm0, %v4093_v46 }
0x213b   :  { %4916 = vmatprep.mubr.msk.f32.mxu0 %vm119_vm0, %v4094_v42 }
0x213c   :  { %v4100_v19 = vld [vmem:[#allocation3 + $0x60] sm:$0xff] }
0x213e   :  { %4917 = vmatmul.mubr.msk.f32.gmra.mrb[40].mxu0 %vm119_vm0, %v4095_v31 }
0x213f   :  { %4919 = vmatprep.mubr.msk.f32.mxu0 %vm119_vm0, %v4096_v60 }
0x2142   :  { %4920 = vmatmul.mubr.msk.f32.gmra.mrb[42].mxu0 %vm119_vm0, %v4097_v47 }
0x2143   :  { %4922 = vmatprep.mubr.msk.f32.mxu0 %vm119_vm0, %v4098_v62 }
0x2146   :  { %4923 = vmatmul.mubr.msk.f32.gmra.mrb[44].mxu0 %vm119_vm0, %v4099_v6 }
0x2147   :  { %4925 = vmatprep.mubr.msk.f32.mxu0 %vm119_vm0, %v4100_v19 }
0x214a   :  { %4926 = vmatmul.mubr.msk.f32.gmra.mrb[46].mxu0 %vm119_vm0, %v4101_v32 }
0x21fd   :  { %v4898_v20 = vpop.f32.mrb[32].mxu0 }
0x21fe   :  { %4082 = vrot.lane.b32.xlu1 %v4898_v20, %s5597_s10  ;;  %v4069_v28 = vpop.f32.mrb[33].mxu0 }
0x21ff   :  { %4080 = vrot.lane.b32.xlu0 %v4069_v28, %s5597_s10 }
0x2205   :  { %v4909_v21 = vpop.f32.mrb[34].mxu0 }
0x2206   :  { %v4235_v35 = vadd.f32 %v4909_v21, %v4458_v30  ;;  %v4229_v17 = vpop.f32.mrb[35].mxu0 }
0x2207   :  { %v4230_v53 = vadd.f32 %v4458_v30, %v4229_v17 }
0x2208   :  { %4309 = vst.msk [vmem:[#allocation13 + $0x8] sm:$0xff] %vm119_vm0, %v4235_v35 }
0x2209   :  { %4308 = vst.msk [vmem:[#allocation13] sm:$0xff] %vm119_vm0, %v4230_v53  ;;  %v4912_v34 = vpop.f32.mrb[36].mxu0 }
0x220a   :  { %v4245_v39 = vadd.f32 %v4912_v34, %v4458_v30  ;;  %v4239_v40 = vpop.f32.mrb[37].mxu0 }
0x220b   :  { %v4240_v14 = vadd.f32 %v4458_v30, %v4239_v40 }
0x220c   :  { %4311 = vst.msk [vmem:[#allocation13 + $0x18] sm:$0xff] %vm119_vm0, %v4245_v39 }
0x220d   :  { %4310 = vst.msk [vmem:[#allocation13 + $0x10] sm:$0xff] %vm119_vm0, %v4240_v14  ;;  %v4915_v11 = vpop.f32.mrb[38].mxu0 }
0x220e   :  { %v4255_v52 = vadd.f32 %v4915_v11, %v4458_v30  ;;  %v4249_v15 = vpop.f32.mrb[39].mxu0 }
0x220f   :  { %v4250_v9 = vadd.f32 %v4458_v30, %v4249_v15 }
0x2210   :  { %4313 = vst.msk [vmem:[#allocation13 + $0x28] sm:$0xff] %vm119_vm0, %v4255_v52 }
0x2211   :  { %4312 = vst.msk [vmem:[#allocation13 + $0x20] sm:$0xff] %vm119_vm0, %v4250_v9  ;;  %v4918_v13 = vpop.f32.mrb[40].mxu0 }
0x2212   :  { %v4265_v29 = vadd.f32 %v4918_v13, %v4458_v30  ;;  %v4259_v1 = vpop.f32.mrb[41].mxu0 }
0x2213   :  { %v4260_v43 = vadd.f32 %v4458_v30, %v4259_v1 }
0x2214   :  { %4315 = vst.msk [vmem:[#allocation13 + $0x38] sm:$0xff] %vm119_vm0, %v4265_v29 }
0x2215   :  { %4314 = vst.msk [vmem:[#allocation13 + $0x30] sm:$0xff] %vm119_vm0, %v4260_v43  ;;  %v4921_v22 = vpop.f32.mrb[42].mxu0 }
0x2216   :  { %v4275_v63 = vadd.f32 %v4921_v22, %v4458_v30  ;;  %v4269_v16 = vpop.f32.mrb[43].mxu0 }
0x2217   :  { %v4270_v18 = vadd.f32 %v4458_v30, %v4269_v16 }
0x2218   :  { %4317 = vst.msk [vmem:[#allocation13 + $0x48] sm:$0xff] %vm119_vm0, %v4275_v63 }
0x2219   :  { %4316 = vst.msk [vmem:[#allocation13 + $0x40] sm:$0xff] %vm119_vm0, %v4270_v18  ;;  %v4924_v26 = vpop.f32.mrb[44].mxu0 }
0x221a   :  { %v4285_v44 = vadd.f32 %v4924_v26, %v4458_v30  ;;  %v4279_v33 = vpop.f32.mrb[45].mxu0 }
0x221b   :  { %v4280_v45 = vadd.f32 %v4458_v30, %v4279_v33 }
0x221c   :  { %4319 = vst.msk [vmem:[#allocation13 + $0x58] sm:$0xff] %vm119_vm0, %v4285_v44 }
0x221d   :  { %4318 = vst.msk [vmem:[#allocation13 + $0x50] sm:$0xff] %vm119_vm0, %v4280_v45  ;;  %v4927_v36 = vpop.f32.mrb[46].mxu0 }
0x221e   :  { %v4295_v38 = vadd.f32 %v4927_v36, %v4458_v30  ;;  %v4289_v12 = vpop.f32.mrb[47].mxu0 }
0x221f   :  { %v4290_v23 = vadd.f32 %v4458_v30, %v4289_v12 }
0x2220   :  { %4321 = vst.msk [vmem:[#allocation13 + $0x68] sm:$0xff] %vm119_vm0, %v4295_v38 }
0x2221   :  { %4320 = vst.msk [vmem:[#allocation13 + $0x60] sm:$0xff] %vm119_vm0, %v4290_v23 }
0x2270   :  { %v4083_v49 = vpop.permute.xlu1 %4082 }
0x2271   :  { %4087 = vst.msk [vmem:[#allocation3 + $0x78] sm:$0xff] %vm1030_vm4, %v4083_v49  ;;  %v4081_v25 = vpop.permute.xlu0 %4080 }
0x2272   :  { %4086 = vst.msk [vmem:[#allocation3 + $0x70] sm:$0xff] %vm1030_vm4, %v4081_v25 }
0x2278   :  { %v4103_v61 = vld [vmem:[#allocation3 + $0x78] sm:$0xff] }
0x2279   :  { %v4102_v54 = vld [vmem:[#allocation3 + $0x70] sm:$0xff] }
0x227a   :  { %4928 = vmatprep.mubr.msk.f32.mxu0 %vm119_vm0, %v4102_v54 }
0x227b   :  { %4929 = vmatmul.mubr.msk.f32.gmra.mrb[48].mxu0 %vm119_vm0, %v4103_v61 }
0x234e   :  { %v4930_v0 = vpop.f32.mrb[48].mxu0 }
0x234f   :  { %v4305_v10 = vadd.f32 %v4930_v0, %v4458_v30  ;;  %v4299_v50 = vpop.f32.mrb[49].mxu0 }
0x2350   :  { %v4300_v57 = vadd.f32 %v4458_v30, %v4299_v50 }
0x2351   :  { %4323 = vst.msk [vmem:[#allocation13 + $0x78] sm:$0xff] %vm119_vm0, %v4305_v10 }
0x2352   :  { %4322 = vst.msk [vmem:[#allocation13 + $0x70] sm:$0xff] %vm119_vm0, %v4300_v57 }
0x2353   :  { %5566 = shalt.err (!%p5563_p2)
}
0x2354   :  { %s5567_s20 = scalar_lea.hbm %s6527_s9, 2048 }
0x2355   :  { %p5568_p3 = scmp.ne.s32.totalorder %s6527_s9, %s5567_s20  ;;  %p5571_p4 = scmp.lt.u32.totalorder %s5567_s20, %s6527_s9 }
0x2357   :  { %p5573_p5 = pnand %p5571_p4, %p5568_p3 }
0x2359   :  { %5576 = shalt.err (!%p5573_p5)
}
0x235a   :  { %4335 = dma.vmem_to_hbm [thread:$0]  %s4330_s15, 2048, %s6527_s9, [#allocation6], %s5587_s21, %s5587_s21, %s5588_s22  }
0x235b   :  { %5583 = dma.done.wait [#allocation6], 2048  }
0x235c   :  { %5584 = vsyncadd [#allocation6], 4294965248 }
0x235d   :  { %4339 = vsyncpa [#allocation5], 1 }
0x235e   :  { %4340 = vsyncpa [#allocation8], 1 }
0x235f   :  { %4341 = vsyncpa [#allocation11], 1 }
0x2360   :  { %4342 = vsyncpa [#allocation6], 1 }

</bundles_post_ra>
